<compile_context>
chip_gen: v7x
topology: tpu7x:2x2x1
jax: 0.10.0
libtpu: 0.0.40
codegen_flags: <defaults>
</compile_context>

<pallas_src>
import functools
import math

import jax
import jax.numpy as jnp
from jax import lax
from jax.experimental import pallas as pl
from jax.experimental.pallas import tpu as pltpu


def _round_up(x, m):
    return (x + m - 1) // m * m


def _cdiv(a, b):
    return (a + b - 1) // b


# ---------------------------------------------------------------------------
# Kernel 1: tiled   y = x @ w + b (+ residual) (* multiplier)
#           bf16 MXU inputs, f32 accumulate, epilogue fusions
# ---------------------------------------------------------------------------

def _mm_bias_kernel(x_ref, w_ref, b_ref, o_ref):
    acc = jnp.dot(x_ref[...], w_ref[...], preferred_element_type=jnp.float32)
    o_ref[...] = (acc + b_ref[...]).astype(o_ref.dtype)


def _mm_bias_res_kernel(x_ref, w_ref, b_ref, r_ref, o_ref):
    acc = jnp.dot(x_ref[...], w_ref[...], preferred_element_type=jnp.float32)
    o_ref[...] = (acc + b_ref[...] + r_ref[...]).astype(o_ref.dtype)


def _mm_bias_res_mul_kernel(x_ref, w_ref, b_ref, r_ref, m_ref, f_ref, p_ref):
    acc = jnp.dot(x_ref[...], w_ref[...], preferred_element_type=jnp.float32)
    y = acc + b_ref[...] + r_ref[...]          # f32:  conv(x) + b + residual
    f_ref[...] = y.astype(f_ref.dtype)         # e.g. F1n  (bf16)
    p_ref[...] = (y * m_ref[...]).astype(p_ref.dtype)   # e.g. Fn*F1n  (f32)


def matmul_bias(x, w, b, residual=None, multiplier=None, *,
                out_dtype=jnp.float32, tile_m=512):
    """x: [M, K], w: [K, N], b: [N]; residual/multiplier optional [M, N].

    Returns [M, N] (out_dtype), or (F, P) with P = (x@w+b+residual)*multiplier (f32).
    Blocks span the full K and N dims (no padding / no output slicing needed).
    """
    m, k = x.shape
    k2, n = w.shape
    assert k == k2 and b.shape == (n,)
    if multiplier is not None:
        assert residual is not None

    # >= 2 M tiles whenever possible (v7x megacore split + DMA/compute overlap),
    # capped at tile_m rows per tile.
    tm = min(tile_m, max(8, _round_up(_cdiv(m, 2), 8)))
    m_pad = _round_up(m, tm)
    grid = (m_pad // tm,)

    def pad_rows(t):
        return t if m_pad == m else jnp.pad(t, ((0, m_pad - m), (0, 0)))

    x_p = pad_rows(x.astype(jnp.bfloat16))
    w_p = w.astype(jnp.bfloat16)
    b_p = b.astype(jnp.float32).reshape(1, n)

    in_specs = [
        pl.BlockSpec((tm, k), lambda i: (i, 0)),    # streamed M tiles (pipelined)
        pl.BlockSpec((k, n), lambda i: (0, 0)),     # weight VMEM-resident across grid
        pl.BlockSpec((1, n), lambda i: (0, 0)),     # bias  VMEM-resident
    ]
    args = [x_p, w_p, b_p]
    row_spec = pl.BlockSpec((tm, n), lambda i: (i, 0))

    if residual is None:
        kernel = _mm_bias_kernel
        out_shape = jax.ShapeDtypeStruct((m_pad, n), out_dtype)
        out_specs = row_spec
    elif multiplier is None:
        kernel = _mm_bias_res_kernel
        in_specs.append(row_spec)
        args.append(pad_rows(residual.astype(jnp.float32)))
        out_shape = jax.ShapeDtypeStruct((m_pad, n), out_dtype)
        out_specs = row_spec
    else:
        kernel = _mm_bias_res_mul_kernel
        in_specs += [row_spec, row_spec]
        args += [pad_rows(residual.astype(jnp.float32)),
                 pad_rows(multiplier.astype(jnp.float32))]
        out_shape = (jax.ShapeDtypeStruct((m_pad, n), out_dtype),
                     jax.ShapeDtypeStruct((m_pad, n), jnp.float32))
        out_specs = (row_spec, row_spec)

    out = pl.pallas_call(
        kernel,
        out_shape=out_shape,
        grid=grid,
        in_specs=in_specs,
        out_specs=out_specs,
        compiler_params=pltpu.CompilerParams(
            dimension_semantics=("parallel",)),
    )(*args)

    if multiplier is not None:
        return out[0][:m], out[1][:m]
    return out[:m]


# ---------------------------------------------------------------------------
# 3x3 conv (stride 1, pad 1), NHWC, bias (+ fused residual / product)
# ---------------------------------------------------------------------------

def conv3x3_nhwc(x, w_oihw, b, residual=None, multiplier=None, *,
                 out_dtype=jnp.float32):
    """x: [N,H,W,Cin]; w_oihw: [Cout,Cin,3,3] (PyTorch layout); b: [Cout]."""
    # TODO(synk): for large H*W replace the im2col materialization (9x input bytes)
    # with a 9-tap reduction grid axis over a haloed NHWC block.
    n, h, w, c = x.shape
    c_out = w_oihw.shape[0]
    xp = jnp.pad(x, ((0, 0), (1, 1), (1, 1), (0, 0)))
    taps = [xp[:, ki:ki + h, kj:kj + w, :] for ki in range(3) for kj in range(3)]
    patches = jnp.concatenate(taps, axis=-1).reshape(n * h * w, 9 * c)    # tap-major K
    w_mat = jnp.transpose(w_oihw, (2, 3, 1, 0)).reshape(9 * c, c_out)     # same K order
    res = None if residual is None else residual.reshape(n * h * w, c_out)
    mul = None if multiplier is None else multiplier.reshape(n * h * w, c_out)
    y = matmul_bias(patches, w_mat, b, residual=res, multiplier=mul,
                    out_dtype=out_dtype)
    if multiplier is not None:
        return y[0].reshape(n, h, w, c_out), y[1].reshape(n, h, w, c_out)
    return y.reshape(n, h, w, c_out)


# ---------------------------------------------------------------------------
# Kernel 2: attention core — all heads of one (module, batch) per grid step
# ---------------------------------------------------------------------------

def _attention_kernel(q_ref, kt_ref, v_ref, o_ref, *, scale):
    q = q_ref[0]           # [nh, L, hd]  bf16
    kt = kt_ref[0]         # [nh, hd, L]  bf16 (pre-transposed in the wrapper)
    v = v_ref[0]           # [nh, L, hd]  bf16
    s = lax.dot_general(q, kt, (((2,), (1,)), ((0,), (0,))),
                        preferred_element_type=jnp.float32) * scale      # [nh, L, L]
    s = s - jnp.max(s, axis=-1, keepdims=True)
    e = jnp.exp(s)
    p = e * pl.reciprocal(jnp.sum(e, axis=-1, keepdims=True), approx=True)
    o = lax.dot_general(p.astype(jnp.bfloat16), v, (((2,), (1,)), ((0,), (0,))),
                        preferred_element_type=jnp.float32)              # [nh, L, hd]
    o_ref[0] = o.astype(o_ref.dtype)


# ---------------------------------------------------------------------------
# Full module forward (NCHW in / NCHW out, matching the PyTorch spec)
# ---------------------------------------------------------------------------

@functools.partial(jax.jit, static_argnames=("num_heads",))
def multilevel_visual_collab(F_c, F2, F3, params, *, num_heads=8):
    B, C, H, W = F_c.shape
    L = H * W
    M = B * L
    hd = C // num_heads
    scale = 1.0 / math.sqrt(hd)

    def to_rows(x):                       # NCHW -> [B*HW, C]  (== flatten(2).permute)
        return jnp.transpose(x, (0, 2, 3, 1)).reshape(M, C)

    fc_rows, f2_rows, f3_rows = to_rows(F_c), to_rows(F2), to_rows(F3)

    in_w1, in_b1 = params["mhsa1_in_w"], params["mhsa1_in_b"]
    in_w2, in_b2 = params["mhsa2_in_w"], params["mhsa2_in_b"]

    # --- fused projections -------------------------------------------------
    # both attentions' q projections consume F_c -> one [C, 2C] matmul
    wq = jnp.concatenate([in_w1[:C].T, in_w2[:C].T], axis=1)
    bq = jnp.concatenate([in_b1[:C], in_b2[:C]])
    q_both = matmul_bias(fc_rows, wq, bq, out_dtype=jnp.bfloat16)         # [M, 2C]
    # per attention: fused k|v projection
    wkv1 = jnp.concatenate([in_w1[C:2 * C].T, in_w1[2 * C:].T], axis=1)
    kv1 = matmul_bias(f2_rows, wkv1, in_b1[C:], out_dtype=jnp.bfloat16)   # [M, 2C]
    wkv2 = jnp.concatenate([in_w2[C:2 * C].T, in_w2[2 * C:].T], axis=1)
    kv2 = matmul_bias(f3_rows, wkv2, in_b2[C:], out_dtype=jnp.bfloat16)   # [M, 2C]

    # --- attention core: both modules batched along the grid ----------------
    def heads(t):                         # [M, C] -> [B, nh, L, hd]
        return t.reshape(B, L, num_heads, hd).transpose(0, 2, 1, 3)

    qh = jnp.concatenate([heads(q_both[:, :C]), heads(q_both[:, C:])], axis=0)
    kh = jnp.concatenate([heads(kv1[:, :C]), heads(kv2[:, :C])], axis=0)
    vh = jnp.concatenate([heads(kv1[:, C:]), heads(kv2[:, C:])], axis=0)
    kt = kh.transpose(0, 1, 3, 2)                                         # [2B, nh, hd, L]

    blk_q = pl.BlockSpec((1, num_heads, L, hd), lambda i: (i, 0, 0, 0))
    blk_k = pl.BlockSpec((1, num_heads, hd, L), lambda i: (i, 0, 0, 0))
    attn = pl.pallas_call(
        functools.partial(_attention_kernel, scale=scale),
        out_shape=jax.ShapeDtypeStruct((2 * B, num_heads, L, hd), jnp.bfloat16),
        grid=(2 * B,),
        in_specs=[blk_q, blk_k, blk_q],
        out_specs=blk_q,
        compiler_params=pltpu.CompilerParams(
            dimension_semantics=("parallel",)),
    )(qh, kt, vh)

    # merge heads and lay the two modules side by side along channels
    attn_cat = (attn.reshape(2, B, num_heads, L, hd)
                    .transpose(1, 3, 0, 2, 4)          # [B, L, 2, nh, hd]
                    .reshape(M, 2 * C))                # row = [attn1 | attn2]

    # fused output projections + (Fn1 + Fn2) in one matmul
    wo = jnp.concatenate([params["mhsa1_out_w"].T, params["mhsa2_out_w"].T], axis=0)
    bo = params["mhsa1_out_b"] + params["mhsa2_out_b"]
    Fn = matmul_bias(attn_cat, wo, bo).reshape(B, H, W, C)                # f32

    # --- refine blocks (products fused into conv epilogues) -----------------
    def refine_fused(x, pfx, mult):
        # F = Sequential(conv3x3, conv3x3)(x) + x ;  P = F * mult  (both in one kernel)
        h1 = conv3x3_nhwc(x, params[f"{pfx}_w1"], params[f"{pfx}_b1"],
                          out_dtype=jnp.bfloat16)
        return conv3x3_nhwc(h1, params[f"{pfx}_w2"], params[f"{pfx}_b2"],
                            residual=x, multiplier=mult, out_dtype=jnp.bfloat16)

    F1n, P2 = refine_fused(Fn, "refine1", Fn)          # F1n bf16, P2 = Fn*F1n f32
    F2n, P3 = refine_fused(P2, "refine2", Fn)          # F2n bf16, P3 = Fn*F2n f32
    h3 = conv3x3_nhwc(P3, params["refine3_w1"], params["refine3_b1"],
                      out_dtype=jnp.bfloat16)
    F3n = conv3x3_nhwc(h3, params["refine3_w2"], params["refine3_b2"],
                       residual=P3, out_dtype=jnp.bfloat16)

    F_cat = jnp.concatenate([F1n, F2n, F3n], axis=-1)                     # [B,H,W,3C]
    Fv = conv3x3_nhwc(F_cat, params["fusion_w"], params["fusion_b"])
    return jnp.transpose(Fv, (0, 3, 1, 2))                                # back to NCHW


# ---------------------------------------------------------------------------
# Pure-JAX reference (same bf16-matmul-input / f32-accumulate policy)
# ---------------------------------------------------------------------------

def _reference(F_c, F2, F3, params, num_heads=8):
    bf = jnp.bfloat16
    B, C, H, W = F_c.shape
    L = H * W
    hd = C // num_heads
    scale = 1.0 / math.sqrt(hd)

    def to_seq(x):
        return jnp.transpose(x, (0, 2, 3, 1)).reshape(B, L, C)

    def linear(x, w, b):                   # w in PyTorch [out, in] layout
        return jnp.einsum("...k,nk->...n", x.astype(bf), w.astype(bf),
                          preferred_element_type=jnp.float32) + b

    def mhsa_ref(q_in, kv_in, in_w, in_b, out_w, out_b):
        q = linear(q_in, in_w[:C], in_b[:C])
        k = linear(kv_in, in_w[C:2 * C], in_b[C:2 * C])
        v = linear(kv_in, in_w[2 * C:], in_b[2 * C:])

        def heads(t):
            return t.reshape(B, L, num_heads, hd).transpose(0, 2, 1, 3)

        qh, kh, vh = heads(q), heads(k), heads(v)
        s = jnp.einsum("bhqd,bhkd->bhqk", qh.astype(bf), kh.astype(bf),
                       preferred_element_type=jnp.float32) * scale
        s = s - jnp.max(s, axis=-1, keepdims=True)
        e = jnp.exp(s)
        p = e / jnp.sum(e, axis=-1, keepdims=True)
        o = jnp.einsum("bhqk,bhkd->bhqd", p.astype(bf), vh.astype(bf),
                       preferred_element_type=jnp.float32)
        o = o.transpose(0, 2, 1, 3).reshape(B, L, C)
        return linear(o, out_w, out_b)

    Fn1 = mhsa_ref(to_seq(F_c), to_seq(F2), params["mhsa1_in_w"], params["mhsa1_in_b"],
                   params["mhsa1_out_w"], params["mhsa1_out_b"])
    Fn2 = mhsa_ref(to_seq(F_c), to_seq(F3), params["mhsa2_in_w"], params["mhsa2_in_b"],
                   params["mhsa2_out_w"], params["mhsa2_out_b"])
    Fn = (Fn1 + Fn2).reshape(B, H, W, C)

    def conv_ref(x, w, b):
        y = jax.lax.conv_general_dilated(
            x.astype(bf), w.astype(bf), window_strides=(1, 1),
            padding=((1, 1), (1, 1)),
            dimension_numbers=("NHWC", "OIHW", "NHWC"),
            preferred_element_type=jnp.float32)
        return y + b

    def refine_ref(x, pfx):
        h1 = conv_ref(x, params[f"{pfx}_w1"], params[f"{pfx}_b1"])
        return conv_ref(h1, params[f"{pfx}_w2"], params[f"{pfx}_b2"]) + x

    F1n = refine_ref(Fn, "refine1")
    P2 = Fn * F1n
    F2n = refine_ref(P2, "refine2")
    P3 = Fn * F2n
    F3n = refine_ref(P3, "refine3")
    F_cat = jnp.concatenate([F1n, F2n, F3n], axis=-1)
    Fv = conv_ref(F_cat, params["fusion_w"], params["fusion_b"])
    return jnp.transpose(Fv, (0, 3, 1, 2))


if __name__ == "__main__":
    B, C, H, W = 2, 32, 8, 8          # in_channels must be divisible by num_heads=8
    NUM_HEADS = 8

    key = jax.random.PRNGKey(0)
    keys = iter(jax.random.split(key, 32))

    def nrm(shape, scale):
        return scale * jax.random.normal(next(keys), shape, dtype=jnp.float32)

    params = {}
    s_attn = 1.0 / math.sqrt(C)
    for name in ("mhsa1", "mhsa2"):
        params[f"{name}_in_w"] = nrm((3 * C, C), s_attn)
        params[f"{name}_in_b"] = nrm((3 * C,), 0.02)
        params[f"{name}_out_w"] = nrm((C, C), s_attn)
        params[f"{name}_out_b"] = nrm((C,), 0.02)
    s_conv = 1.0 / math.sqrt(9 * C)
    for name in ("refine1", "refine2", "refine3"):
        params[f"{name}_w1"] = nrm((C, C, 3, 3), s_conv)
        params[f"{name}_b1"] = nrm((C,), 0.02)
        params[f"{name}_w2"] = nrm((C, C, 3, 3), s_conv)
        params[f"{name}_b2"] = nrm((C,), 0.02)
    params["fusion_w"] = nrm((C, 3 * C, 3, 3), 1.0 / math.sqrt(9 * 3 * C))
    params["fusion_b"] = nrm((C,), 0.02)

    F_c = jax.random.normal(next(keys), (B, C, H, W), dtype=jnp.float32)
    F2 = jax.random.normal(next(keys), (B, C, H, W), dtype=jnp.float32)
    F3 = jax.random.normal(next(keys), (B, C, H, W), dtype=jnp.float32)

    out = multilevel_visual_collab(F_c, F2, F3, params, num_heads=NUM_HEADS)
    out = jax.block_until_ready(out)
    assert out.shape == (B, C, H, W)
    assert bool(jnp.all(jnp.isfinite(out)))

    ref = _reference(F_c, F2, F3, params, num_heads=NUM_HEADS)
    max_abs = float(jnp.max(jnp.abs(out - ref)))
    assert max_abs < 5e-2, f"mismatch vs reference: max abs diff = {max_abs}"

    print("KERNEL_OK")
</pallas_src>

<mosaic_0001>
module attributes {stable_mosaic.version = 11 : i64} {
  func.func @_mm_bias_kernel(%arg0: i32, %arg1: memref<64x32xbf16, #tpu.memory_space<vmem>>, %arg2: memref<32x64xbf16, #tpu.memory_space<vmem>>, %arg3: memref<1x64xf32, #tpu.memory_space<vmem>>, %arg4: memref<64x64xbf16, #tpu.memory_space<vmem>>) attributes {dimension_semantics = [#tpu.dimension_semantics<parallel>], iteration_bounds = array<i64: 2>, scalar_prefetch = 0 : i64, scratch_operands = 0 : i64, tpu.core_type = #tpu.core_type<tc>, window_params = [{transform_indices = @transform_0, window_bounds = array<i64: 64, 32>}, {pipeline_mode = #tpu.pipeline_mode<synchronous>, transform_indices = @transform_1, window_bounds = array<i64: 32, 64>}, {pipeline_mode = #tpu.pipeline_mode<synchronous>, transform_indices = @transform_2, window_bounds = array<i64: 1, 64>}, {transform_indices = @transform_3, window_bounds = array<i64: 64, 64>}]} {
    %c0 = arith.constant 0 : index
    %c0_0 = arith.constant 0 : index
    %0 = vector.load %arg1[%c0, %c0_0] : memref<64x32xbf16, #tpu.memory_space<vmem>>, vector<64x32xbf16>
    %c0_1 = arith.constant 0 : index
    %c0_2 = arith.constant 0 : index
    %1 = vector.load %arg2[%c0_1, %c0_2] : memref<32x64xbf16, #tpu.memory_space<vmem>>, vector<32x64xbf16>
    %cst = arith.constant dense<0.000000e+00> : vector<64x64xf32>
    %2 = tpu.matmul %0, %1, %cst {dimension_numbers = #tpu.dot_dimension_numbers<[1], [0], [0], [1], [0, 0, 1, 1], [], []>} : vector<64x32xbf16>, vector<32x64xbf16>, vector<64x64xf32> -> vector<64x64xf32>
    %c0_3 = arith.constant 0 : index
    %c0_4 = arith.constant 0 : index
    %3 = vector.load %arg3[%c0_3, %c0_4] : memref<1x64xf32, #tpu.memory_space<vmem>>, vector<1x64xf32>
    %4 = vector.broadcast %3 : vector<1x64xf32> to vector<64x64xf32>
    %5 = arith.addf %2, %4 : vector<64x64xf32>
    %6 = arith.truncf %5 : vector<64x64xf32> to vector<64x64xbf16>
    %c0_5 = arith.constant 0 : index
    %c0_6 = arith.constant 0 : index
    %7 = vector.load %arg4[%c0_5, %c0_6] : memref<64x64xbf16, #tpu.memory_space<vmem>>, vector<64x64xbf16>
    tpu.vector_store %arg4[%c0_5, %c0_6], %6 {strides = array<i32>} : memref<64x64xbf16, #tpu.memory_space<vmem>>, vector<64x64xbf16>,
    return
  }
  func.func @transform_0(%arg0: i32) -> (i32, i32) {
    %c0_i32 = arith.constant 0 : i32
    %c0_i32_0 = arith.constant 0 : i32
    return %arg0, %c0_i32 : i32, i32
  }
  func.func @transform_1(%arg0: i32) -> (i32, i32) {
    %c0_i32 = arith.constant 0 : i32
    %c0_i32_0 = arith.constant 0 : i32
    %c0_i32_1 = arith.constant 0 : i32
    return %c0_i32, %c0_i32_0 : i32, i32
  }
  func.func @transform_2(%arg0: i32) -> (i32, i32) {
    %c0_i32 = arith.constant 0 : i32
    %c0_i32_0 = arith.constant 0 : i32
    %c0_i32_1 = arith.constant 0 : i32
    return %c0_i32, %c0_i32_0 : i32, i32
  }
  func.func @transform_3(%arg0: i32) -> (i32, i32) {
    %c0_i32 = arith.constant 0 : i32
    %c0_i32_0 = arith.constant 0 : i32
    return %arg0, %c0_i32 : i32, i32
  }
}

module attributes {stable_mosaic.version = 11 : i64} {
  func.func @_attention_kernel(%arg0: i32, %arg1: memref<1x8x64x4xbf16, #tpu.memory_space<vmem>>, %arg2: memref<1x8x4x64xbf16, #tpu.memory_space<vmem>>, %arg3: memref<1x8x64x4xbf16, #tpu.memory_space<vmem>>, %arg4: memref<1x8x64x4xbf16, #tpu.memory_space<vmem>>) attributes {dimension_semantics = [#tpu.dimension_semantics<parallel>], iteration_bounds = array<i64: 4>, scalar_prefetch = 0 : i64, scratch_operands = 0 : i64, tpu.core_type = #tpu.core_type<tc>, window_params = [{transform_indices = @transform_0, window_bounds = array<i64: 1, 8, 64, 4>}, {transform_indices = @transform_1, window_bounds = array<i64: 1, 8, 4, 64>}, {transform_indices = @transform_2, window_bounds = array<i64: 1, 8, 64, 4>}, {transform_indices = @transform_3, window_bounds = array<i64: 1, 8, 64, 4>}]} {
    %c0 = arith.constant 0 : index
    %c0_0 = arith.constant 0 : index
    %c0_1 = arith.constant 0 : index
    %c0_2 = arith.constant 0 : index
    %0 = vector.load %arg1[%c0, %c0_0, %c0_1, %c0_2] : memref<1x8x64x4xbf16, #tpu.memory_space<vmem>>, vector<1x8x64x4xbf16>
    %1 = vector.shape_cast %0 : vector<1x8x64x4xbf16> to vector<8x64x4xbf16>
    %c0_3 = arith.constant 0 : index
    %c0_4 = arith.constant 0 : index
    %c0_5 = arith.constant 0 : index
    %c0_6 = arith.constant 0 : index
    %2 = vector.load %arg2[%c0_3, %c0_4, %c0_5, %c0_6] : memref<1x8x4x64xbf16, #tpu.memory_space<vmem>>, vector<1x8x4x64xbf16>
    %3 = vector.shape_cast %2 : vector<1x8x4x64xbf16> to vector<8x4x64xbf16>
    %c0_7 = arith.constant 0 : index
    %c0_8 = arith.constant 0 : index
    %c0_9 = arith.constant 0 : index
    %c0_10 = arith.constant 0 : index
    %4 = vector.load %arg3[%c0_7, %c0_8, %c0_9, %c0_10] : memref<1x8x64x4xbf16, #tpu.memory_space<vmem>>, vector<1x8x64x4xbf16>
    %5 = vector.shape_cast %4 : vector<1x8x64x4xbf16> to vector<8x64x4xbf16>
    %cst = arith.constant dense<0.000000e+00> : vector<8x64x64xf32>
    %6 = tpu.matmul %1, %3, %cst {dimension_numbers = #tpu.dot_dimension_numbers<[2], [1], [1], [2], [0, 0, 0, 1, 1, 2], [0], [0]>} : vector<8x64x4xbf16>, vector<8x4x64xbf16>, vector<8x64x64xf32> -> vector<8x64x64xf32>
    %cst_11 = arith.constant 5.000000e-01 : f32
    %7 = vector.broadcast %cst_11 : f32 to vector<8x64x64xf32>
    %8 = arith.mulf %6, %7 : vector<8x64x64xf32>
    %cst_12 = arith.constant dense<0xFF800000> : vector<8x64xf32>
    %9 = vector.multi_reduction <maximumf>, %8, %cst_12 [2] : vector<8x64x64xf32> to vector<8x64xf32>
    %10 = vector.shape_cast %9 : vector<8x64xf32> to vector<8x64x1xf32>
    %11 = vector.broadcast %10 : vector<8x64x1xf32> to vector<8x64x64xf32>
    %12 = arith.subf %8, %11 : vector<8x64x64xf32>
    %13 = math.exp %12 : vector<8x64x64xf32>
    %cst_13 = arith.constant dense<0.000000e+00> : vector<8x64xf32>
    %14 = vector.multi_reduction <add>, %13, %cst_13 [2] : vector<8x64x64xf32> to vector<8x64xf32>
    %15 = vector.shape_cast %14 : vector<8x64xf32> to vector<8x64x1xf32>
    %16 = tpu.reciprocal %15 {approx = true} : vector<8x64x1xf32> -> vector<8x64x1xf32>
    %17 = vector.broadcast %16 : vector<8x64x1xf32> to vector<8x64x64xf32>
    %18 = arith.mulf %13, %17 : vector<8x64x64xf32>
    %19 = arith.truncf %18 : vector<8x64x64xf32> to vector<8x64x64xbf16>
    %cst_14 = arith.constant dense<0.000000e+00> : vector<8x64x4xf32>
    %20 = tpu.matmul %19, %5, %cst_14 {dimension_numbers = #tpu.dot_dimension_numbers<[2], [1], [1], [2], [0, 0, 0, 1, 1, 2], [0], [0]>} : vector<8x64x64xbf16>, vector<8x64x4xbf16>, vector<8x64x4xf32> -> vector<8x64x4xf32>
    %21 = arith.truncf %20 : vector<8x64x4xf32> to vector<8x64x4xbf16>
    %c0_15 = arith.constant 0 : index
    %c0_16 = arith.constant 0 : index
    %c0_17 = arith.constant 0 : index
    %c0_18 = arith.constant 0 : index
    %22 = vector.load %arg4[%c0_15, %c0_16, %c0_17, %c0_18] : memref<1x8x64x4xbf16, #tpu.memory_space<vmem>>, vector<1x8x64x4xbf16>
    %23 = vector.shape_cast %22 : vector<1x8x64x4xbf16> to vector<8x64x4xbf16>
    %24 = vector.shape_cast %21 : vector<8x64x4xbf16> to vector<1x8x64x4xbf16>
    tpu.vector_store %arg4[%c0_15, %c0_16, %c0_17, %c0_18], %24 {strides = array<i32>} : memref<1x8x64x4xbf16, #tpu.memory_space<vmem>>, vector<1x8x64x4xbf16>,
    return
  }
  func.func @transform_0(%arg0: i32) -> (i32, i32, i32, i32) {
    %c0_i32 = arith.constant 0 : i32
    %c0_i32_0 = arith.constant 0 : i32
    %c0_i32_1 = arith.constant 0 : i32
    %c0_i32_2 = arith.constant 0 : i32
    return %arg0, %c0_i32, %c0_i32_0, %c0_i32_1 : i32, i32, i32, i32
  }
  func.func @transform_1(%arg0: i32) -> (i32, i32, i32, i32) {
    %c0_i32 = arith.constant 0 : i32
    %c0_i32_0 = arith.constant 0 : i32
    %c0_i32_1 = arith.constant 0 : i32
    %c0_i32_2 = arith.constant 0 : i32
    return %arg0, %c0_i32, %c0_i32_0, %c0_i32_1 : i32, i32, i32, i32
  }
  func.func @transform_2(%arg0: i32) -> (i32, i32, i32, i32) {
    %c0_i32 = arith.constant 0 : i32
    %c0_i32_0 = arith.constant 0 : i32
    %c0_i32_1 = arith.constant 0 : i32
    %c0_i32_2 = arith.constant 0 : i32
    return %arg0, %c0_i32, %c0_i32_0, %c0_i32_1 : i32, i32, i32, i32
  }
  func.func @transform_3(%arg0: i32) -> (i32, i32, i32, i32) {
    %c0_i32 = arith.constant 0 : i32
    %c0_i32_0 = arith.constant 0 : i32
    %c0_i32_1 = arith.constant 0 : i32
    %c0_i32_2 = arith.constant 0 : i32
    return %arg0, %c0_i32, %c0_i32_0, %c0_i32_1 : i32, i32, i32, i32
  }
}

module attributes {stable_mosaic.version = 11 : i64} {
  func.func @_mm_bias_kernel(%arg0: i32, %arg1: memref<64x64xbf16, #tpu.memory_space<vmem>>, %arg2: memref<64x32xbf16, #tpu.memory_space<vmem>>, %arg3: memref<1x32xf32, #tpu.memory_space<vmem>>, %arg4: memref<64x32xf32, #tpu.memory_space<vmem>>) attributes {dimension_semantics = [#tpu.dimension_semantics<parallel>], iteration_bounds = array<i64: 2>, scalar_prefetch = 0 : i64, scratch_operands = 0 : i64, tpu.core_type = #tpu.core_type<tc>, window_params = [{transform_indices = @transform_0, window_bounds = array<i64: 64, 64>}, {pipeline_mode = #tpu.pipeline_mode<synchronous>, transform_indices = @transform_1, window_bounds = array<i64: 64, 32>}, {pipeline_mode = #tpu.pipeline_mode<synchronous>, transform_indices = @transform_2, window_bounds = array<i64: 1, 32>}, {transform_indices = @transform_3, window_bounds = array<i64: 64, 32>}]} {
    %c0 = arith.constant 0 : index
    %c0_0 = arith.constant 0 : index
    %0 = vector.load %arg1[%c0, %c0_0] : memref<64x64xbf16, #tpu.memory_space<vmem>>, vector<64x64xbf16>
    %c0_1 = arith.constant 0 : index
    %c0_2 = arith.constant 0 : index
    %1 = vector.load %arg2[%c0_1, %c0_2] : memref<64x32xbf16, #tpu.memory_space<vmem>>, vector<64x32xbf16>
    %cst = arith.constant dense<0.000000e+00> : vector<64x32xf32>
    %2 = tpu.matmul %0, %1, %cst {dimension_numbers = #tpu.dot_dimension_numbers<[1], [0], [0], [1], [0, 0, 1, 1], [], []>} : vector<64x64xbf16>, vector<64x32xbf16>, vector<64x32xf32> -> vector<64x32xf32>
    %c0_3 = arith.constant 0 : index
    %c0_4 = arith.constant 0 : index
    %3 = vector.load %arg3[%c0_3, %c0_4] : memref<1x32xf32, #tpu.memory_space<vmem>>, vector<1x32xf32>
    %4 = vector.broadcast %3 : vector<1x32xf32> to vector<64x32xf32>
    %5 = arith.addf %2, %4 : vector<64x32xf32>
    %c0_5 = arith.constant 0 : index
    %c0_6 = arith.constant 0 : index
    %6 = vector.load %arg4[%c0_5, %c0_6] : memref<64x32xf32, #tpu.memory_space<vmem>>, vector<64x32xf32>
    tpu.vector_store %arg4[%c0_5, %c0_6], %5 {strides = array<i32>} : memref<64x32xf32, #tpu.memory_space<vmem>>, vector<64x32xf32>,
    return
  }
  func.func @transform_0(%arg0: i32) -> (i32, i32) {
    %c0_i32 = arith.constant 0 : i32
    %c0_i32_0 = arith.constant 0 : i32
    return %arg0, %c0_i32 : i32, i32
  }
  func.func @transform_1(%arg0: i32) -> (i32, i32) {
    %c0_i32 = arith.constant 0 : i32
    %c0_i32_0 = arith.constant 0 : i32
    %c0_i32_1 = arith.constant 0 : i32
    return %c0_i32, %c0_i32_0 : i32, i32
  }
  func.func @transform_2(%arg0: i32) -> (i32, i32) {
    %c0_i32 = arith.constant 0 : i32
    %c0_i32_0 = arith.constant 0 : i32
    %c0_i32_1 = arith.constant 0 : i32
    return %c0_i32, %c0_i32_0 : i32, i32
  }
  func.func @transform_3(%arg0: i32) -> (i32, i32) {
    %c0_i32 = arith.constant 0 : i32
    %c0_i32_0 = arith.constant 0 : i32
    return %arg0, %c0_i32 : i32, i32
  }
}

module attributes {stable_mosaic.version = 11 : i64} {
  func.func @_mm_bias_kernel(%arg0: i32, %arg1: memref<64x288xbf16, #tpu.memory_space<vmem>>, %arg2: memref<288x32xbf16, #tpu.memory_space<vmem>>, %arg3: memref<1x32xf32, #tpu.memory_space<vmem>>, %arg4: memref<64x32xbf16, #tpu.memory_space<vmem>>) attributes {dimension_semantics = [#tpu.dimension_semantics<parallel>], iteration_bounds = array<i64: 2>, scalar_prefetch = 0 : i64, scratch_operands = 0 : i64, tpu.core_type = #tpu.core_type<tc>, window_params = [{transform_indices = @transform_0, window_bounds = array<i64: 64, 288>}, {pipeline_mode = #tpu.pipeline_mode<synchronous>, transform_indices = @transform_1, window_bounds = array<i64: 288, 32>}, {pipeline_mode = #tpu.pipeline_mode<synchronous>, transform_indices = @transform_2, window_bounds = array<i64: 1, 32>}, {transform_indices = @transform_3, window_bounds = array<i64: 64, 32>}]} {
    %c0 = arith.constant 0 : index
    %c0_0 = arith.constant 0 : index
    %0 = vector.load %arg1[%c0, %c0_0] : memref<64x288xbf16, #tpu.memory_space<vmem>>, vector<64x288xbf16>
    %c0_1 = arith.constant 0 : index
    %c0_2 = arith.constant 0 : index
    %1 = vector.load %arg2[%c0_1, %c0_2] : memref<288x32xbf16, #tpu.memory_space<vmem>>, vector<288x32xbf16>
    %cst = arith.constant dense<0.000000e+00> : vector<64x32xf32>
    %2 = tpu.matmul %0, %1, %cst {dimension_numbers = #tpu.dot_dimension_numbers<[1], [0], [0], [1], [0, 0, 1, 1], [], []>} : vector<64x288xbf16>, vector<288x32xbf16>, vector<64x32xf32> -> vector<64x32xf32>
    %c0_3 = arith.constant 0 : index
    %c0_4 = arith.constant 0 : index
    %3 = vector.load %arg3[%c0_3, %c0_4] : memref<1x32xf32, #tpu.memory_space<vmem>>, vector<1x32xf32>
    %4 = vector.broadcast %3 : vector<1x32xf32> to vector<64x32xf32>
    %5 = arith.addf %2, %4 : vector<64x32xf32>
    %6 = arith.truncf %5 : vector<64x32xf32> to vector<64x32xbf16>
    %c0_5 = arith.constant 0 : index
    %c0_6 = arith.constant 0 : index
    %7 = vector.load %arg4[%c0_5, %c0_6] : memref<64x32xbf16, #tpu.memory_space<vmem>>, vector<64x32xbf16>
    tpu.vector_store %arg4[%c0_5, %c0_6], %6 {strides = array<i32>} : memref<64x32xbf16, #tpu.memory_space<vmem>>, vector<64x32xbf16>,
    return
  }
  func.func @transform_0(%arg0: i32) -> (i32, i32) {
    %c0_i32 = arith.constant 0 : i32
    %c0_i32_0 = arith.constant 0 : i32
    return %arg0, %c0_i32 : i32, i32
  }
  func.func @transform_1(%arg0: i32) -> (i32, i32) {
    %c0_i32 = arith.constant 0 : i32
    %c0_i32_0 = arith.constant 0 : i32
    %c0_i32_1 = arith.constant 0 : i32
    return %c0_i32, %c0_i32_0 : i32, i32
  }
  func.func @transform_2(%arg0: i32) -> (i32, i32) {
    %c0_i32 = arith.constant 0 : i32
    %c0_i32_0 = arith.constant 0 : i32
    %c0_i32_1 = arith.constant 0 : i32
    return %c0_i32, %c0_i32_0 : i32, i32
  }
  func.func @transform_3(%arg0: i32) -> (i32, i32) {
    %c0_i32 = arith.constant 0 : i32
    %c0_i32_0 = arith.constant 0 : i32
    return %arg0, %c0_i32 : i32, i32
  }
}

module attributes {stable_mosaic.version = 11 : i64} {
  func.func @_mm_bias_res_mul_kernel(%arg0: i32, %arg1: memref<64x288xbf16, #tpu.memory_space<vmem>>, %arg2: memref<288x32xbf16, #tpu.memory_space<vmem>>, %arg3: memref<1x32xf32, #tpu.memory_space<vmem>>, %arg4: memref<64x32xf32, #tpu.memory_space<vmem>>, %arg5: memref<64x32xf32, #tpu.memory_space<vmem>>, %arg6: memref<64x32xbf16, #tpu.memory_space<vmem>>, %arg7: memref<64x32xf32, #tpu.memory_space<vmem>>) attributes {dimension_semantics = [#tpu.dimension_semantics<parallel>], iteration_bounds = array<i64: 2>, scalar_prefetch = 0 : i64, scratch_operands = 0 : i64, tpu.core_type = #tpu.core_type<tc>, window_params = [{transform_indices = @transform_0, window_bounds = array<i64: 64, 288>}, {pipeline_mode = #tpu.pipeline_mode<synchronous>, transform_indices = @transform_1, window_bounds = array<i64: 288, 32>}, {pipeline_mode = #tpu.pipeline_mode<synchronous>, transform_indices = @transform_2, window_bounds = array<i64: 1, 32>}, {transform_indices = @transform_3, window_bounds = array<i64: 64, 32>}, {transform_indices = @transform_4, window_bounds = array<i64: 64, 32>}, {transform_indices = @transform_5, window_bounds = array<i64: 64, 32>}, {transform_indices = @transform_6, window_bounds = array<i64: 64, 32>}]} {
    %c0 = arith.constant 0 : index
    %c0_0 = arith.constant 0 : index
    %0 = vector.load %arg1[%c0, %c0_0] : memref<64x288xbf16, #tpu.memory_space<vmem>>, vector<64x288xbf16>
    %c0_1 = arith.constant 0 : index
    %c0_2 = arith.constant 0 : index
    %1 = vector.load %arg2[%c0_1, %c0_2] : memref<288x32xbf16, #tpu.memory_space<vmem>>, vector<288x32xbf16>
    %cst = arith.constant dense<0.000000e+00> : vector<64x32xf32>
    %2 = tpu.matmul %0, %1, %cst {dimension_numbers = #tpu.dot_dimension_numbers<[1], [0], [0], [1], [0, 0, 1, 1], [], []>} : vector<64x288xbf16>, vector<288x32xbf16>, vector<64x32xf32> -> vector<64x32xf32>
    %c0_3 = arith.constant 0 : index
    %c0_4 = arith.constant 0 : index
    %3 = vector.load %arg3[%c0_3, %c0_4] : memref<1x32xf32, #tpu.memory_space<vmem>>, vector<1x32xf32>
    %4 = vector.broadcast %3 : vector<1x32xf32> to vector<64x32xf32>
    %5 = arith.addf %2, %4 : vector<64x32xf32>
    %c0_5 = arith.constant 0 : index
    %c0_6 = arith.constant 0 : index
    %6 = vector.load %arg4[%c0_5, %c0_6] : memref<64x32xf32, #tpu.memory_space<vmem>>, vector<64x32xf32>
    %7 = arith.addf %5, %6 : vector<64x32xf32>
    %8 = arith.truncf %7 : vector<64x32xf32> to vector<64x32xbf16>
    %c0_7 = arith.constant 0 : index
    %c0_8 = arith.constant 0 : index
    %9 = vector.load %arg6[%c0_7, %c0_8] : memref<64x32xbf16, #tpu.memory_space<vmem>>, vector<64x32xbf16>
    tpu.vector_store %arg6[%c0_7, %c0_8], %8 {strides = array<i32>} : memref<64x32xbf16, #tpu.memory_space<vmem>>, vector<64x32xbf16>,
    %c0_9 = arith.constant 0 : index
    %c0_10 = arith.constant 0 : index
    %10 = vector.load %arg5[%c0_9, %c0_10] : memref<64x32xf32, #tpu.memory_space<vmem>>, vector<64x32xf32>
    %11 = arith.mulf %7, %10 : vector<64x32xf32>
    %c0_11 = arith.constant 0 : index
    %c0_12 = arith.constant 0 : index
    %12 = vector.load %arg7[%c0_11, %c0_12] : memref<64x32xf32, #tpu.memory_space<vmem>>, vector<64x32xf32>
    tpu.vector_store %arg7[%c0_11, %c0_12], %11 {strides = array<i32>} : memref<64x32xf32, #tpu.memory_space<vmem>>, vector<64x32xf32>,
    return
  }
  func.func @transform_0(%arg0: i32) -> (i32, i32) {
    %c0_i32 = arith.constant 0 : i32
    %c0_i32_0 = arith.constant 0 : i32
    return %arg0, %c0_i32 : i32, i32
  }
  func.func @transform_1(%arg0: i32) -> (i32, i32) {
    %c0_i32 = arith.constant 0 : i32
    %c0_i32_0 = arith.constant 0 : i32
    %c0_i32_1 = arith.constant 0 : i32
    return %c0_i32, %c0_i32_0 : i32, i32
  }
  func.func @transform_2(%arg0: i32) -> (i32, i32) {
    %c0_i32 = arith.constant 0 : i32
    %c0_i32_0 = arith.constant 0 : i32
    %c0_i32_1 = arith.constant 0 : i32
    return %c0_i32, %c0_i32_0 : i32, i32
  }
  func.func @transform_3(%arg0: i32) -> (i32, i32) {
    %c0_i32 = arith.constant 0 : i32
    %c0_i32_0 = arith.constant 0 : i32
    return %arg0, %c0_i32 : i32, i32
  }
  func.func @transform_4(%arg0: i32) -> (i32, i32) {
    %c0_i32 = arith.constant 0 : i32
    %c0_i32_0 = arith.constant 0 : i32
    return %arg0, %c0_i32 : i32, i32
  }
  func.func @transform_5(%arg0: i32) -> (i32, i32) {
    %c0_i32 = arith.constant 0 : i32
    %c0_i32_0 = arith.constant 0 : i32
    return %arg0, %c0_i32 : i32, i32
  }
  func.func @transform_6(%arg0: i32) -> (i32, i32) {
    %c0_i32 = arith.constant 0 : i32
    %c0_i32_0 = arith.constant 0 : i32
    return %arg0, %c0_i32 : i32, i32
  }
}

module attributes {stable_mosaic.version = 11 : i64} {
  func.func @_mm_bias_res_kernel(%arg0: i32, %arg1: memref<64x288xbf16, #tpu.memory_space<vmem>>, %arg2: memref<288x32xbf16, #tpu.memory_space<vmem>>, %arg3: memref<1x32xf32, #tpu.memory_space<vmem>>, %arg4: memref<64x32xf32, #tpu.memory_space<vmem>>, %arg5: memref<64x32xbf16, #tpu.memory_space<vmem>>) attributes {dimension_semantics = [#tpu.dimension_semantics<parallel>], iteration_bounds = array<i64: 2>, scalar_prefetch = 0 : i64, scratch_operands = 0 : i64, tpu.core_type = #tpu.core_type<tc>, window_params = [{transform_indices = @transform_0, window_bounds = array<i64: 64, 288>}, {pipeline_mode = #tpu.pipeline_mode<synchronous>, transform_indices = @transform_1, window_bounds = array<i64: 288, 32>}, {pipeline_mode = #tpu.pipeline_mode<synchronous>, transform_indices = @transform_2, window_bounds = array<i64: 1, 32>}, {transform_indices = @transform_3, window_bounds = array<i64: 64, 32>}, {transform_indices = @transform_4, window_bounds = array<i64: 64, 32>}]} {
    %c0 = arith.constant 0 : index
    %c0_0 = arith.constant 0 : index
    %0 = vector.load %arg1[%c0, %c0_0] : memref<64x288xbf16, #tpu.memory_space<vmem>>, vector<64x288xbf16>
    %c0_1 = arith.constant 0 : index
    %c0_2 = arith.constant 0 : index
    %1 = vector.load %arg2[%c0_1, %c0_2] : memref<288x32xbf16, #tpu.memory_space<vmem>>, vector<288x32xbf16>
    %cst = arith.constant dense<0.000000e+00> : vector<64x32xf32>
    %2 = tpu.matmul %0, %1, %cst {dimension_numbers = #tpu.dot_dimension_numbers<[1], [0], [0], [1], [0, 0, 1, 1], [], []>} : vector<64x288xbf16>, vector<288x32xbf16>, vector<64x32xf32> -> vector<64x32xf32>
    %c0_3 = arith.constant 0 : index
    %c0_4 = arith.constant 0 : index
    %3 = vector.load %arg3[%c0_3, %c0_4] : memref<1x32xf32, #tpu.memory_space<vmem>>, vector<1x32xf32>
    %4 = vector.broadcast %3 : vector<1x32xf32> to vector<64x32xf32>
    %5 = arith.addf %2, %4 : vector<64x32xf32>
    %c0_5 = arith.constant 0 : index
    %c0_6 = arith.constant 0 : index
    %6 = vector.load %arg4[%c0_5, %c0_6] : memref<64x32xf32, #tpu.memory_space<vmem>>, vector<64x32xf32>
    %7 = arith.addf %5, %6 : vector<64x32xf32>
    %8 = arith.truncf %7 : vector<64x32xf32> to vector<64x32xbf16>
    %c0_7 = arith.constant 0 : index
    %c0_8 = arith.constant 0 : index
    %9 = vector.load %arg5[%c0_7, %c0_8] : memref<64x32xbf16, #tpu.memory_space<vmem>>, vector<64x32xbf16>
    tpu.vector_store %arg5[%c0_7, %c0_8], %8 {strides = array<i32>} : memref<64x32xbf16, #tpu.memory_space<vmem>>, vector<64x32xbf16>,
    return
  }
  func.func @transform_0(%arg0: i32) -> (i32, i32) {
    %c0_i32 = arith.constant 0 : i32
    %c0_i32_0 = arith.constant 0 : i32
    return %arg0, %c0_i32 : i32, i32
  }
  func.func @transform_1(%arg0: i32) -> (i32, i32) {
    %c0_i32 = arith.constant 0 : i32
    %c0_i32_0 = arith.constant 0 : i32
    %c0_i32_1 = arith.constant 0 : i32
    return %c0_i32, %c0_i32_0 : i32, i32
  }
  func.func @transform_2(%arg0: i32) -> (i32, i32) {
    %c0_i32 = arith.constant 0 : i32
    %c0_i32_0 = arith.constant 0 : i32
    %c0_i32_1 = arith.constant 0 : i32
    return %c0_i32, %c0_i32_0 : i32, i32
  }
  func.func @transform_3(%arg0: i32) -> (i32, i32) {
    %c0_i32 = arith.constant 0 : i32
    %c0_i32_0 = arith.constant 0 : i32
    return %arg0, %c0_i32 : i32, i32
  }
  func.func @transform_4(%arg0: i32) -> (i32, i32) {
    %c0_i32 = arith.constant 0 : i32
    %c0_i32_0 = arith.constant 0 : i32
    return %arg0, %c0_i32 : i32, i32
  }
}

module attributes {stable_mosaic.version = 11 : i64} {
  func.func @_mm_bias_kernel(%arg0: i32, %arg1: memref<64x864xbf16, #tpu.memory_space<vmem>>, %arg2: memref<864x32xbf16, #tpu.memory_space<vmem>>, %arg3: memref<1x32xf32, #tpu.memory_space<vmem>>, %arg4: memref<64x32xf32, #tpu.memory_space<vmem>>) attributes {dimension_semantics = [#tpu.dimension_semantics<parallel>], iteration_bounds = array<i64: 2>, scalar_prefetch = 0 : i64, scratch_operands = 0 : i64, tpu.core_type = #tpu.core_type<tc>, window_params = [{transform_indices = @transform_0, window_bounds = array<i64: 64, 864>}, {pipeline_mode = #tpu.pipeline_mode<synchronous>, transform_indices = @transform_1, window_bounds = array<i64: 864, 32>}, {pipeline_mode = #tpu.pipeline_mode<synchronous>, transform_indices = @transform_2, window_bounds = array<i64: 1, 32>}, {transform_indices = @transform_3, window_bounds = array<i64: 64, 32>}]} {
    %c0 = arith.constant 0 : index
    %c0_0 = arith.constant 0 : index
    %0 = vector.load %arg1[%c0, %c0_0] : memref<64x864xbf16, #tpu.memory_space<vmem>>, vector<64x864xbf16>
    %c0_1 = arith.constant 0 : index
    %c0_2 = arith.constant 0 : index
    %1 = vector.load %arg2[%c0_1, %c0_2] : memref<864x32xbf16, #tpu.memory_space<vmem>>, vector<864x32xbf16>
    %cst = arith.constant dense<0.000000e+00> : vector<64x32xf32>
    %2 = tpu.matmul %0, %1, %cst {dimension_numbers = #tpu.dot_dimension_numbers<[1], [0], [0], [1], [0, 0, 1, 1], [], []>} : vector<64x864xbf16>, vector<864x32xbf16>, vector<64x32xf32> -> vector<64x32xf32>
    %c0_3 = arith.constant 0 : index
    %c0_4 = arith.constant 0 : index
    %3 = vector.load %arg3[%c0_3, %c0_4] : memref<1x32xf32, #tpu.memory_space<vmem>>, vector<1x32xf32>
    %4 = vector.broadcast %3 : vector<1x32xf32> to vector<64x32xf32>
    %5 = arith.addf %2, %4 : vector<64x32xf32>
    %c0_5 = arith.constant 0 : index
    %c0_6 = arith.constant 0 : index
    %6 = vector.load %arg4[%c0_5, %c0_6] : memref<64x32xf32, #tpu.memory_space<vmem>>, vector<64x32xf32>
    tpu.vector_store %arg4[%c0_5, %c0_6], %5 {strides = array<i32>} : memref<64x32xf32, #tpu.memory_space<vmem>>, vector<64x32xf32>,
    return
  }
  func.func @transform_0(%arg0: i32) -> (i32, i32) {
    %c0_i32 = arith.constant 0 : i32
    %c0_i32_0 = arith.constant 0 : i32
    return %arg0, %c0_i32 : i32, i32
  }
  func.func @transform_1(%arg0: i32) -> (i32, i32) {
    %c0_i32 = arith.constant 0 : i32
    %c0_i32_0 = arith.constant 0 : i32
    %c0_i32_1 = arith.constant 0 : i32
    return %c0_i32, %c0_i32_0 : i32, i32
  }
  func.func @transform_2(%arg0: i32) -> (i32, i32) {
    %c0_i32 = arith.constant 0 : i32
    %c0_i32_0 = arith.constant 0 : i32
    %c0_i32_1 = arith.constant 0 : i32
    return %c0_i32, %c0_i32_0 : i32, i32
  }
  func.func @transform_3(%arg0: i32) -> (i32, i32) {
    %c0_i32 = arith.constant 0 : i32
    %c0_i32_0 = arith.constant 0 : i32
    return %arg0, %c0_i32 : i32, i32
  }
}

</mosaic_0001>

<bundles_post_ra>
// kernel: multilevel_visual_collab.12
= control target key start
LH: loop header
LB: loop body
LE: loop exit
PB: predicated region body
PF: predicated region fallthrough
CT: control target
= control target key end

     0   :  { %s503_s12 = smov 0   ;;  %s537_s0 = inlined_call_operand.vmem [shape: bf16[128,32], index: 0, kind: input, shape index: {}]   ;;  %s538_s1 = inlined_call_operand.vmem [shape: bf16[32,64], index: 1, kind: input, shape index: {}]   ;;  %s539_s2 = inlined_call_operand.vmem [shape: f32[1,64], index: 2, kind: input, shape index: {}]   ;;  %s540_s3 = inlined_call_operand.vmem [shape: bf16[128,64], index: 3, kind: output, shape index: {}]  }
   0x1 LB: > { %s401_s13 = sadd.s32 4294967295, %s481_s12   ;;  %p405_p0 = scmp.ge.s32.totalorder %s481_s12, 1  ;;  %s481_s12 = sphi %s503_s12, %s13_s12  }
   0x2   : > { %p138_p1 = scmp.lt.s32.totalorder %s481_s12, 3 }
   0x4   : > { %p139_p2 = pnand %p405_p0, %p138_p1 }
   0x5   : > { %v469_v0 = vld [vmem:[%s538_s1] sm:$0xff] (!%p139_p2)   ;;  %s406_s16 = sshll.u32 (!%p139_p2), %s401_s13, 3  ;;  %v470_v1 = vld [vmem:[%s538_s1 + $0x8] sm:$0xff] (!%p139_p2)   ;;  %vm226_vm0 = vcmask (!%p139_p2), 261120   ;;  %vm336_vm1 = vcmask (!%p139_p2), 519168  }
   0x6   : > { %142 = sbr.rel (%p139_p2) target bundleno = 238 (0xee), region = 32  ;;  %p163_p3 = scmp.lt.s32.totalorder (!%p139_p2), %s406_s16, 15  ;;  %445 = vmatprep.subr.bf16.mxu0 (!%p139_p2), %v469_v0  ;;  %457 = vmatprep.subr.bf16.mxu1 (!%p139_p2), %v469_v0  ;;  %v410_v6 = vld [vmem:[%s539_s2] ss:$0 sm:$0xff] (!%p139_p2) }
   0x7   : > { %446 = vmatpush3.bf16.msra.mxu0 (!%p139_p2), %v469_v0  ;;  %459 = vmatpush3.bf16.msra.mxu1 (!%p139_p2), %v469_v0 }
   0x8   : > { %447 = vmatprep.subr.bf16.mxu0 (!%p139_p2), %v470_v1  ;;  %458 = vmatprep.subr.bf16.mxu1 (!%p139_p2), %v470_v1 }
   0xb   : > { %448 = vmatpush3.bf16.msra.mxu0 (!%p139_p2), %v470_v1  ;;  %460 = vmatpush3.bf16.msra.mxu1 (!%p139_p2), %v470_v1 }
   0xd   : > { %s542_s16 = smov (!%p163_p3, %s406_s16), 15 }
   0xe   : > { %s407_s19 = sshll.u32 %s542_s16, 2 }
   0xf   : > { %s166_s22 = scalar_lea.vmem %s537_s0, %s407_s19  ;;  %s172_s27 = scalar_lea.vmem %s540_s3, %s407_s19 }
  0x10   : > { %v471_v2 = vld [vmem:[%s166_s22] sm:$0xff]   ;;  %v472_v3 = vld [vmem:[%s166_s22 + $0x10] sm:$0xff]   ;;  %v473_v4 = vld [vmem:[%s166_s22 + $0x8] sm:$0xff]  }
  0x11   : > { %449 = vmatprep.mubr.msk.bf16.mxu0 %vm226_vm0, %v471_v2  ;;  %453 = vmatprep.mubr.msk.bf16.mxu1 %vm226_vm0, %v472_v3  ;;  %v474_v5 = vld [vmem:[%s166_s22 + $0x18] sm:$0xff]  }
  0x12   : > { %450 = vmatmul.mubr.msk.bf16.vlgmr.msra.gmra.mrb[0].mxu0 %vm226_vm0, %v473_v4  ;;  %454 = vmatmul.mubr.msk.bf16.vlgmr.msra.gmra.mrb[0].mxu1 %vm226_vm0, %v474_v5 }
  0xe5   : > { %v451_v7 = vpop.f32.mrb[0].mxu0  ;;  %v455_v9 = vpop.f32.mrb[0].mxu1 }
  0xe6   : > { %v282_v8 = vadd.f32 %v451_v7, %v410_v6  ;;  %v273_v10 = vpop.f32.mrb[1].mxu0  ;;  %v298_v11 = vadd.f32 %v455_v9, %v410_v6  ;;  %v289_v13 = vpop.f32.mrb[1].mxu1 }
  0xe7   : > { %v274_v12 = vadd.f32 %v410_v6, %v273_v10  ;;  %v452_v14 = vpop.f32.mrb[2].mxu0  ;;  %v290_v16 = vadd.f32 %v410_v6, %v289_v13  ;;  %v456_v18 = vpop.f32.mrb[2].mxu1 }
  0xe8   : > { %v433_v15 = vpack.c.bf16 %v282_v8, %v282_v8  ;;  %v285_v17 = vadd.f32 %v452_v14, %v410_v6  ;;  %v276_v19 = vpop.f32.mrb[3].mxu0  ;;  %v437_v20 = vpack.c.bf16 %v298_v11, %v298_v11  ;;  %v301_v22 = vadd.f32 %v456_v18, %v410_v6  ;;  %v292_v24 = vpop.f32.mrb[3].mxu1 }
  0xe9   : > { %v431_v21 = vpack.c.bf16 %v274_v12, %v274_v12  ;;  %v277_v23 = vadd.f32 %v410_v6, %v276_v19  ;;  %v435_v25 = vpack.c.bf16 %v290_v16, %v290_v16  ;;  %v293_v27 = vadd.f32 %v410_v6, %v292_v24 }
  0xea   : > { %339 = vst.msk [vmem:[%s172_s27 + $0x8] sm:$0xf] %vm336_vm1, %v433_v15  ;;  %v434_v26 = vpack.c.bf16 %v285_v17, %v285_v17  ;;  %343 = vst.msk [vmem:[%s172_s27 + $0x18] sm:$0xf] %vm336_vm1, %v437_v20  ;;  %v438_v28 = vpack.c.bf16 %v301_v22, %v301_v22 }
  0xeb   : > { %337 = vst.msk [vmem:[%s172_s27] sm:$0xf] %vm336_vm1, %v431_v21  ;;  %v432_v29 = vpack.c.bf16 %v277_v23, %v277_v23  ;;  %341 = vst.msk [vmem:[%s172_s27 + $0x10] sm:$0xf] %vm336_vm1, %v435_v25  ;;  %v436_v30 = vpack.c.bf16 %v293_v27, %v293_v27 }
  0xec   : > { %340 = vst.msk [vmem:[%s172_s27 + $0xc] sm:$0xf] %vm336_vm1, %v434_v26  ;;  %344 = vst.msk [vmem:[%s172_s27 + $0x1c] sm:$0xf] %vm336_vm1, %v438_v28 }
  0xed   : > { %338 = vst.msk [vmem:[%s172_s27 + $0x4] sm:$0xf] %vm336_vm1, %v432_v29  ;;  %342 = vst.msk [vmem:[%s172_s27 + $0x14] sm:$0xf] %vm336_vm1, %v436_v30 }
  0xee PF: > { %s13_s12 = sadd.s32 1, %s481_s12  }
  0xef   : > { %p10_p4 = scmp.ge.s32.totalorder %s13_s12, 4  }
  0xf1   :  { %12 = sbr.rel (!%p10_p4) target bundleno = 1 (0x1), region = 62 }

// kernel: multilevel_visual_collab.16
= control target key start
LH: loop header
LB: loop body
LE: loop exit
PB: predicated region body
PF: predicated region fallthrough
CT: control target
= control target key end

     0   :  { %s485_s12 = smov 0   ;;  %s533_s0 = inlined_call_operand.vmem [shape: bf16[128,64], index: 0, kind: input, shape index: {}]   ;;  %s534_s1 = inlined_call_operand.vmem [shape: bf16[64,32], index: 1, kind: input, shape index: {}]   ;;  %s535_s2 = inlined_call_operand.vmem [shape: f32[1,32], index: 2, kind: input, shape index: {}]   ;;  %s536_s3 = inlined_call_operand.vmem [shape: f32[128,32], index: 3, kind: output, shape index: {}]  }
   0x1 LB: > { %s385_s13 = sadd.s32 4294967295, %s463_s12   ;;  %p389_p0 = scmp.ge.s32.totalorder %s463_s12, 1  ;;  %s463_s12 = sphi %s485_s12, %s13_s12  }
   0x2   : > { %p138_p1 = scmp.lt.s32.totalorder %s463_s12, 3 }
   0x4   : > { %p139_p2 = pnand %p389_p0, %p138_p1 }
   0x5   : > { %v449_v0 = vld [vmem:[%s534_s1] sm:$0xff] (!%p139_p2)   ;;  %s390_s16 = sshll.u32 (!%p139_p2), %s385_s13, 3  ;;  %v450_v1 = vld [vmem:[%s534_s1 + $0x8] sm:$0xff] (!%p139_p2)   ;;  %v451_v2 = vld [vmem:[%s534_s1 + $0x10] sm:$0xff] (!%p139_p2)   ;;  %vm242_vm0 = vcmask (!%p139_p2), 523264   ;;  %vm320_vm1 = vcmask (!%p139_p2), 261120  }
   0x6   : > { %142 = sbr.rel (%p139_p2) target bundleno = 240 (0xf0), region = 32  ;;  %p163_p3 = scmp.lt.s32.totalorder (!%p139_p2), %s390_s16, 15  ;;  %417 = vmatprep.subr.bf16.mxu0 (!%p139_p2), %v449_v0  ;;  %433 = vmatprep.subr.bf16.mxu1 (!%p139_p2), %v449_v0  ;;  %v452_v3 = vld [vmem:[%s534_s1 + $0x18] sm:$0xff] (!%p139_p2)   ;;  %v394_v8 = vld [vmem:[%s535_s2] ss:$0 sm:$0xff] (!%p139_p2) }
   0x7   : > { %418 = vmatpush3.bf16.msra.mxu0 (!%p139_p2), %v449_v0  ;;  %437 = vmatpush3.bf16.msra.mxu1 (!%p139_p2), %v449_v0 }
   0x8   : > { %419 = vmatprep.subr.bf16.mxu0 (!%p139_p2), %v450_v1  ;;  %434 = vmatprep.subr.bf16.mxu1 (!%p139_p2), %v450_v1 }
   0xb   : > { %420 = vmatpush3.bf16.msra.mxu0 (!%p139_p2), %v450_v1  ;;  %438 = vmatpush3.bf16.msra.mxu1 (!%p139_p2), %v450_v1 }
   0xc   : > { %421 = vmatprep.subr.bf16.mxu0 (!%p139_p2), %v451_v2  ;;  %435 = vmatprep.subr.bf16.mxu1 (!%p139_p2), %v451_v2 }
   0xd   : > { %s538_s16 = smov (!%p163_p3, %s390_s16), 15 }
   0xe   : > { %s391_s21 = sshll.u32 %s538_s16, 2  ;;  %s393_s27 = sshll.u32 %s538_s16, 3 }
   0xf   : > { %s166_s26 = scalar_lea.vmem %s533_s0, %s391_s21  ;;  %422 = vmatpush3.bf16.msra.mxu0 %v451_v2  ;;  %439 = vmatpush3.bf16.msra.mxu1 %v451_v2  ;;  %s172_s5 = scalar_lea.vmem %s536_s3, %s393_s27 }
  0x10   : > { %v453_v4 = vld [vmem:[%s166_s26] sm:$0xff]   ;;  %v454_v5 = vld [vmem:[%s166_s26 + $0x10] sm:$0xff]   ;;  %423 = vmatprep.subr.bf16.mxu0 %v452_v3  ;;  %436 = vmatprep.subr.bf16.mxu1 %v452_v3  ;;  %v455_v6 = vld [vmem:[%s166_s26 + $0x8] sm:$0xff]  }
  0x11   : > { %425 = vmatprep.mubr.msk.bf16.mxu0 %vm242_vm0, %v453_v4  ;;  %429 = vmatprep.mubr.msk.bf16.mxu1 %vm242_vm0, %v454_v5  ;;  %v456_v7 = vld [vmem:[%s166_s26 + $0x18] sm:$0xff]  }
  0x13   : > { %424 = vmatpush3.bf16.msra.mxu0 %v452_v3  ;;  %440 = vmatpush3.bf16.msra.mxu1 %v452_v3 }
  0x16   : > { %426 = vmatmul.mubr.msk.bf16.vlgmr.msra.gmra.mrb[0].mxu0 %vm242_vm0, %v455_v6  ;;  %430 = vmatmul.mubr.msk.bf16.vlgmr.msra.gmra.mrb[0].mxu1 %vm242_vm0, %v456_v7 }
  0xe9   : > { %v427_v9 = vpop.f32.mrb[0].mxu0  ;;  %v431_v10 = vpop.f32.mrb[0].mxu1 }
  0xea   : > { %v298_v11 = vadd.f32 %v427_v9, %v394_v8  ;;  %v314_v12 = vadd.f32 %v431_v10, %v394_v8  ;;  %v289_v13 = vpop.f32.mrb[1].mxu0  ;;  %v305_v14 = vpop.f32.mrb[1].mxu1 }
  0xeb   : > { %v290_v15 = vadd.f32 %v394_v8, %v289_v13  ;;  %v306_v16 = vadd.f32 %v394_v8, %v305_v14  ;;  %v428_v17 = vpop.f32.mrb[2].mxu0  ;;  %v432_v18 = vpop.f32.mrb[2].mxu1 }
  0xec   : > { %323 = vst.msk [vmem:[%s172_s5 + $0x10] sm:$0xff] %vm320_vm1, %v298_v11  ;;  %327 = vst.msk [vmem:[%s172_s5 + $0x30] sm:$0xff] %vm320_vm1, %v314_v12  ;;  %v301_v19 = vadd.f32 %v428_v17, %v394_v8  ;;  %v317_v20 = vadd.f32 %v432_v18, %v394_v8  ;;  %v292_v21 = vpop.f32.mrb[3].mxu0  ;;  %v308_v22 = vpop.f32.mrb[3].mxu1 }
  0xed   : > { %321 = vst.msk [vmem:[%s172_s5] sm:$0xff] %vm320_vm1, %v290_v15  ;;  %325 = vst.msk [vmem:[%s172_s5 + $0x20] sm:$0xff] %vm320_vm1, %v306_v16  ;;  %v293_v23 = vadd.f32 %v394_v8, %v292_v21  ;;  %v309_v24 = vadd.f32 %v394_v8, %v308_v22 }
  0xee   : > { %324 = vst.msk [vmem:[%s172_s5 + $0x18] sm:$0xff] %vm320_vm1, %v301_v19  ;;  %328 = vst.msk [vmem:[%s172_s5 + $0x38] sm:$0xff] %vm320_vm1, %v317_v20 }
  0xef   : > { %322 = vst.msk [vmem:[%s172_s5 + $0x8] sm:$0xff] %vm320_vm1, %v293_v23  ;;  %326 = vst.msk [vmem:[%s172_s5 + $0x28] sm:$0xff] %vm320_vm1, %v309_v24 }
  0xf0 PF: > { %s13_s12 = sadd.s32 1, %s463_s12  }
  0xf1   : > { %p10_p4 = scmp.ge.s32.totalorder %s13_s12, 4  }
  0xf3   :  { %12 = sbr.rel (!%p10_p4) target bundleno = 1 (0x1), region = 62 }

// kernel: multilevel_visual_collab.15
= control target key start
LH: loop header
LB: loop body
LE: loop exit
PB: predicated region body
PF: predicated region fallthrough
CT: control target
= control target key end

     0   :  { %s4110_s12 = smov 0   ;;  %s5198_s0 = inlined_call_operand.vmem [shape: bf16[4,8,64,4], index: 0, kind: input, shape index: {}]   ;;  %s5199_s1 = inlined_call_operand.vmem [shape: bf16[4,8,4,64], index: 1, kind: input, shape index: {}]   ;;  %s5200_s2 = inlined_call_operand.vmem [shape: bf16[4,8,64,4], index: 2, kind: input, shape index: {}]   ;;  %s5201_s3 = inlined_call_operand.vmem [shape: bf16[4,8,64,4], index: 3, kind: output, shape index: {}]  }
   0x1 LB: > { %s3159_s13 = sadd.s32 4294967295, %s4088_s12   ;;  %p3163_p0 = scmp.ge.s32.totalorder %s4088_s12, 1  ;;  %s4088_s12 = sphi %s4110_s12, %s13_s12  }
   0x2   : > { %p157_p1 = scmp.lt.s32.totalorder %s4088_s12, 5 }
   0x4   : > { %p158_p2 = pnand %p3163_p0, %p157_p1 }
   0x6   : > { %161 = sbr.rel (%p158_p2) target bundleno = 901 (0x385), region = 32 }
   0xd   : > { %p191_p3 = scmp.lt.s32.totalorder %s3159_s13, 3  ;;  %vm381_vm0 = vcmask 1041408   ;;  %vm368_vm1 = vcmask 31744   ;;  %vm1214_vm2 = vcmask 523264   ;;  %vm3015_vm3 = vcmask 27648  }
   0xf   : > { %s5320_s13 = smov (!%p191_p3, %s3159_s13), 3 }
  0x10   : > { %s4118_s14 = sshll.u32 %s5320_s13, 8  ;;  %s3367_s15 = sshll.u32 %s5320_s13, 4 }
  0x11   : > { %s4124_s18 = scalar_lea.vmem %s5198_s0, %s4118_s14  ;;  %s4129_s21 = scalar_lea.vmem %s5199_s1, %s3367_s15 }
  0x12   : > { %v276_v0 = vld [vmem:[%s4129_s21] sm:$0x3]  ;;  %v277_v1 = vld [vmem:[%s4129_s21 + $0x2] sm:$0x3]  ;;  %v3764_v6 = vld [vmem:[%s4124_s18 + $0x8] sm:$0xff]   ;;  %s4196_s24 = scalar_lea.vmem %s5200_s2, %s4118_s14  ;;  %s5065_s27 = scalar_lea.vmem %s5201_s3, %s4118_s14 }
  0x13   : > { %3746 = vmatprep.subr.msk.bf16.mxu0 %vm381_vm0, %v276_v0  ;;  %3747 = vmatprep.subr.msk.bf16.mxu1 %vm381_vm0, %v277_v1  ;;  %v383_v2 = vsel %vm381_vm0, %v276_v0, 0  ;;  %v483_v3 = vsel %vm381_vm0, %v277_v1, 0  ;;  %v3762_v4 = vld [vmem:[%s4124_s18] sm:$0xff]   ;;  %v3765_v7 = vld [vmem:[%s4124_s18 + $0x28] sm:$0xff]   ;;  %v3766_v8 = vld [vmem:[%s4124_s18 + $0x10] sm:$0xff]  }
  0x14   : > { %v3763_v5 = vld [vmem:[%s4124_s18 + $0x20] sm:$0xff]   ;;  %3539 = vmatpush3.bf16.msra.mxu0 %v383_v2  ;;  %3549 = vmatpush3.bf16.msra.mxu1 %v483_v3  ;;  %v3767_v10 = vld [vmem:[%s4124_s18 + $0x18] sm:$0xff]   ;;  %v3768_v11 = vld [vmem:[%s4124_s18 + $0x30] sm:$0xff]  }
  0x15   : > { %3540 = vmatprep.mubr.msk.bf16.mxu0 %vm368_vm1, %v3762_v4  ;;  %3550 = vmatprep.mubr.msk.bf16.mxu1 %vm368_vm1, %v3763_v5  ;;  %v278_v9 = vld [vmem:[%s4129_s21 + $0x4] sm:$0x3]  ;;  %v3769_v13 = vld [vmem:[%s4124_s18 + $0x38] sm:$0xff]   ;;  %v279_v14 = vld [vmem:[%s4129_s21 + $0x6] sm:$0x3] }
  0x16   : > { %3748 = vmatprep.subr.msk.bf16.mxu0 %vm381_vm0, %v278_v9  ;;  %v583_v12 = vsel %vm381_vm0, %v278_v9, 0  ;;  %3749 = vmatprep.subr.msk.bf16.mxu1 %vm381_vm0, %v279_v14  ;;  %v683_v15 = vsel %vm381_vm0, %v279_v14, 0  ;;  %v3770_v16 = vld [vmem:[%s4124_s18 + $0x40] sm:$0xff]   ;;  %v280_v18 = vld [vmem:[%s4129_s21 + $0x8] sm:$0x3]  ;;  %v3774_v22 = vld [vmem:[%s4124_s18 + $0x50] sm:$0xff]  }
  0x17   : > { %3541 = vmatmul.mubr.msk.bf16.vlgmr.msra.gmra.mrb[0].mxu0 %vm368_vm1, %v3764_v6  ;;  %3551 = vmatmul.mubr.msk.bf16.vlgmr.msra.gmra.mrb[0].mxu1 %vm368_vm1, %v3765_v7  ;;  %v3772_v17 = vld [vmem:[%s4124_s18 + $0x60] sm:$0xff]   ;;  %v3771_v19 = vld [vmem:[%s4124_s18 + $0x48] sm:$0xff]   ;;  %v3776_v23 = vld [vmem:[%s4124_s18 + $0x70] sm:$0xff]   ;;  %v783_v24 = vsel %vm381_vm0, %v280_v18, 0 }
  0x18   : > { %3544 = vmatprep.mubr.msk.bf16.mxu0 %vm368_vm1, %v3766_v8  ;;  %3559 = vmatpush3.bf16.msra.mxu0 %v583_v12  ;;  %v3773_v20 = vld [vmem:[%s4124_s18 + $0x68] sm:$0xff]   ;;  %v3775_v26 = vld [vmem:[%s4124_s18 + $0x58] sm:$0xff]   ;;  %v3778_v29 = vld [vmem:[%s4124_s18 + $0x80] sm:$0xff]  }
  0x19   : > { %3554 = vmatprep.mubr.msk.bf16.mxu1 %vm368_vm1, %v3768_v11  ;;  %3569 = vmatpush3.bf16.msra.mxu1 %v683_v15  ;;  %v281_v21 = vld [vmem:[%s4129_s21 + $0xa] sm:$0x3]  ;;  %v282_v27 = vld [vmem:[%s4129_s21 + $0xc] sm:$0x3]  ;;  %v3777_v28 = vld [vmem:[%s4124_s18 + $0x78] sm:$0xff]  }
  0x1a   : > { %3750 = vmatprep.subr.msk.bf16.mxu0 %vm381_vm0, %v280_v18  ;;  %3751 = vmatprep.subr.msk.bf16.mxu1 %vm381_vm0, %v281_v21  ;;  %v883_v25 = vsel %vm381_vm0, %v281_v21, 0  ;;  %v283_v30 = vld [vmem:[%s4129_s21 + $0xe] sm:$0x3]  ;;  %v3780_v31 = vld [vmem:[%s4124_s18 + $0xa0] sm:$0xff]   ;;  %v3782_v34 = vld [vmem:[%s4124_s18 + $0x90] sm:$0xff]   ;;  %v983_v36 = vsel %vm381_vm0, %v282_v27, 0 }
  0x1b   : > { %v3779_v32 = vld [vmem:[%s4124_s18 + $0x88] sm:$0xff]   ;;  %v3784_v35 = vld [vmem:[%s4124_s18 + $0xb0] sm:$0xff]   ;;  %v1083_v37 = vsel %vm381_vm0, %v283_v30, 0  ;;  %v3783_v38 = vld [vmem:[%s4124_s18 + $0x98] sm:$0xff]  }
  0x1c   : > { %v3781_v33 = vld [vmem:[%s4124_s18 + $0xa8] sm:$0xff]   ;;  %v3785_v39 = vld [vmem:[%s4124_s18 + $0xb8] sm:$0xff]   ;;  %v3786_v40 = vld [vmem:[%s4124_s18 + $0xc0] sm:$0xff]  }
  0x1d   : > { %v3788_v41 = vld [vmem:[%s4124_s18 + $0xe0] sm:$0xff]   ;;  %v3787_v42 = vld [vmem:[%s4124_s18 + $0xc8] sm:$0xff]   ;;  %v3790_v44 = vld [vmem:[%s4124_s18 + $0xd0] sm:$0xff]  }
  0x1e   : > { %v3789_v43 = vld [vmem:[%s4124_s18 + $0xe8] sm:$0xff]   ;;  %v3792_v45 = vld [vmem:[%s4124_s18 + $0xf0] sm:$0xff]   ;;  %v3791_v46 = vld [vmem:[%s4124_s18 + $0xd8] sm:$0xff]  }
  0x1f   : > { %3545 = vmatmul.mubr.msk.bf16.gmra.mrb[4].mxu0 %vm368_vm1, %v3767_v10  ;;  %3555 = vmatmul.mubr.msk.bf16.gmra.mrb[4].mxu1 %vm368_vm1, %v3769_v13  ;;  %v3793_v47 = vld [vmem:[%s4124_s18 + $0xf8] sm:$0xff]  }
  0x20   : > { %3560 = vmatprep.mubr.msk.bf16.mxu0 %vm368_vm1, %v3770_v16  ;;  %3570 = vmatprep.mubr.msk.bf16.mxu1 %vm368_vm1, %v3772_v17 }
  0x27   : > { %3561 = vmatmul.mubr.msk.bf16.vlgmr.msra.gmra.mrb[8].mxu0 %vm368_vm1, %v3771_v19  ;;  %3571 = vmatmul.mubr.msk.bf16.vlgmr.msra.gmra.mrb[8].mxu1 %vm368_vm1, %v3773_v20 }
  0x28   : > { %3564 = vmatprep.mubr.msk.bf16.mxu0 %vm368_vm1, %v3774_v22  ;;  %3574 = vmatprep.mubr.msk.bf16.mxu1 %vm368_vm1, %v3776_v23 }
  0x29   : > { %3579 = vmatpush3.bf16.msra.mxu0 %v783_v24  ;;  %3589 = vmatpush3.bf16.msra.mxu1 %v883_v25 }
  0x2a   : > { %3752 = vmatprep.subr.msk.bf16.mxu0 %vm381_vm0, %v282_v27  ;;  %3753 = vmatprep.subr.msk.bf16.mxu1 %vm381_vm0, %v283_v30 }
  0x2f   : > { %3565 = vmatmul.mubr.msk.bf16.gmra.mrb[12].mxu0 %vm368_vm1, %v3775_v26  ;;  %3575 = vmatmul.mubr.msk.bf16.gmra.mrb[12].mxu1 %vm368_vm1, %v3777_v28 }
  0x30   : > { %3580 = vmatprep.mubr.msk.bf16.mxu0 %vm368_vm1, %v3778_v29  ;;  %3590 = vmatprep.mubr.msk.bf16.mxu1 %vm368_vm1, %v3780_v31 }
  0x37   : > { %3581 = vmatmul.mubr.msk.bf16.vlgmr.msra.gmra.mrb[16].mxu0 %vm368_vm1, %v3779_v32  ;;  %3591 = vmatmul.mubr.msk.bf16.vlgmr.msra.gmra.mrb[16].mxu1 %vm368_vm1, %v3781_v33 }
  0x38   : > { %3584 = vmatprep.mubr.msk.bf16.mxu0 %vm368_vm1, %v3782_v34  ;;  %3594 = vmatprep.mubr.msk.bf16.mxu1 %vm368_vm1, %v3784_v35 }
  0x39   : > { %3599 = vmatpush3.bf16.msra.mxu0 %v983_v36  ;;  %3609 = vmatpush3.bf16.msra.mxu1 %v1083_v37 }
  0x3f   : > { %3585 = vmatmul.mubr.msk.bf16.gmra.mrb[20].mxu0 %vm368_vm1, %v3783_v38  ;;  %3595 = vmatmul.mubr.msk.bf16.gmra.mrb[20].mxu1 %vm368_vm1, %v3785_v39 }
  0x40   : > { %3600 = vmatprep.mubr.msk.bf16.mxu0 %vm368_vm1, %v3786_v40  ;;  %3610 = vmatprep.mubr.msk.bf16.mxu1 %vm368_vm1, %v3788_v41 }
  0x47   : > { %3601 = vmatmul.mubr.msk.bf16.vlgmr.msra.gmra.mrb[24].mxu0 %vm368_vm1, %v3787_v42  ;;  %3611 = vmatmul.mubr.msk.bf16.vlgmr.msra.gmra.mrb[24].mxu1 %vm368_vm1, %v3789_v43 }
  0x48   : > { %3604 = vmatprep.mubr.msk.bf16.mxu0 %vm368_vm1, %v3790_v44  ;;  %3614 = vmatprep.mubr.msk.bf16.mxu1 %vm368_vm1, %v3792_v45 }
  0x4f   : > { %3605 = vmatmul.mubr.msk.bf16.gmra.mrb[28].mxu0 %vm368_vm1, %v3791_v46  ;;  %3615 = vmatmul.mubr.msk.bf16.gmra.mrb[28].mxu1 %vm368_vm1, %v3793_v47 }
  0xea   : > { %v3542_v48 = vpop.f32.mrb[0].mxu0  ;;  %v3552_v50 = vpop.f32.mrb[0].mxu1 }
  0xeb   : > { %v4225_v49 = vmul.f32 0.5, %v3542_v48  ;;  %v419_v51 = vpop.f32.mrb[1].mxu0  ;;  %v519_v52 = vpop.f32.mrb[1].mxu1  ;;  %v4227_v54 = vmul.f32 0.5, %v3552_v50 }
  0xec   : > { %v3543_v53 = vpop.f32.mrb[2].mxu0  ;;  %v4229_v55 = vmul.f32 0.5, %v519_v52  ;;  %v3553_v56 = vpop.f32.mrb[2].mxu1  ;;  %v4237_v62 = vmul.f32 0.5, %v419_v51 }
  0xed   : > { %v422_v57 = vpop.f32.mrb[3].mxu0  ;;  %v1221_v58 = vsel %vm1214_vm2, %v4225_v49, -inf  ;;  %v522_v59 = vpop.f32.mrb[3].mxu1  ;;  %v4233_v60 = vmul.f32 0.5, %v3543_v53  ;;  %v1245_v63 = vsel %vm1214_vm2, %v4227_v54, -inf  ;;  %v4241_v1 = vmul.f32 0.5, %v3553_v56 }
  0xee   : > { %1222 = vmax.xlane.f32.xlu0 %v1221_v58  ;;  %v1239_v61 = vsel %vm1214_vm2, %v4229_v55, -inf  ;;  %v4245_v7 = vmul.f32 0.5, %v422_v57  ;;  %v1215_v8 = vsel %vm1214_vm2, %v4237_v62, -inf  ;;  %v4249_v12 = vmul.f32 0.5, %v522_v59 }
  0xef   : > { %1240 = vmax.xlane.f32.xlu1 %v1239_v61  ;;  %v1224_v2 = vsel %vm1214_vm2, %v4233_v60, -inf  ;;  %v1248_v14 = vsel %vm1214_vm2, %v4241_v1, -inf }
  0xf0   : > { %v1218_v15 = vsel %vm1214_vm2, %v4245_v7, -inf  ;;  %v1242_v19 = vsel %vm1214_vm2, %v4249_v12, -inf }
  0xf2   : > { %1246 = vmax.xlane.f32.xlu0 %v1245_v63  ;;  %v3546_v0 = vpop.f32.mrb[4].mxu0  ;;  %v3556_v4 = vpop.f32.mrb[4].mxu1 }
  0xf3   : > { %v435_v3 = vpop.f32.mrb[5].mxu0  ;;  %1225 = vmax.xlane.f32.xlu1 %v1224_v2  ;;  %v535_v6 = vpop.f32.mrb[5].mxu1  ;;  %v4251_v13 = vmul.f32 0.5, %v3546_v0  ;;  %v4259_v18 = vmul.f32 0.5, %v3556_v4 }
  0xf4   : > { %v3547_v5 = vpop.f32.mrb[6].mxu0  ;;  %v3557_v10 = vpop.f32.mrb[6].mxu1  ;;  %v4271_v31 = vmul.f32 0.5, %v435_v3  ;;  %v4281_v39 = vmul.f32 0.5, %v535_v6 }
  0xf5   : > { %v438_v9 = vpop.f32.mrb[7].mxu0  ;;  %v538_v11 = vpop.f32.mrb[7].mxu1  ;;  %v4257_v17 = vmul.f32 0.5, %v3547_v5  ;;  %v1233_v20 = vsel %vm1214_vm2, %v4251_v13, -inf  ;;  %v4265_v28 = vmul.f32 0.5, %v3557_v10  ;;  %v1257_v30 = vsel %vm1214_vm2, %v4259_v18, -inf }
  0xf6   : > { %1216 = vmax.xlane.f32.xlu0 %v1215_v8  ;;  %v4273_v33 = vmul.f32 0.5, %v438_v9  ;;  %v1227_v40 = vsel %vm1214_vm2, %v4271_v31, -inf  ;;  %v4289_v44 = vmul.f32 0.5, %v538_v11  ;;  %v1251_v47 = vsel %vm1214_vm2, %v4281_v39, -inf }
  0xf7   : > { %1249 = vmax.xlane.f32.xlu1 %v1248_v14  ;;  %v1236_v29 = vsel %vm1214_vm2, %v4257_v17, -inf  ;;  %v1260_v34 = vsel %vm1214_vm2, %v4265_v28, -inf }
  0xf8   : > { %v1230_v46 = vsel %vm1214_vm2, %v4273_v33, -inf  ;;  %v1254_v52 = vsel %vm1214_vm2, %v4289_v44, -inf }
  0xfa   : > { %1219 = vmax.xlane.f32.xlu0 %v1218_v15  ;;  %v3562_v16 = vpop.f32.mrb[8].mxu0  ;;  %v3572_v22 = vpop.f32.mrb[8].mxu1 }
  0xfb   : > { %v619_v21 = vpop.f32.mrb[9].mxu0  ;;  %1243 = vmax.xlane.f32.xlu1 %v1242_v19  ;;  %v719_v24 = vpop.f32.mrb[9].mxu1  ;;  %v4291_v45 = vmul.f32 0.5, %v3562_v16  ;;  %v4301_v51 = vmul.f32 0.5, %v3572_v22 }
  0xfc   : > { %v3563_v23 = vpop.f32.mrb[10].mxu0  ;;  %v3573_v26 = vpop.f32.mrb[10].mxu1  ;;  %v4327_v5 = vmul.f32 0.5, %v619_v21  ;;  %v4343_v16 = vmul.f32 0.5, %v719_v24 }
  0xfd   : > { %v622_v25 = vpop.f32.mrb[11].mxu0  ;;  %v722_v27 = vpop.f32.mrb[11].mxu1  ;;  %v4299_v50 = vmul.f32 0.5, %v3563_v23  ;;  %v1269_v53 = vsel %vm1214_vm2, %v4291_v45, -inf  ;;  %v4321_v2 = vmul.f32 0.5, %v3573_v26  ;;  %v1293_v4 = vsel %vm1214_vm2, %v4301_v51, -inf }
  0xfe   : > { %1234 = vmax.xlane.f32.xlu0 %v1233_v20  ;;  %v4331_v8 = vmul.f32 0.5, %v622_v25  ;;  %v1263_v19 = vsel %vm1214_vm2, %v4327_v5, -inf  ;;  %v4353_v23 = vmul.f32 0.5, %v722_v27  ;;  %v1287_v24 = vsel %vm1214_vm2, %v4343_v16, -inf }
  0xff   : > { %1237 = vmax.xlane.f32.xlu1 %v1236_v29  ;;  %v1272_v3 = vsel %vm1214_vm2, %v4299_v50, -inf  ;;  %v1296_v9 = vsel %vm1214_vm2, %v4321_v2, -inf }
 0x100   : > { %5241 = vst [vmem:[#allocation2_spill] sm:$0xff] %v4353_v23  ;;  %v1266_v26 = vsel %vm1214_vm2, %v4331_v8, -inf  ;;  %v1290_v27 = vsel %vm1214_vm2, %v4353_v23, -inf }
 0x102   : > { %1258 = vmax.xlane.f32.xlu0 %v1257_v30  ;;  %v3566_v32 = vpop.f32.mrb[12].mxu0  ;;  %v3576_v36 = vpop.f32.mrb[12].mxu1 }
 0x103   : > { %v4277_v35 = vpop.f32.mrb[13].mxu0  ;;  %1261 = vmax.xlane.f32.xlu1 %v1260_v34  ;;  %v4279_v38 = vpop.f32.mrb[13].mxu1  ;;  %v4355_v25 = vmul.f32 0.5, %v3566_v32  ;;  %v4365_v34 = vmul.f32 0.5, %v3576_v36 }
 0x104   : > { %v3567_v37 = vpop.f32.mrb[14].mxu0  ;;  %v3577_v42 = vpop.f32.mrb[14].mxu1 }
 0x105   : > { %v4285_v41 = vpop.f32.mrb[15].mxu0  ;;  %v4287_v43 = vpop.f32.mrb[15].mxu1  ;;  %5242 = vst [vmem:[#allocation3_spill] sm:$0xff] %v4355_v25  ;;  %v4363_v30 = vmul.f32 0.5, %v3567_v37  ;;  %5244 = vst [vmem:[#allocation5_spill] sm:$0xff] %v4365_v34  ;;  %v1281_v32 = vsel %vm1214_vm2, %v4355_v25, -inf }
 0x106   : > { %1228 = vmax.xlane.f32.xlu0 %v1227_v40  ;;  %v4421_v25 = vmul.f32 0.5, %v4287_v43 }
 0x107   : > { %1231 = vmax.xlane.f32.xlu1 %v1230_v46  ;;  %5243 = vst [vmem:[#allocation4_spill] sm:$0xff] %v4363_v30 }
 0x108   : > { %5247 = vst [vmem:[#allocation8_spill] sm:$0xff] %v4421_v25  ;;  %v1302_v43 = vsel %vm1214_vm2, %v4421_v25, -inf }
 0x10a   : > { %1252 = vmax.xlane.f32.xlu0 %v1251_v47  ;;  %v4297_v48 = vpop.f32.mrb[16].mxu0  ;;  %v4309_v57 = vpop.f32.mrb[16].mxu1 }
 0x10b   : > { %v4307_v56 = vpop.f32.mrb[17].mxu0  ;;  %1255 = vmax.xlane.f32.xlu1 %v1254_v52  ;;  %v4313_v59 = vpop.f32.mrb[17].mxu1 }
 0x10c   : > { %v4311_v58 = vpop.f32.mrb[18].mxu0  ;;  %v4317_v63 = vpop.f32.mrb[18].mxu1 }
 0x10d   : > { %v4315_v61 = vpop.f32.mrb[19].mxu0  ;;  %v4319_v0 = vpop.f32.mrb[19].mxu1  ;;  %v4431_v23 = vmul.f32 0.5, %v4311_v58 }
 0x10e   : > { %1270 = vmax.xlane.f32.xlu0 %v1269_v53  ;;  %v4451_v25 = vmul.f32 0.5, %v4315_v61 }
 0x10f   : > { %1273 = vmax.xlane.f32.xlu1 %v1272_v3  ;;  %v4385_v3 = vmul.f32 0.5, %v3577_v42 }
 0x110   : > { %v1314_v61 = vsel %vm1214_vm2, %v4451_v25, -inf }
 0x111   : > { %5245 = vst [vmem:[#allocation6_spill] sm:$0xff] %v4385_v3  ;;  %v1308_v42 = vsel %vm1214_vm2, %v4385_v3, -inf }
 0x112   : > { %1294 = vmax.xlane.f32.xlu0 %v1293_v4  ;;  %v4329_v6 = vpop.f32.mrb[20].mxu0  ;;  %v4337_v11 = vpop.f32.mrb[20].mxu1  ;;  %v1284_v4 = vsel %vm1214_vm2, %v4363_v30, -inf }
 0x113   : > { %v4335_v10 = vpop.f32.mrb[21].mxu0  ;;  %1297 = vmax.xlane.f32.xlu1 %v1296_v9  ;;  %v4341_v15 = vpop.f32.mrb[21].mxu1  ;;  %v1305_v9 = vsel %vm1214_vm2, %v4365_v34, -inf }
 0x114   : > { %v4339_v14 = vpop.f32.mrb[22].mxu0  ;;  %v4349_v21 = vpop.f32.mrb[22].mxu1 }
 0x115   : > { %v4347_v20 = vpop.f32.mrb[23].mxu0  ;;  %v4351_v22 = vpop.f32.mrb[23].mxu1 }
 0x116   : > { %1264 = vmax.xlane.f32.xlu0 %v1263_v19  ;;  %v4392_v19 = vmul.f32 0.5, %v4277_v35  ;;  %v4410_v35 = vmul.f32 0.5, %v4279_v38 }
 0x117   : > { %1267 = vmax.xlane.f32.xlu1 %v1266_v26 }
 0x118   : > { %5246 = vst [vmem:[#allocation7_spill] sm:$0xff] %v4392_v19 }
 0x11a   : > { %1288 = vmax.xlane.f32.xlu0 %v1287_v24  ;;  %v4361_v29 = vpop.f32.mrb[24].mxu0  ;;  %v4373_v46 = vpop.f32.mrb[24].mxu1  ;;  %v4397_v24 = vmul.f32 0.5, %v4285_v41 }
 0x11b   : > { %v4371_v40 = vpop.f32.mrb[25].mxu0  ;;  %1291 = vmax.xlane.f32.xlu1 %v1290_v27  ;;  %v4377_v52 = vpop.f32.mrb[25].mxu1 }
 0x11c   : > { %v4375_v47 = vpop.f32.mrb[26].mxu0  ;;  %v4381_v37 = vpop.f32.mrb[26].mxu1  ;;  %v1278_v38 = vsel %vm1214_vm2, %v4397_v24, -inf }
 0x11d   : > { %v4379_v53 = vpop.f32.mrb[27].mxu0  ;;  %v4383_v36 = vpop.f32.mrb[27].mxu1 }
 0x11e   : > { %1282 = vmax.xlane.f32.xlu0 %v1281_v32 }
 0x11f   : > { %1285 = vmax.xlane.f32.xlu1 %v1284_v4 }
 0x122   : > { %1306 = vmax.xlane.f32.xlu0 %v1305_v9  ;;  %v4394_v26 = vpop.f32.mrb[28].mxu0  ;;  %v4403_v32 = vpop.f32.mrb[28].mxu1  ;;  %v1275_v9 = vsel %vm1214_vm2, %v4392_v19, -inf  ;;  %v1299_v19 = vsel %vm1214_vm2, %v4410_v35, -inf }
 0x123   : > { %v4401_v27 = vpop.f32.mrb[29].mxu0  ;;  %1309 = vmax.xlane.f32.xlu1 %v1308_v42  ;;  %v4407_v4 = vpop.f32.mrb[29].mxu1  ;;  %v4424_v42 = vmul.f32 0.5, %v4297_v48 }
 0x124   : > { %v4405_v30 = vpop.f32.mrb[30].mxu0  ;;  %v4416_v34 = vpop.f32.mrb[30].mxu1 }
 0x125   : > { %v4414_v41 = vpop.f32.mrb[31].mxu0  ;;  %v4418_v3 = vpop.f32.mrb[31].mxu1  ;;  %v1317_v48 = vsel %vm1214_vm2, %v4424_v42, -inf }
 0x126   : > { %1276 = vmax.xlane.f32.xlu0 %v1275_v9  ;;  %v4434_v9 = vmul.f32 0.5, %v4309_v57  ;;  %v4448_v57 = vmul.f32 0.5, %v4307_v56  ;;  %v4464_v56 = vmul.f32 0.5, %v4329_v6 }
 0x127   : > { %1279 = vmax.xlane.f32.xlu1 %v1278_v38  ;;  %v4441_v38 = vmul.f32 0.5, %v4317_v63  ;;  %v4456_v63 = vmul.f32 0.5, %v4313_v59  ;;  %v4471_v59 = vmul.f32 0.5, %v4339_v14 }
 0x128   : > { %v1341_v58 = vsel %vm1214_vm2, %v4434_v9, -inf  ;;  %v1329_v6 = vsel %vm1214_vm2, %v4464_v56, -inf }
 0x12a   : > { %1300 = vmax.xlane.f32.xlu0 %v1299_v19  ;;  %v1320_v19 = vsel %vm1214_vm2, %v4431_v23, -inf }
 0x12b   : > { %1303 = vmax.xlane.f32.xlu1 %v1302_v43  ;;  %v1344_v43 = vsel %vm1214_vm2, %v4441_v38, -inf }
 0x12e   : > { %1318 = vmax.xlane.f32.xlu0 %v1317_v48  ;;  %v1311_v48 = vsel %vm1214_vm2, %v4448_v57, -inf }
 0x12f   : > { %1321 = vmax.xlane.f32.xlu1 %v1320_v19  ;;  %v4461_v19 = vmul.f32 0.5, %v4319_v0 }
 0x131   : > { %v1338_v0 = vsel %vm1214_vm2, %v4461_v19, -inf }
 0x132   : > { %1342 = vmax.xlane.f32.xlu0 %v1341_v58  ;;  %v1335_v58 = vsel %vm1214_vm2, %v4456_v63, -inf }
 0x133   : > { %1345 = vmax.xlane.f32.xlu1 %v1344_v43  ;;  %v4474_v43 = vmul.f32 0.5, %v4337_v11  ;;  %v4488_v11 = vmul.f32 0.5, %v4335_v10  ;;  %v4504_v10 = vmul.f32 0.5, %v4361_v29 }
 0x135   : > { %v1353_v14 = vsel %vm1214_vm2, %v4474_v43, -inf  ;;  %v1365_v29 = vsel %vm1214_vm2, %v4504_v10, -inf }
 0x136   : > { %1312 = vmax.xlane.f32.xlu0 %v1311_v48  ;;  %v4481_v48 = vmul.f32 0.5, %v4349_v21  ;;  %v4496_v21 = vmul.f32 0.5, %v4341_v15  ;;  %v4511_v15 = vmul.f32 0.5, %v4375_v47 }
 0x137   : > { %1315 = vmax.xlane.f32.xlu1 %v1314_v61  ;;  %v1332_v61 = vsel %vm1214_vm2, %v4471_v59, -inf }
 0x13a   : > { %1336 = vmax.xlane.f32.xlu0 %v1335_v58  ;;  %v4491_v58 = vmul.f32 0.5, %v4347_v20 }
 0x13b   : > { %1339 = vmax.xlane.f32.xlu1 %v1338_v0  ;;  %v1356_v0 = vsel %vm1214_vm2, %v4481_v48, -inf }
 0x13c   : > { %v1326_v20 = vsel %vm1214_vm2, %v4491_v58, -inf }
 0x13e   : > { %1330 = vmax.xlane.f32.xlu0 %v1329_v6  ;;  %v1323_v6 = vsel %vm1214_vm2, %v4488_v11, -inf }
 0x13f   : > { %1333 = vmax.xlane.f32.xlu1 %v1332_v61  ;;  %v4501_v61 = vmul.f32 0.5, %v4351_v22 }
 0x141   : > { %v1350_v22 = vsel %vm1214_vm2, %v4501_v61, -inf }
 0x142   : > { %1354 = vmax.xlane.f32.xlu0 %v1353_v14  ;;  %v1347_v14 = vsel %vm1214_vm2, %v4496_v21, -inf }
 0x143   : > { %1357 = vmax.xlane.f32.xlu1 %v1356_v0  ;;  %v4514_v0 = vmul.f32 0.5, %v4373_v46  ;;  %v4528_v46 = vmul.f32 0.5, %v4371_v40  ;;  %v4544_v40 = vmul.f32 0.5, %v4394_v26 }
 0x145   : > { %v1389_v47 = vsel %vm1214_vm2, %v4514_v0, -inf  ;;  %5248 = vst [vmem:[#allocation9_spill] sm:$0xff] %v4544_v40  ;;  %v1377_v26 = vsel %vm1214_vm2, %v4544_v40, -inf }
 0x146   : > { %1324 = vmax.xlane.f32.xlu0 %v1323_v6  ;;  %v4521_v6 = vmul.f32 0.5, %v4381_v37  ;;  %v4536_v37 = vmul.f32 0.5, %v4377_v52  ;;  %v4551_v52 = vmul.f32 0.5, %v4405_v30 }
 0x147   : > { %1327 = vmax.xlane.f32.xlu1 %v1326_v20  ;;  %v1368_v20 = vsel %vm1214_vm2, %v4511_v15, -inf }
 0x148   : > { %5249 = vst [vmem:[#allocation10_spill] sm:$0xff] %v4551_v52 }
 0x14a   : > { %1348 = vmax.xlane.f32.xlu0 %v1347_v14  ;;  %v4531_v14 = vmul.f32 0.5, %v4379_v53 }
 0x14b   : > { %1351 = vmax.xlane.f32.xlu1 %v1350_v22  ;;  %v1392_v22 = vsel %vm1214_vm2, %v4521_v6, -inf }
 0x14c   : > { %v1362_v53 = vsel %vm1214_vm2, %v4531_v14, -inf }
 0x14e   : > { %1366 = vmax.xlane.f32.xlu0 %v1365_v29  ;;  %v1359_v29 = vsel %vm1214_vm2, %v4528_v46, -inf }
 0x14f   : > { %1369 = vmax.xlane.f32.xlu1 %v1368_v20  ;;  %v4541_v20 = vmul.f32 0.5, %v4383_v36 }
 0x151   : > { %v1386_v36 = vsel %vm1214_vm2, %v4541_v20, -inf }
 0x152   : > { %1390 = vmax.xlane.f32.xlu0 %v1389_v47  ;;  %v1383_v47 = vsel %vm1214_vm2, %v4536_v37, -inf }
 0x153   : > { %1393 = vmax.xlane.f32.xlu1 %v1392_v22  ;;  %v4554_v22 = vmul.f32 0.5, %v4403_v32  ;;  %v4568_v32 = vmul.f32 0.5, %v4401_v27 }
 0x155   : > { %5250 = vst [vmem:[#allocation11_spill] sm:$0xff] %v4554_v22  ;;  %v1401_v30 = vsel %vm1214_vm2, %v4554_v22, -inf  ;;  %5252 = vst [vmem:[#allocation13_spill] sm:$0xff] %v4568_v32 }
 0x156   : > { %1360 = vmax.xlane.f32.xlu0 %v1359_v29  ;;  %v4561_v29 = vmul.f32 0.5, %v4416_v34  ;;  %v4576_v34 = vmul.f32 0.5, %v4407_v4 }
 0x157   : > { %1363 = vmax.xlane.f32.xlu1 %v1362_v53  ;;  %v1380_v53 = vsel %vm1214_vm2, %v4551_v52, -inf }
 0x158   : > { %5251 = vst [vmem:[#allocation12_spill] sm:$0xff] %v4561_v29  ;;  %5254 = vst [vmem:[#allocation15_spill] sm:$0xff] %v4576_v34 }
 0x15a   : > { %1384 = vmax.xlane.f32.xlu0 %v1383_v47  ;;  %v4571_v47 = vmul.f32 0.5, %v4414_v41  ;;  %v1395_v41 = vsel %vm1214_vm2, %v4576_v34, -inf }
 0x15b   : > { %1387 = vmax.xlane.f32.xlu1 %v1386_v36  ;;  %v1404_v36 = vsel %vm1214_vm2, %v4561_v29, -inf }
 0x15c   : > { %5253 = vst [vmem:[#allocation14_spill] sm:$0xff] %v4571_v47  ;;  %v1374_v27 = vsel %vm1214_vm2, %v4571_v47, -inf }
 0x15e   : > { %1378 = vmax.xlane.f32.xlu0 %v1377_v26  ;;  %v1371_v26 = vsel %vm1214_vm2, %v4568_v32, -inf }
 0x15f   : > { %1381 = vmax.xlane.f32.xlu1 %v1380_v53  ;;  %v4581_v53 = vmul.f32 0.5, %v4418_v3 }
 0x161   : > { %5255 = vst [vmem:[#allocation16_spill] sm:$0xff] %v4581_v53 }
 0x162   : > { %1402 = vmax.xlane.f32.xlu0 %v1401_v30  ;;  %v1398_v30 = vsel %vm1214_vm2, %v4581_v53, -inf }
 0x163   : > { %1405 = vmax.xlane.f32.xlu1 %v1404_v36 }
 0x166   : > { %1372 = vmax.xlane.f32.xlu0 %v1371_v26 }
 0x167   : > { %1375 = vmax.xlane.f32.xlu1 %v1374_v27 }
 0x16a   : > { %1396 = vmax.xlane.f32.xlu0 %v1395_v41 }
 0x16b   : > { %1399 = vmax.xlane.f32.xlu1 %v1398_v30 }
 0x17b   : > { %v1223_v4 = vpop.xlane.xlu0 %1222 }
 0x17c   : > { %v1409_v36 = vsub.f32 %v4225_v49, %v1223_v4  ;;  %v1241_v29 = vpop.xlane.xlu1 %1240 }
 0x17d   : > { %v1415_v47 = vsub.f32 %v4229_v55, %v1241_v29 }
 0x17e   : > { %v1475_v26 = vmul.f32 1.442695, %v1409_v36 }
 0x17f   : > { %v1247_v22 = vpop.xlane.xlu0 %1246  ;;  %v1487_v53 = vmul.f32 1.442695, %v1415_v47 }
 0x180   : > { %3826 = vpow2.f32 %v1475_v26  ;;  %v1417_v3 = vsub.f32 %v4227_v54, %v1247_v22  ;;  %v1226_v27 = vpop.xlane.xlu1 %1225 }
 0x181   : > { %v1410_v34 = vsub.f32 %v4233_v60, %v1226_v27 }
 0x182   : > { %v1491_v32 = vmul.f32 1.442695, %v1417_v3 }
 0x183   : > { %v1217_v41 = vpop.xlane.xlu0 %1216  ;;  %v1477_v52 = vmul.f32 1.442695, %v1410_v34 }
 0x184   : > { %3828 = vpow2.f32 %v1491_v32  ;;  %v1407_v30 = vsub.f32 %v4237_v62, %v1217_v41  ;;  %v1250_v40 = vpop.xlane.xlu1 %1249 }
 0x185   : > { %3830 = vpow2.f32 %v1477_v52  ;;  %v1418_v4 = vsub.f32 %v4241_v1, %v1250_v40 }
 0x186   : > { %v1471_v49 = vmul.f32 1.442695, %v1407_v30 }
 0x187   : > { %v1220_v36 = vpop.xlane.xlu0 %1219  ;;  %v1493_v54 = vmul.f32 1.442695, %v1418_v4 }
 0x188   : > { %3832 = vpow2.f32 %v1471_v49  ;;  %v1408_v55 = vsub.f32 %v4245_v7, %v1220_v36  ;;  %v1244_v22 = vpop.xlane.xlu1 %1243 }
 0x189   : > { %3834 = vpow2.f32 %v1487_v53  ;;  %v1416_v32 = vsub.f32 %v4249_v12, %v1244_v22 }
 0x18a   : > { %v4596_v29 = vpop.eup %3826  ;;  %3836 = vpow2.f32 %v1493_v54  ;;  %v1473_v60 = vmul.f32 1.442695, %v1408_v55 }
 0x18b   : > { %v1235_v62 = vpop.xlane.xlu0 %1234  ;;  %v1605_v52 = vsel %vm1214_vm2, %v4596_v29, 0.0  ;;  %v1489_v47 = vmul.f32 1.442695, %v1416_v32 }
 0x18c   : > { %3838 = vpow2.f32 %v1473_v60  ;;  %v1413_v1 = vsub.f32 %v4251_v13, %v1235_v62  ;;  %1606 = vadd.xlane.f32.xlu0 %v1605_v52  ;;  %v1238_v40 = vpop.xlane.xlu1 %1237 }
 0x18d   : > { %v1414_v53 = vsub.f32 %v4257_v17, %v1238_v40  ;;  %3840 = vpow2.f32 %v1489_v47 }
 0x18e   : > { %v4602_v34 = vpop.eup %3828  ;;  %v1483_v7 = vmul.f32 1.442695, %v1413_v1 }
 0x18f   : > { %v1259_v26 = vpop.xlane.xlu0 %1258  ;;  %v1629_v12 = vsel %vm1214_vm2, %v4602_v34, 0.0  ;;  %v4607_v3 = vpop.eup %3830  ;;  %v1485_v27 = vmul.f32 1.442695, %v1414_v53 }
 0x190   : > { %3842 = vpow2.f32 %v1483_v7  ;;  %v1421_v41 = vsub.f32 %v4259_v18, %v1259_v26  ;;  %1630 = vadd.xlane.f32.xlu0 %v1629_v12  ;;  %v1262_v13 = vpop.xlane.xlu1 %1261  ;;  %v1608_v30 = vsel %vm1214_vm2, %v4607_v3, 0.0 }
 0x191   : > { %v1422_v17 = vsub.f32 %v4265_v28, %v1262_v13  ;;  %1609 = vadd.xlane.f32.xlu1 %v1608_v30  ;;  %3844 = vpow2.f32 %v1485_v27 }
 0x192   : > { %v4612_v49 = vpop.eup %3832  ;;  %v1499_v4 = vmul.f32 1.442695, %v1421_v41 }
 0x193   : > { %v4615_v36 = vpop.eup %3834  ;;  %v1229_v54 = vpop.xlane.xlu0 %1228  ;;  %v1599_v55 = vsel %vm1214_vm2, %v4612_v49, 0.0  ;;  %v1501_v18 = vmul.f32 1.442695, %v1422_v17 }
 0x194   : > { %v4619_v22 = vpop.eup %3836  ;;  %3846 = vpow2.f32 %v1499_v4  ;;  %v1411_v60 = vsub.f32 %v4271_v31, %v1229_v54  ;;  %1600 = vadd.xlane.f32.xlu0 %v1599_v55  ;;  %v1232_v32 = vpop.xlane.xlu1 %1231  ;;  %v1623_v40 = vsel %vm1214_vm2, %v4615_v36, 0.0 }
 0x195   : > { %v1632_v62 = vsel %vm1214_vm2, %v4619_v22, 0.0  ;;  %v1412_v47 = vsub.f32 %v4273_v33, %v1232_v32  ;;  %3848 = vpow2.f32 %v1501_v18 }
 0x196   : > { %v4624_v28 = vpop.eup %3838  ;;  %v1479_v52 = vmul.f32 1.442695, %v1411_v60  ;;  %1633 = vadd.xlane.f32.xlu1 %v1632_v62 }
 0x197   : > { %v1253_v1 = vpop.xlane.xlu0 %1252  ;;  %v1602_v7 = vsel %vm1214_vm2, %v4624_v28, 0.0  ;;  %v1481_v31 = vmul.f32 1.442695, %v1412_v47  ;;  %v4632_v26 = vpop.eup %3840 }
 0x198   : > { %3850 = vpow2.f32 %v1479_v52  ;;  %v1419_v53 = vsub.f32 %v4281_v39, %v1253_v1  ;;  %1624 = vadd.xlane.f32.xlu0 %v1623_v40  ;;  %v1256_v12 = vpop.xlane.xlu1 %1255  ;;  %v1626_v55 = vsel %vm1214_vm2, %v4632_v26, 0.0 }
 0x199   : > { %v1420_v41 = vsub.f32 %v4289_v44, %v1256_v12  ;;  %3852 = vpow2.f32 %v1481_v31 }
 0x19a   : > { %v4634_v27 = vpop.eup %3842  ;;  %v1495_v33 = vmul.f32 1.442695, %v1419_v53  ;;  %1603 = vadd.xlane.f32.xlu1 %v1602_v7 }
 0x19b   : > { %v1271_v13 = vpop.xlane.xlu0 %1270  ;;  %v1617_v30 = vsel %vm1214_vm2, %v4634_v27, 0.0  ;;  %v1497_v4 = vmul.f32 1.442695, %v1420_v41  ;;  %v4640_v39 = vpop.eup %3844 }
 0x19c   : > { %3854 = vpow2.f32 %v1495_v33  ;;  %v1425_v17 = vsub.f32 %v4291_v45, %v1271_v13  ;;  %1618 = vadd.xlane.f32.xlu0 %v1617_v30  ;;  %v1274_v54 = vpop.xlane.xlu1 %1273  ;;  %v1620_v40 = vsel %vm1214_vm2, %v4640_v39, 0.0 }
 0x19d   : > { %v1426_v60 = vsub.f32 %v4299_v50, %v1274_v54  ;;  %3856 = vpow2.f32 %v1497_v4  ;;  %v3794_v54 = vld [vmem:[%s4196_s24] sm:$0xff]  }
 0x19e   : > { %v4644_v18 = vpop.eup %3846  ;;  %v1507_v44 = vmul.f32 1.442695, %v1425_v17  ;;  %1627 = vadd.xlane.f32.xlu1 %v1626_v55  ;;  %3618 = vmatprep.subr.bf16.mxu0 %v3794_v54 }
 0x19f   : > { %v1295_v32 = vpop.xlane.xlu0 %1294  ;;  %v1641_v62 = vsel %vm1214_vm2, %v4644_v18, 0.0  ;;  %v1509_v45 = vmul.f32 1.442695, %v1426_v60  ;;  %v4650_v47 = vpop.eup %3848  ;;  %3619 = vmatpush3.bf16.msra.mxu0 %v3794_v54 }
 0x1a0   : > { %3858 = vpow2.f32 %v1507_v44  ;;  %v1433_v52 = vsub.f32 %v4301_v51, %v1295_v32  ;;  %1642 = vadd.xlane.f32.xlu0 %v1641_v62  ;;  %v1298_v1 = vpop.xlane.xlu1 %1297  ;;  %v1644_v30 = vsel %vm1214_vm2, %v4650_v47, 0.0 }
 0x1a1   : > { %v1434_v31 = vsub.f32 %v4321_v2, %v1298_v1  ;;  %3860 = vpow2.f32 %v1509_v45  ;;  %v5256_v1 = vld [vmem:[#allocation2_spill] sm:$0xff] }
 0x1a2   : > { %v4654_v7 = vpop.eup %3850  ;;  %v1523_v50 = vmul.f32 1.442695, %v1433_v52  ;;  %1621 = vadd.xlane.f32.xlu1 %v1620_v40 }
 0x1a3   : > { %v1265_v53 = vpop.xlane.xlu0 %1264  ;;  %v1611_v12 = vsel %vm1214_vm2, %v4654_v7, 0.0  ;;  %v1525_v51 = vmul.f32 1.442695, %v1434_v31  ;;  %v4660_v41 = vpop.eup %3852  ;;  %v3796_v31 = vld [vmem:[%s4196_s24 + $0x20] sm:$0xff]  }
 0x1a4   : > { %3862 = vpow2.f32 %v1523_v50  ;;  %v1423_v33 = vsub.f32 %v4327_v5, %v1265_v53  ;;  %1612 = vadd.xlane.f32.xlu0 %v1611_v12  ;;  %v1268_v13 = vpop.xlane.xlu1 %1267  ;;  %v3795_v50 = vld [vmem:[%s4196_s24 + $0x8] sm:$0xff]   ;;  %3634 = vmatprep.subr.bf16.mxu1 %v3796_v31 }
 0x1a5   : > { %v1424_v17 = vsub.f32 %v4331_v8, %v1268_v13  ;;  %3864 = vpow2.f32 %v1525_v51  ;;  %v1614_v8 = vsel %vm1214_vm2, %v4660_v41, 0.0  ;;  %v5257_v51 = vld [vmem:[#allocation3_spill] sm:$0xff]  ;;  %3620 = vmatprep.subr.bf16.mxu0 %v3795_v50  ;;  %3635 = vmatpush3.bf16.msra.mxu1 %v3796_v31 }
 0x1a6   : > { %v4664_v4 = vpop.eup %3854  ;;  %v1503_v2 = vmul.f32 1.442695, %v1423_v33  ;;  %1645 = vadd.xlane.f32.xlu1 %v1644_v30  ;;  %3621 = vmatpush3.bf16.msra.mxu0 %v3795_v50 }
 0x1a7   : > { %v1289_v55 = vpop.xlane.xlu0 %1288  ;;  %v1635_v5 = vsel %vm1214_vm2, %v4664_v4, 0.0  ;;  %v1505_v44 = vmul.f32 1.442695, %v1424_v17  ;;  %v4671_v32 = vpop.eup %3856 }
 0x1a8   : > { %3866 = vpow2.f32 %v1503_v2  ;;  %v1431_v60 = vsub.f32 %v4343_v16, %v1289_v55  ;;  %1636 = vadd.xlane.f32.xlu0 %v1635_v5  ;;  %v1292_v62 = vpop.xlane.xlu1 %1291  ;;  %v1638_v2 = vsel %vm1214_vm2, %v4671_v32, 0.0  ;;  %v5258_v55 = vld [vmem:[#allocation4_spill] sm:$0xff] }
 0x1a9   : > { %v1432_v40 = vsub.f32 %v5256_v1, %v1292_v62  ;;  %3868 = vpow2.f32 %v1505_v44  ;;  %v3797_v44 = vld [vmem:[%s4196_s24 + $0x10] sm:$0xff]   ;;  %v5259_v1 = vld [vmem:[#allocation5_spill] sm:$0xff] }
 0x1aa   : > { %v4675_v45 = vpop.eup %3858  ;;  %v1519_v52 = vmul.f32 1.442695, %v1431_v60  ;;  %1615 = vadd.xlane.f32.xlu1 %v1614_v8  ;;  %v3798_v60 = vld [vmem:[%s4196_s24 + $0x28] sm:$0xff]   ;;  %3622 = vmatprep.subr.bf16.mxu0 %v3797_v44 }
 0x1ab   : > { %v1283_v53 = vpop.xlane.xlu0 %1282  ;;  %v1653_v16 = vsel %vm1214_vm2, %v4675_v45, 0.0  ;;  %v1521_v12 = vmul.f32 1.442695, %v1432_v40  ;;  %v4683_v13 = vpop.eup %3860  ;;  %3636 = vmatprep.subr.bf16.mxu1 %v3798_v60  ;;  %3623 = vmatpush3.bf16.msra.mxu0 %v3797_v44 }
 0x1ac   : > { %3870 = vpow2.f32 %v1519_v52  ;;  %v1429_v33 = vsub.f32 %v5257_v51, %v1283_v53  ;;  %1654 = vadd.xlane.f32.xlu0 %v1653_v16  ;;  %v1286_v30 = vpop.xlane.xlu1 %1285  ;;  %v1656_v31 = vsel %vm1214_vm2, %v4683_v13, 0.0  ;;  %v5260_v51 = vld [vmem:[#allocation6_spill] sm:$0xff]  ;;  %3637 = vmatpush3.bf16.msra.mxu1 %v3798_v60 }
 0x1ad   : > { %v1430_v5 = vsub.f32 %v5258_v55, %v1286_v30  ;;  %3872 = vpow2.f32 %v1521_v12  ;;  %v3799_v30 = vld [vmem:[%s4196_s24 + $0x18] sm:$0xff]  }
 0x1ae   : > { %v4687_v17 = vpop.eup %3862  ;;  %v1515_v54 = vmul.f32 1.442695, %v1429_v33  ;;  %1639 = vadd.xlane.f32.xlu1 %v1638_v2  ;;  %v3800_v2 = vld [vmem:[%s4196_s24 + $0x30] sm:$0xff]   ;;  %3624 = vmatprep.subr.bf16.mxu0 %v3799_v30 }
 0x1af   : > { %v1307_v62 = vpop.xlane.xlu0 %1306  ;;  %v1677_v8 = vsel %vm1214_vm2, %v4687_v17, 0.0  ;;  %v1517_v52 = vmul.f32 1.442695, %v1430_v5  ;;  %v4695_v50 = vpop.eup %3864  ;;  %3638 = vmatprep.subr.bf16.mxu1 %v3800_v2  ;;  %3625 = vmatpush3.bf16.msra.mxu0 %v3799_v30 }
 0x1b0   : > { %3874 = vpow2.f32 %v1515_v54  ;;  %v1437_v40 = vsub.f32 %v5259_v1, %v1307_v62  ;;  %1678 = vadd.xlane.f32.xlu0 %v1677_v8  ;;  %v1310_v53 = vpop.xlane.xlu1 %1309  ;;  %v5261_v62 = vld [vmem:[#allocation7_spill] sm:$0xff]  ;;  %v1680_v60 = vsel %vm1214_vm2, %v4695_v50, 0.0  ;;  %3639 = vmatpush3.bf16.msra.mxu1 %v3800_v2 }
 0x1b1   : > { %v1438_v33 = vsub.f32 %v5260_v51, %v1310_v53  ;;  %3876 = vpow2.f32 %v1517_v52 }
 0x1b2   : > { %v4699_v16 = vpop.eup %3866  ;;  %v1531_v12 = vmul.f32 1.442695, %v1437_v40  ;;  %1657 = vadd.xlane.f32.xlu1 %v1656_v31  ;;  %v3801_v31 = vld [vmem:[%s4196_s24 + $0x38] sm:$0xff]  }
 0x1b3   : > { %v1277_v54 = vpop.xlane.xlu0 %1276  ;;  %v1647_v55 = vsel %vm1214_vm2, %v4699_v16, 0.0  ;;  %v1533_v5 = vmul.f32 1.442695, %v1438_v33  ;;  %v4707_v44 = vpop.eup %3868  ;;  %3640 = vmatprep.subr.bf16.mxu1 %v3801_v31 }
 0x1b4   : > { %3878 = vpow2.f32 %v1531_v12  ;;  %v1427_v8 = vsub.f32 %v5261_v62, %v1277_v54  ;;  %1648 = vadd.xlane.f32.xlu0 %v1647_v55  ;;  %v1280_v1 = vpop.xlane.xlu1 %1279  ;;  %3641 = vmatpush3.bf16.msra.mxu1 %v3801_v31 }
 0x1b5   : > { %v1428_v53 = vsub.f32 %v4397_v24, %v1280_v1  ;;  %3880 = vpow2.f32 %v1533_v5  ;;  %v1650_v24 = vsel %vm1214_vm2, %v4707_v44, 0.0  ;;  %v5262_v5 = vld [vmem:[#allocation8_spill] sm:$0xff] }
 0x1b6   : > { %v4711_v52 = vpop.eup %3870  ;;  %v1511_v40 = vmul.f32 1.442695, %v1427_v8  ;;  %1681 = vadd.xlane.f32.xlu1 %v1680_v60 }
 0x1b7   : > { %v1301_v12 = vpop.xlane.xlu0 %1300  ;;  %v1671_v51 = vsel %vm1214_vm2, %v4711_v52, 0.0  ;;  %v1513_v33 = vmul.f32 1.442695, %v1428_v53  ;;  %v4718_v30 = vpop.eup %3872 }
 0x1b8   : > { %3882 = vpow2.f32 %v1511_v40  ;;  %v1435_v54 = vsub.f32 %v4410_v35, %v1301_v12  ;;  %1672 = vadd.xlane.f32.xlu0 %v1671_v51  ;;  %v1304_v55 = vpop.xlane.xlu1 %1303  ;;  %v1674_v51 = vsel %vm1214_vm2, %v4718_v30, 0.0 }
 0x1b9   : > { %v1436_v8 = vsub.f32 %v5262_v5, %v1304_v55  ;;  %3884 = vpow2.f32 %v1513_v33 }
 0x1ba   : > { %v4722_v62 = vpop.eup %3874  ;;  %v1527_v2 = vmul.f32 1.442695, %v1435_v54  ;;  %1651 = vadd.xlane.f32.xlu1 %v1650_v24 }
 0x1bb   : > { %v1319_v1 = vpop.xlane.xlu0 %1318  ;;  %v1665_v35 = vsel %vm1214_vm2, %v4722_v62, 0.0  ;;  %v1529_v60 = vmul.f32 1.442695, %v1436_v8  ;;  %v4728_v53 = vpop.eup %3876 }
 0x1bc   : > { %3886 = vpow2.f32 %v1527_v2  ;;  %v1441_v40 = vsub.f32 %v4424_v42, %v1319_v1  ;;  %1666 = vadd.xlane.f32.xlu0 %v1665_v35  ;;  %v1322_v12 = vpop.xlane.xlu1 %1321  ;;  %v1668_v1 = vsel %vm1214_vm2, %v4728_v53, 0.0 }
 0x1bd   : > { %v1442_v31 = vsub.f32 %v4431_v23, %v1322_v12  ;;  %3888 = vpow2.f32 %v1529_v60 }
 0x1be   : > { %v4732_v54 = vpop.eup %3878  ;;  %v1539_v55 = vmul.f32 1.442695, %v1441_v40  ;;  %1675 = vadd.xlane.f32.xlu1 %v1674_v51 }
 0x1bf   : > { %v1343_v33 = vpop.xlane.xlu0 %1342  ;;  %v1689_v24 = vsel %vm1214_vm2, %v4732_v54, 0.0  ;;  %v1541_v42 = vmul.f32 1.442695, %v1442_v31  ;;  %v4738_v5 = vpop.eup %3880 }
 0x1c0   : > { %3890 = vpow2.f32 %v1539_v55  ;;  %v1449_v2 = vsub.f32 %v4434_v9, %v1343_v33  ;;  %1690 = vadd.xlane.f32.xlu0 %v1689_v24  ;;  %v1346_v8 = vpop.xlane.xlu1 %1345  ;;  %v1692_v33 = vsel %vm1214_vm2, %v4738_v5, 0.0 }
 0x1c1   : > { %v1450_v60 = vsub.f32 %v4441_v38, %v1346_v8  ;;  %3892 = vpow2.f32 %v1541_v42 }
 0x1c2   : > { %v4742_v35 = vpop.eup %3882  ;;  %v1555_v23 = vmul.f32 1.442695, %v1449_v2  ;;  %1669 = vadd.xlane.f32.xlu1 %v1668_v1  ;;  %v4756_v2 = vld [vmem:[%s4196_s24 + $0x40] sm:$0xff]  }
 0x1c3   : > { %v1313_v40 = vpop.xlane.xlu0 %1312  ;;  %v1659_v12 = vsel %vm1214_vm2, %v4742_v35, 0.0  ;;  %v1557_v9 = vmul.f32 1.442695, %v1450_v60  ;;  %v4748_v55 = vpop.eup %3884  ;;  %3650 = vmatprep.subr.bf16.mxu0 %v4756_v2 }
 0x1c4   : > { %3894 = vpow2.f32 %v1555_v23  ;;  %v1439_v51 = vsub.f32 %v4448_v57, %v1313_v40  ;;  %1660 = vadd.xlane.f32.xlu0 %v1659_v12  ;;  %v1316_v31 = vpop.xlane.xlu1 %1315 }
 0x1c5   : > { %v1440_v42 = vsub.f32 %v4451_v25, %v1316_v31  ;;  %3896 = vpow2.f32 %v1557_v9  ;;  %v1662_v25 = vsel %vm1214_vm2, %v4748_v55, 0.0  ;;  %v4770_v31 = vld [vmem:[%s4196_s24 + $0x60] sm:$0xff]  }
 0x1c6   : > { %v4752_v24 = vpop.eup %3886  ;;  %v1535_v38 = vmul.f32 1.442695, %v1439_v51  ;;  %1693 = vadd.xlane.f32.xlu1 %v1692_v33  ;;  %3666 = vmatprep.subr.bf16.mxu1 %v4770_v31 }
 0x1c7   : > { %v1337_v8 = vpop.xlane.xlu0 %1336  ;;  %v1683_v57 = vsel %vm1214_vm2, %v4752_v24, 0.0  ;;  %v1537_v1 = vmul.f32 1.442695, %v1440_v42  ;;  %v4762_v60 = vpop.eup %3888 }
 0x1c8   : > { %3898 = vpow2.f32 %v1535_v38  ;;  %v1447_v23 = vsub.f32 %v4456_v63, %v1337_v8  ;;  %1684 = vadd.xlane.f32.xlu0 %v1683_v57  ;;  %v1340_v40 = vpop.xlane.xlu1 %1339 }
 0x1c9   : > { %v1448_v51 = vsub.f32 %v4461_v19, %v1340_v40  ;;  %3900 = vpow2.f32 %v1537_v1  ;;  %v1686_v19 = vsel %vm1214_vm2, %v4762_v60, 0.0 }
 0x1ca   : > { %v4766_v12 = vpop.eup %3890  ;;  %v1551_v9 = vmul.f32 1.442695, %v1447_v23  ;;  %1663 = vadd.xlane.f32.xlu1 %v1662_v25 }
 0x1cb   : > { %5263 = vst [vmem:[#allocation2_spill] sm:$0xff] %v4766_v12  ;;  %v1331_v33 = vpop.xlane.xlu0 %1330  ;;  %v1701_v63 = vsel %vm1214_vm2, %v4766_v12, 0.0  ;;  %v1553_v38 = vmul.f32 1.442695, %v1448_v51  ;;  %v4776_v8 = vpop.eup %3892 }
 0x1cc   : > { %3902 = vpow2.f32 %v1551_v9  ;;  %v1445_v42 = vsub.f32 %v4464_v56, %v1331_v33  ;;  %1702 = vadd.xlane.f32.xlu0 %v1701_v63  ;;  %v1334_v57 = vpop.xlane.xlu1 %1333  ;;  %v1704_v12 = vsel %vm1214_vm2, %v4776_v8, 0.0 }
 0x1cd   : > { %v1446_v40 = vsub.f32 %v4471_v59, %v1334_v57  ;;  %3904 = vpow2.f32 %v1553_v38 }
 0x1ce   : > { %v4780_v23 = vpop.eup %3894  ;;  %v1547_v1 = vmul.f32 1.442695, %v1445_v42  ;;  %1687 = vadd.xlane.f32.xlu1 %v1686_v19 }
 0x1cf   : > { %v1355_v25 = vpop.xlane.xlu0 %1354  ;;  %v1725_v56 = vsel %vm1214_vm2, %v4780_v23, 0.0  ;;  %v1549_v9 = vmul.f32 1.442695, %v1446_v40  ;;  %v4786_v33 = vpop.eup %3896 }
 0x1d0   : > { %3906 = vpow2.f32 %v1547_v1  ;;  %v1453_v51 = vsub.f32 %v4474_v43, %v1355_v25  ;;  %1726 = vadd.xlane.f32.xlu0 %v1725_v56  ;;  %v1358_v63 = vpop.xlane.xlu1 %1357  ;;  %v1728_v56 = vsel %vm1214_vm2, %v4786_v33, 0.0 }
 0x1d1   : > { %v1454_v38 = vsub.f32 %v4481_v48, %v1358_v63  ;;  %3908 = vpow2.f32 %v1549_v9 }
 0x1d2   : > { %v4790_v42 = vpop.eup %3898  ;;  %v1563_v59 = vmul.f32 1.442695, %v1453_v51  ;;  %1705 = vadd.xlane.f32.xlu1 %v1704_v12 }
 0x1d3   : > { %v1325_v57 = vpop.xlane.xlu0 %1324  ;;  %v1695_v19 = vsel %vm1214_vm2, %v4790_v42, 0.0  ;;  %v1565_v43 = vmul.f32 1.442695, %v1454_v38  ;;  %v4796_v40 = vpop.eup %3900 }
 0x1d4   : > { %3910 = vpow2.f32 %v1563_v59  ;;  %v1443_v1 = vsub.f32 %v4488_v11, %v1325_v57  ;;  %1696 = vadd.xlane.f32.xlu0 %v1695_v19  ;;  %v1328_v25 = vpop.xlane.xlu1 %1327  ;;  %v1698_v19 = vsel %vm1214_vm2, %v4796_v40, 0.0 }
 0x1d5   : > { %v1444_v12 = vsub.f32 %v4491_v58, %v1328_v25  ;;  %3912 = vpow2.f32 %v1565_v43 }
 0x1d6   : > { %v4800_v51 = vpop.eup %3902  ;;  %v1543_v48 = vmul.f32 1.442695, %v1443_v1  ;;  %1729 = vadd.xlane.f32.xlu1 %v1728_v56 }
 0x1d7   : > { %v1349_v9 = vpop.xlane.xlu0 %1348  ;;  %v1719_v63 = vsel %vm1214_vm2, %v4800_v51, 0.0  ;;  %v1545_v11 = vmul.f32 1.442695, %v1444_v12  ;;  %v4806_v38 = vpop.eup %3904 }
 0x1d8   : > { %3914 = vpow2.f32 %v1543_v48  ;;  %v1451_v59 = vsub.f32 %v4496_v21, %v1349_v9  ;;  %1720 = vadd.xlane.f32.xlu0 %v1719_v63  ;;  %v1352_v57 = vpop.xlane.xlu1 %1351  ;;  %v1722_v63 = vsel %vm1214_vm2, %v4806_v38, 0.0 }
 0x1d9   : > { %v1452_v43 = vsub.f32 %v4501_v61, %v1352_v57  ;;  %3916 = vpow2.f32 %v1545_v11 }
 0x1da   : > { %v4810_v1 = vpop.eup %3906  ;;  %v1559_v58 = vmul.f32 1.442695, %v1451_v59  ;;  %1699 = vadd.xlane.f32.xlu1 %v1698_v19 }
 0x1db   : > { %5264 = vst [vmem:[#allocation3_spill] sm:$0xff] %v4810_v1  ;;  %v1367_v25 = vpop.xlane.xlu0 %1366  ;;  %v1713_v56 = vsel %vm1214_vm2, %v4810_v1, 0.0  ;;  %v1561_v21 = vmul.f32 1.442695, %v1452_v43  ;;  %v4816_v12 = vpop.eup %3908 }
 0x1dc   : > { %3918 = vpow2.f32 %v1559_v58  ;;  %v1457_v48 = vsub.f32 %v4504_v10, %v1367_v25  ;;  %1714 = vadd.xlane.f32.xlu0 %v1713_v56  ;;  %v1370_v9 = vpop.xlane.xlu1 %1369  ;;  %v1716_v56 = vsel %vm1214_vm2, %v4816_v12, 0.0 }
 0x1dd   : > { %v1458_v11 = vsub.f32 %v4511_v15, %v1370_v9  ;;  %3920 = vpow2.f32 %v1561_v21 }
 0x1de   : > { %v4820_v59 = vpop.eup %3910  ;;  %v1571_v61 = vmul.f32 1.442695, %v1457_v48  ;;  %1723 = vadd.xlane.f32.xlu1 %v1722_v63 }
 0x1df   : > { %5265 = vst [vmem:[#allocation4_spill] sm:$0xff] %v4820_v59  ;;  %v1391_v57 = vpop.xlane.xlu0 %1390  ;;  %v1737_v19 = vsel %vm1214_vm2, %v4820_v59, 0.0  ;;  %v1573_v10 = vmul.f32 1.442695, %v1458_v11  ;;  %v4826_v43 = vpop.eup %3912 }
 0x1e0   : > { %3922 = vpow2.f32 %v1571_v61  ;;  %v1465_v58 = vsub.f32 %v4514_v0, %v1391_v57  ;;  %1738 = vadd.xlane.f32.xlu0 %v1737_v19  ;;  %5266 = vst [vmem:[#allocation5_spill] sm:$0xff] %v4826_v43  ;;  %v1394_v25 = vpop.xlane.xlu1 %1393  ;;  %v1740_v19 = vsel %vm1214_vm2, %v4826_v43, 0.0 }
 0x1e1   : > { %v1466_v21 = vsub.f32 %v4521_v6, %v1394_v25  ;;  %3924 = vpow2.f32 %v1573_v10 }
 0x1e2   : > { %v4830_v48 = vpop.eup %3914  ;;  %v1587_v15 = vmul.f32 1.442695, %v1465_v58  ;;  %1717 = vadd.xlane.f32.xlu1 %v1716_v56 }
 0x1e3   : > { %5267 = vst [vmem:[#allocation6_spill] sm:$0xff] %v4830_v48  ;;  %v1361_v9 = vpop.xlane.xlu0 %1360  ;;  %v1707_v63 = vsel %vm1214_vm2, %v4830_v48, 0.0  ;;  %v1589_v0 = vmul.f32 1.442695, %v1466_v21  ;;  %v4836_v11 = vpop.eup %3916  ;;  %v3803_v48 = vld [vmem:[%s4196_s24 + $0x48] sm:$0xff]  }
 0x1e4   : > { %3926 = vpow2.f32 %v1587_v15  ;;  %v1455_v61 = vsub.f32 %v4528_v46, %v1361_v9  ;;  %1708 = vadd.xlane.f32.xlu0 %v1707_v63  ;;  %5268 = vst [vmem:[#allocation7_spill] sm:$0xff] %v4836_v11  ;;  %v1364_v57 = vpop.xlane.xlu1 %1363  ;;  %v1710_v63 = vsel %vm1214_vm2, %v4836_v11, 0.0 }
 0x1e5   : > { %v1456_v10 = vsub.f32 %v4531_v14, %v1364_v57  ;;  %3928 = vpow2.f32 %v1589_v0 }
 0x1e6   : > { %v4840_v58 = vpop.eup %3918  ;;  %v1567_v6 = vmul.f32 1.442695, %v1455_v61  ;;  %1741 = vadd.xlane.f32.xlu1 %v1740_v19 }
 0x1e7   : > { %5269 = vst [vmem:[#allocation8_spill] sm:$0xff] %v4840_v58  ;;  %v1385_v25 = vpop.xlane.xlu0 %1384  ;;  %v1731_v56 = vsel %vm1214_vm2, %v4840_v58, 0.0  ;;  %v1569_v46 = vmul.f32 1.442695, %v1456_v10  ;;  %v4846_v21 = vpop.eup %3920 }
 0x1e8   : > { %3930 = vpow2.f32 %v1567_v6  ;;  %v1463_v15 = vsub.f32 %v4536_v37, %v1385_v25  ;;  %1732 = vadd.xlane.f32.xlu0 %v1731_v56  ;;  %5270 = vst [vmem:[#allocation17_spill] sm:$0xff] %v4846_v21  ;;  %v1388_v9 = vpop.xlane.xlu1 %1387  ;;  %v5272_v6 = vld [vmem:[#allocation9_spill] sm:$0xff]  ;;  %v1734_v59 = vsel %vm1214_vm2, %v4846_v21, 0.0 }
 0x1e9   : > { %v1464_v0 = vsub.f32 %v4541_v20, %v1388_v9  ;;  %3932 = vpow2.f32 %v1569_v46  ;;  %v5275_v9 = vld [vmem:[#allocation10_spill] sm:$0xff] }
 0x1ea   : > { %v4850_v61 = vpop.eup %3922  ;;  %v1583_v14 = vmul.f32 1.442695, %v1463_v15  ;;  %1711 = vadd.xlane.f32.xlu1 %v1710_v63 }
 0x1eb   : > { %5271 = vst [vmem:[#allocation18_spill] sm:$0xff] %v4850_v61  ;;  %v1379_v57 = vpop.xlane.xlu0 %1378  ;;  %v1749_v19 = vsel %vm1214_vm2, %v4850_v61, 0.0  ;;  %v1585_v37 = vmul.f32 1.442695, %v1464_v0  ;;  %v4856_v25 = vpop.eup %3924 }
 0x1ec   : > { %3934 = vpow2.f32 %v1583_v14  ;;  %v1461_v10 = vsub.f32 %v5272_v6, %v1379_v57  ;;  %1750 = vadd.xlane.f32.xlu0 %v1749_v19  ;;  %5273 = vst [vmem:[#allocation9_spill] sm:$0xff] %v4856_v25  ;;  %v1382_v56 = vpop.xlane.xlu1 %1381  ;;  %v1752_v6 = vsel %vm1214_vm2, %v4856_v25, 0.0 }
 0x1ed   : > { %v1462_v46 = vsub.f32 %v5275_v9, %v1382_v56  ;;  %3936 = vpow2.f32 %v1585_v37  ;;  %v5278_v37 = vld [vmem:[#allocation13_spill] sm:$0xff]  ;;  %v5280_v9 = vld [vmem:[#allocation11_spill] sm:$0xff] }
 0x1ee   : > { %v4860_v15 = vpop.eup %3926  ;;  %v1579_v20 = vmul.f32 1.442695, %v1461_v10  ;;  %1735 = vadd.xlane.f32.xlu1 %v1734_v59 }
 0x1ef   : > { %5274 = vst [vmem:[#allocation19_spill] sm:$0xff] %v4860_v15  ;;  %v1403_v63 = vpop.xlane.xlu0 %1402  ;;  %v1773_v14 = vsel %vm1214_vm2, %v4860_v15, 0.0  ;;  %v1581_v0 = vmul.f32 1.442695, %v1462_v46  ;;  %v4865_v57 = vpop.eup %3928 }
 0x1f0   : > { %3938 = vpow2.f32 %v1579_v20  ;;  %1774 = vadd.xlane.f32.xlu0 %v1773_v14  ;;  %5276 = vst [vmem:[#allocation10_spill] sm:$0xff] %v4865_v57  ;;  %v1406_v19 = vpop.xlane.xlu1 %1405  ;;  %v1469_v46 = vsub.f32 %v5280_v9, %v1403_v63  ;;  %v1776_v15 = vsel %vm1214_vm2, %v4865_v57, 0.0 }
 0x1f1   : > { %3940 = vpow2.f32 %v1581_v0 }
 0x1f2   : > { %v4869_v61 = vpop.eup %3930  ;;  %1753 = vadd.xlane.f32.xlu1 %v1752_v6  ;;  %v5282_v6 = vld [vmem:[#allocation14_spill] sm:$0xff]  ;;  %v1595_v57 = vmul.f32 1.442695, %v1469_v46 }
 0x1f3   : > { %5277 = vst [vmem:[#allocation20_spill] sm:$0xff] %v4869_v61  ;;  %v1373_v10 = vpop.xlane.xlu0 %1372  ;;  %v1743_v59 = vsel %vm1214_vm2, %v4869_v61, 0.0  ;;  %v4874_v20 = vpop.eup %3932  ;;  %v5284_v61 = vld [vmem:[#allocation15_spill] sm:$0xff] }
 0x1f4   : > { %v1459_v56 = vsub.f32 %v5278_v37, %v1373_v10  ;;  %1744 = vadd.xlane.f32.xlu0 %v1743_v59  ;;  %5279 = vst [vmem:[#allocation13_spill] sm:$0xff] %v4874_v20  ;;  %v1376_v14 = vpop.xlane.xlu1 %1375  ;;  %v5283_v10 = vld [vmem:[#allocation12_spill] sm:$0xff] }
 0x1f5   : > { %v1460_v58 = vsub.f32 %v5282_v6, %v1376_v14  ;;  %v1470_v59 = vsub.f32 %v5283_v10, %v1406_v19  ;;  %v5287_v6 = vld [vmem:[#allocation16_spill] sm:$0xff] }
 0x1f6   : > { %v4879_v25 = vpop.eup %3934  ;;  %v1575_v21 = vmul.f32 1.442695, %v1459_v56  ;;  %1777 = vadd.xlane.f32.xlu1 %v1776_v15  ;;  %v1746_v56 = vsel %vm1214_vm2, %v4874_v20, 0.0 }
 0x1f7   : > { %5281 = vst [vmem:[#allocation11_spill] sm:$0xff] %v4879_v25  ;;  %v1397_v43 = vpop.xlane.xlu0 %1396  ;;  %v1767_v0 = vsel %vm1214_vm2, %v4879_v25, 0.0  ;;  %v1577_v37 = vmul.f32 1.442695, %v1460_v58  ;;  %v4886_v9 = vpop.eup %3936 }
 0x1f8   : > { %3942 = vpow2.f32 %v1575_v21  ;;  %v1467_v63 = vsub.f32 %v5284_v61, %v1397_v43  ;;  %1768 = vadd.xlane.f32.xlu0 %v1767_v0  ;;  %5285 = vst [vmem:[#allocation14_spill] sm:$0xff] %v4886_v9  ;;  %v1400_v1 = vpop.xlane.xlu1 %1399  ;;  %v1597_v21 = vmul.f32 1.442695, %v1470_v59  ;;  %v1770_v61 = vsel %vm1214_vm2, %v4886_v9, 0.0 }
 0x1f9   : > { %3944 = vpow2.f32 %v1577_v37  ;;  %v1468_v25 = vsub.f32 %v5287_v6, %v1400_v1 }
 0x1fa   : > { %v4890_v14 = vpop.eup %3938  ;;  %v1591_v15 = vmul.f32 1.442695, %v1467_v63  ;;  %1747 = vadd.xlane.f32.xlu1 %v1746_v56 }
 0x1fb   : > { %5286 = vst [vmem:[#allocation12_spill] sm:$0xff] %v4890_v14  ;;  %v1761_v58 = vsel %vm1214_vm2, %v4890_v14, 0.0  ;;  %v1593_v43 = vmul.f32 1.442695, %v1468_v25  ;;  %v4897_v19 = vpop.eup %3940 }
 0x1fc   : > { %3946 = vpow2.f32 %v1591_v15  ;;  %1762 = vadd.xlane.f32.xlu0 %v1761_v58  ;;  %5288 = vst [vmem:[#allocation15_spill] sm:$0xff] %v4897_v19  ;;  %v1764_v1 = vsel %vm1214_vm2, %v4897_v19, 0.0 }
 0x1fd   : > { %3948 = vpow2.f32 %v1595_v57 }
 0x1fe   : > { %3950 = vpow2.f32 %v1593_v43  ;;  %1771 = vadd.xlane.f32.xlu1 %v1770_v61 }
 0x1ff   : > { %3952 = vpow2.f32 %v1597_v21 }
 0x202   : > { %v4901_v46 = vpop.eup %3942  ;;  %1765 = vadd.xlane.f32.xlu1 %v1764_v1 }
 0x203   : > { %5289 = vst [vmem:[#allocation16_spill] sm:$0xff] %v4901_v46  ;;  %v1755_v0 = vsel %vm1214_vm2, %v4901_v46, 0.0  ;;  %v4905_v25 = vpop.eup %3944 }
 0x204   : > { %5290 = vst [vmem:[#allocation21_spill] sm:$0xff] %v4905_v25  ;;  %1756 = vadd.xlane.f32.xlu0 %v1755_v0  ;;  %v1758_v57 = vsel %vm1214_vm2, %v4905_v25, 0.0 }
 0x206   : > { %v4909_v10 = vpop.eup %3946  ;;  %1759 = vadd.xlane.f32.xlu1 %v1758_v57 }
 0x207   : > { %5291 = vst [vmem:[#allocation22_spill] sm:$0xff] %v4909_v10  ;;  %v4911_v59 = vpop.eup %3948  ;;  %v1779_v37 = vsel %vm1214_vm2, %v4909_v10, 0.0 }
 0x208   : > { %5292 = vst [vmem:[#allocation23_spill] sm:$0xff] %v4911_v59  ;;  %v4915_v63 = vpop.eup %3950  ;;  %1780 = vadd.xlane.f32.xlu0 %v1779_v37  ;;  %v1785_v6 = vsel %vm1214_vm2, %v4911_v59, 0.0 }
 0x209   : > { %5293 = vst [vmem:[#allocation24_spill] sm:$0xff] %v4915_v63  ;;  %v1782_v56 = vsel %vm1214_vm2, %v4915_v63, 0.0  ;;  %v4919_v15 = vpop.eup %3952 }
 0x20a   : > { %5294 = vst [vmem:[#allocation25_spill] sm:$0xff] %v4919_v15  ;;  %1783 = vadd.xlane.f32.xlu1 %v1782_v56  ;;  %v1788_v58 = vsel %vm1214_vm2, %v4919_v15, 0.0 }
 0x20c   : > { %1786 = vadd.xlane.f32.xlu0 %v1785_v6 }
 0x20e   : > { %1789 = vadd.xlane.f32.xlu1 %v1788_v58 }
 0x219   : > { %v1607_v21 = vpop.xlane.xlu0 %1606 }
 0x21d   : > { %v1631_v43 = vpop.xlane.xlu0 %1630 }
 0x21e   : > { %v1610_v61 = vpop.xlane.xlu1 %1609 }
 0x21f   : > { %3954 = vrcp.f32 %v1610_v61 }
 0x221   : > { %v1601_v1 = vpop.xlane.xlu0 %1600 }
 0x222   : > { %3956 = vrcp.f32 %v1601_v1 }
 0x223   : > { %v1634_v0 = vpop.xlane.xlu1 %1633  ;;  %3958 = vrcp.f32 %v1607_v21 }
 0x225   : > { %v1625_v57 = vpop.xlane.xlu0 %1624 }
 0x227   : > { %v1604_v37 = vpop.xlane.xlu1 %1603 }
 0x228   : > { %3960 = vrcp.f32 %v1604_v37 }
 0x229   : > { %3962 = vrcp.f32 %v1634_v0  ;;  %v1619_v56 = vpop.xlane.xlu0 %1618  ;;  %v3955_v15 = vpop.eup %3954 }
 0x22a   : > { %3964 = vrcp.f32 %v1625_v57  ;;  %v1858_v61 = vmul.f32 %v3955_v15, %v4607_v3 }
 0x22b   : > { %3966 = vrcp.f32 %v1631_v43  ;;  %v1628_v6 = vpop.xlane.xlu1 %1627 }
 0x22c   : > { %3968 = vrcp.f32 %v1628_v6  ;;  %v3957_v63 = vpop.eup %3956 }
 0x22d   : > { %v1643_v59 = vpop.xlane.xlu0 %1642  ;;  %v3959_v10 = vpop.eup %3958  ;;  %v1855_v37 = vmul.f32 %v3957_v63, %v4612_v49 }
 0x22e   : > { %v1857_v43 = vmul.f32 %v3959_v10, %v4596_v29  ;;  %v3806_v10 = vld [vmem:[%s4196_s24 + $0x68] sm:$0xff]  }
 0x22f   : > { %v1622_v58 = vpop.xlane.xlu1 %1621 }
 0x230   : > { %3970 = vrcp.f32 %v1622_v58  ;;  %v1920_v20 = vpack.c.bf16 %v1858_v61, %v1857_v43 }
 0x231   : > { %v1613_v14 = vpop.xlane.xlu0 %1612 }
 0x232   : > { %v3961_v25 = vpop.eup %3960  ;;  %3972 = vrcp.f32 %v1613_v14 }
 0x233   : > { %v3963_v1 = vpop.eup %3962  ;;  %v1646_v21 = vpop.xlane.xlu1 %1645  ;;  %v1856_v0 = vmul.f32 %v3961_v25, %v4624_v28  ;;  %3974 = vrcp.f32 %v1619_v56 }
 0x234   : > { %v3965_v57 = vpop.eup %3964  ;;  %v1866_v11 = vmul.f32 %v3963_v1, %v4619_v22 }
 0x235   : > { %v3967_v6 = vpop.eup %3966  ;;  %v1637_v19 = vpop.xlane.xlu0 %1636  ;;  %v1919_v46 = vpack.c.bf16 %v1856_v0, %v1855_v37  ;;  %v1863_v49 = vmul.f32 %v3965_v57, %v4615_v36 }
 0x236   : > { %v3969_v9 = vpop.eup %3968  ;;  %v1865_v28 = vmul.f32 %v3967_v6, %v4602_v34 }
 0x237   : > { %3626 = vmatprep.mubr.msk.bf16.mxu0 %vm1214_vm2, %v1919_v46  ;;  %v1616_v3 = vpop.xlane.xlu1 %1615  ;;  %v1864_v29 = vmul.f32 %v3969_v9, %v4632_v26  ;;  %v3805_v46 = vld [vmem:[%s4196_s24 + $0x50] sm:$0xff]   ;;  %v3807_v26 = vld [vmem:[%s4196_s24 + $0x58] sm:$0xff]  }
 0x238   : > { %3976 = vrcp.f32 %v1616_v3  ;;  %3627 = vmatmul.mubr.msk.bf16.vlgmr.msra.gmra.mrb[32].mxu0 %vm1214_vm2, %v1920_v20  ;;  %v1924_v14 = vpack.c.bf16 %v1866_v11, %v1865_v28 }
 0x239   : > { %3978 = vrcp.f32 %v1646_v21  ;;  %v1655_v25 = vpop.xlane.xlu0 %1654  ;;  %v1923_v22 = vpack.c.bf16 %v1864_v29, %v1863_v49  ;;  %3651 = vmatpush3.bf16.msra.mxu0 %v4756_v2  ;;  %v3808_v2 = vld [vmem:[%s4196_s24 + $0x70] sm:$0xff]  }
 0x23a   : > { %3980 = vrcp.f32 %v1637_v19  ;;  %3652 = vmatprep.subr.bf16.mxu0 %v3803_v48  ;;  %v3971_v11 = vpop.eup %3970 }
 0x23b   : > { %3982 = vrcp.f32 %v1643_v59  ;;  %3642 = vmatprep.mubr.msk.bf16.mxu1 %vm1214_vm2, %v1923_v22  ;;  %v1640_v36 = vpop.xlane.xlu1 %1639  ;;  %v1862_v15 = vmul.f32 %v3971_v11, %v4640_v39 }
 0x23c   : > { %3984 = vrcp.f32 %v1640_v36  ;;  %3643 = vmatmul.mubr.msk.bf16.vlgmr.msra.gmra.mrb[32].mxu1 %vm1214_vm2, %v1924_v14  ;;  %v3973_v9 = vpop.eup %3972 }
 0x23d   : > { %v1679_v34 = vpop.xlane.xlu0 %1678  ;;  %3653 = vmatpush3.bf16.msra.mxu0 %v3803_v48  ;;  %3667 = vmatpush3.bf16.msra.mxu1 %v4770_v31  ;;  %v3975_v19 = vpop.eup %3974  ;;  %v3809_v48 = vld [vmem:[%s4196_s24 + $0x78] sm:$0xff]   ;;  %v4947_v31 = vld [vmem:[%s4196_s24 + $0x80] sm:$0xff]   ;;  %v1859_v61 = vmul.f32 %v3973_v9, %v4654_v7 }
 0x23e   : > { %3654 = vmatprep.subr.bf16.mxu0 %v3805_v46  ;;  %3668 = vmatprep.subr.bf16.mxu1 %v3806_v10  ;;  %v1861_v37 = vmul.f32 %v3975_v19, %v4634_v27  ;;  %v4955_v7 = vld [vmem:[%s4196_s24 + $0xa0] sm:$0xff]  }
 0x23f   : > { %v1658_v20 = vpop.xlane.xlu1 %1657 }
 0x240   : > { %3986 = vrcp.f32 %v1658_v20  ;;  %v1922_v6 = vpack.c.bf16 %v1862_v15, %v1861_v37  ;;  %v3813_v37 = vld [vmem:[%s4196_s24 + $0x90] sm:$0xff]  }
 0x241   : > { %v1649_v59 = vpop.xlane.xlu0 %1648  ;;  %3655 = vmatpush3.bf16.msra.mxu0 %v3805_v46  ;;  %3669 = vmatpush3.bf16.msra.mxu1 %v3806_v10 }
 0x242   : > { %v3977_v63 = vpop.eup %3976  ;;  %3656 = vmatprep.subr.bf16.mxu0 %v3807_v26  ;;  %3670 = vmatprep.subr.bf16.mxu1 %v3808_v2  ;;  %3988 = vrcp.f32 %v1649_v59 }
 0x243   : > { %v3979_v56 = vpop.eup %3978  ;;  %v1682_v58 = vpop.xlane.xlu1 %1681  ;;  %v1860_v1 = vmul.f32 %v3977_v63, %v4660_v41  ;;  %3990 = vrcp.f32 %v1655_v25 }
 0x244   : > { %v3981_v21 = vpop.eup %3980  ;;  %v1870_v3 = vmul.f32 %v3979_v56, %v4650_v47 }
 0x245   : > { %v3983_v0 = vpop.eup %3982  ;;  %v1673_v57 = vpop.xlane.xlu0 %1672  ;;  %v1921_v43 = vpack.c.bf16 %v1860_v1, %v1859_v61  ;;  %3657 = vmatpush3.bf16.msra.mxu0 %v3807_v26  ;;  %3671 = vmatpush3.bf16.msra.mxu1 %v3808_v2  ;;  %v1867_v41 = vmul.f32 %v3981_v21, %v4664_v4  ;;  %v3811_v61 = vld [vmem:[%s4196_s24 + $0x88] sm:$0xff]  }
 0x246   : > { %v3985_v39 = vpop.eup %3984  ;;  %3672 = vmatprep.subr.bf16.mxu1 %v3809_v48  ;;  %3682 = vmatprep.subr.bf16.mxu0 %v4947_v31  ;;  %v1869_v29 = vmul.f32 %v3983_v0, %v4644_v18  ;;  %v3814_v0 = vld [vmem:[%s4196_s24 + $0xa8] sm:$0xff]  }
 0x247   : > { %3630 = vmatprep.mubr.msk.bf16.mxu0 %vm1214_vm2, %v1921_v43  ;;  %v1652_v27 = vpop.xlane.xlu1 %1651  ;;  %v1868_v49 = vmul.f32 %v3985_v39, %v4671_v32 }
 0x248   : > { %3992 = vrcp.f32 %v1652_v27  ;;  %3631 = vmatmul.mubr.msk.bf16.gmra.mrb[36].mxu0 %vm1214_vm2, %v1922_v6  ;;  %v1926_v22 = vpack.c.bf16 %v1870_v3, %v1869_v29 }
 0x249   : > { %3994 = vrcp.f32 %v1682_v58  ;;  %v1667_v47 = vpop.xlane.xlu0 %1666  ;;  %v1925_v28 = vpack.c.bf16 %v1868_v49, %v1867_v41  ;;  %3673 = vmatpush3.bf16.msra.mxu1 %v3809_v48  ;;  %v3817_v49 = vld [vmem:[%s4196_s24 + $0xb8] sm:$0xff]  }
 0x24a   : > { %3996 = vrcp.f32 %v1673_v57  ;;  %3698 = vmatprep.subr.bf16.mxu1 %v4955_v7  ;;  %v3987_v32 = vpop.eup %3986 }
 0x24b   : > { %3998 = vrcp.f32 %v1679_v34  ;;  %3646 = vmatprep.mubr.msk.bf16.mxu1 %vm1214_vm2, %v1925_v28  ;;  %v1676_v25 = vpop.xlane.xlu1 %1675  ;;  %v1874_v26 = vmul.f32 %v3987_v32, %v4683_v13 }
 0x24c   : > { %4000 = vrcp.f32 %v1676_v25  ;;  %3647 = vmatmul.mubr.msk.bf16.gmra.mrb[36].mxu1 %vm1214_vm2, %v1926_v22  ;;  %v3989_v46 = vpop.eup %3988 }
 0x24d   : > { %v1691_v4 = vpop.xlane.xlu0 %1690  ;;  %v3991_v18 = vpop.eup %3990  ;;  %v1871_v34 = vmul.f32 %v3989_v46, %v4699_v16 }
 0x24e   : > { %v1873_v19 = vmul.f32 %v3991_v18, %v4675_v45 }
 0x24f   : > { %v1670_v14 = vpop.xlane.xlu1 %1669 }
 0x250   : > { %4002 = vrcp.f32 %v1670_v14  ;;  %v1928_v56 = vpack.c.bf16 %v1874_v26, %v1873_v19 }
 0x251   : > { %v1661_v10 = vpop.xlane.xlu0 %1660 }
 0x252   : > { %v3993_v36 = vpop.eup %3992  ;;  %4004 = vrcp.f32 %v1661_v10 }
 0x253   : > { %v3995_v2 = vpop.eup %3994  ;;  %v1694_v11 = vpop.xlane.xlu1 %1693  ;;  %v1872_v20 = vmul.f32 %v3993_v36, %v4707_v44  ;;  %4006 = vrcp.f32 %v1667_v47 }
 0x254   : > { %v3997_v9 = vpop.eup %3996  ;;  %v1882_v58 = vmul.f32 %v3995_v2, %v4695_v50 }
 0x255   : > { %v3999_v59 = vpop.eup %3998  ;;  %v1685_v63 = vpop.xlane.xlu0 %1684  ;;  %v1927_v15 = vpack.c.bf16 %v1872_v20, %v1871_v34  ;;  %v1879_v16 = vmul.f32 %v3997_v9, %v4711_v52 }
 0x256   : > { %v4001_v48 = vpop.eup %4000  ;;  %v1881_v44 = vmul.f32 %v3999_v59, %v4687_v17 }
 0x257   : > { %3658 = vmatprep.mubr.msk.bf16.mxu0 %vm1214_vm2, %v1927_v15  ;;  %v1664_v13 = vpop.xlane.xlu1 %1663  ;;  %v1880_v45 = vmul.f32 %v4001_v48, %v4718_v30  ;;  %v3815_v30 = vld [vmem:[%s4196_s24 + $0x98] sm:$0xff]  }
 0x258   : > { %4008 = vrcp.f32 %v1664_v13  ;;  %3659 = vmatmul.mubr.msk.bf16.vlgmr.msra.gmra.mrb[40].mxu0 %vm1214_vm2, %v1928_v56  ;;  %v1932_v21 = vpack.c.bf16 %v1882_v58, %v1881_v44  ;;  %v5295_v13 = vld [vmem:[#allocation2_spill] sm:$0xff] }
 0x259   : > { %4010 = vrcp.f32 %v1694_v11  ;;  %v1703_v1 = vpop.xlane.xlu0 %1702  ;;  %v1931_v50 = vpack.c.bf16 %v1880_v45, %v1879_v16  ;;  %3683 = vmatpush3.bf16.msra.mxu0 %v4947_v31  ;;  %v3816_v31 = vld [vmem:[%s4196_s24 + $0xb0] sm:$0xff]  }
 0x25a   : > { %4012 = vrcp.f32 %v1685_v63  ;;  %3684 = vmatprep.subr.bf16.mxu0 %v3811_v61  ;;  %v4003_v57 = vpop.eup %4002 }
 0x25b   : > { %4014 = vrcp.f32 %v1691_v4  ;;  %3674 = vmatprep.mubr.msk.bf16.mxu1 %vm1214_vm2, %v1931_v50  ;;  %v1688_v52 = vpop.xlane.xlu1 %1687  ;;  %v1878_v41 = vmul.f32 %v4003_v57, %v4728_v53  ;;  %v3822_v57 = vld [vmem:[%s4196_s24 + $0xe8] sm:$0xff]  }
 0x25c   : > { %4016 = vrcp.f32 %v1688_v52  ;;  %3675 = vmatmul.mubr.msk.bf16.vlgmr.msra.gmra.mrb[40].mxu1 %vm1214_vm2, %v1932_v21  ;;  %v4005_v39 = vpop.eup %4004 }
 0x25d   : > { %v1727_v17 = vpop.xlane.xlu0 %1726  ;;  %3685 = vmatpush3.bf16.msra.mxu0 %v3811_v61  ;;  %3699 = vmatpush3.bf16.msra.mxu1 %v4955_v7  ;;  %v4007_v6 = vpop.eup %4006  ;;  %v4987_v7 = vld [vmem:[%s4196_s24 + $0xc0] sm:$0xff]   ;;  %v1875_v28 = vmul.f32 %v4005_v39, %v4742_v35 }
 0x25e   : > { %3686 = vmatprep.subr.bf16.mxu0 %v3813_v37  ;;  %3700 = vmatprep.subr.bf16.mxu1 %v3814_v0  ;;  %v1877_v4 = vmul.f32 %v4007_v6, %v4722_v62  ;;  %v4995_v35 = vld [vmem:[%s4196_s24 + $0xe0] sm:$0xff]  }
 0x25f   : > { %v1706_v43 = vpop.xlane.xlu1 %1705 }
 0x260   : > { %4018 = vrcp.f32 %v1706_v43  ;;  %v1930_v18 = vpack.c.bf16 %v1878_v41, %v1877_v4  ;;  %v3824_v43 = vld [vmem:[%s4196_s24 + $0xf0] sm:$0xff]   ;;  %v5297_v4 = vld [vmem:[#allocation7_spill] sm:$0xff] }
 0x261   : > { %v1697_v3 = vpop.xlane.xlu0 %1696  ;;  %3687 = vmatpush3.bf16.msra.mxu0 %v3813_v37  ;;  %3701 = vmatpush3.bf16.msra.mxu1 %v3814_v0  ;;  %v3819_v0 = vld [vmem:[%s4196_s24 + $0xc8] sm:$0xff]  }
 0x262   : > { %v4009_v27 = vpop.eup %4008  ;;  %3688 = vmatprep.subr.bf16.mxu0 %v3815_v30  ;;  %3702 = vmatprep.subr.bf16.mxu1 %v3816_v31  ;;  %4020 = vrcp.f32 %v1697_v3 }
 0x263   : > { %v4011_v29 = vpop.eup %4010  ;;  %v1730_v47 = vpop.xlane.xlu1 %1729  ;;  %v1876_v22 = vmul.f32 %v4009_v27, %v4748_v55  ;;  %4022 = vrcp.f32 %v1703_v1 }
 0x264   : > { %v4013_v25 = vpop.eup %4012  ;;  %v1886_v10 = vmul.f32 %v4011_v29, %v4738_v5  ;;  %v3825_v29 = vld [vmem:[%s4196_s24 + $0xf8] sm:$0xff]  }
 0x265   : > { %v4015_v32 = vpop.eup %4014  ;;  %v1721_v14 = vpop.xlane.xlu0 %1720  ;;  %v1929_v46 = vpack.c.bf16 %v1876_v22, %v1875_v28  ;;  %3689 = vmatpush3.bf16.msra.mxu0 %v3815_v30  ;;  %3703 = vmatpush3.bf16.msra.mxu1 %v3816_v31  ;;  %v1883_v55 = vmul.f32 %v4013_v25, %v4752_v24  ;;  %v3821_v31 = vld [vmem:[%s4196_s24 + $0xd0] sm:$0xff]   ;;  %v5296_v22 = vld [vmem:[#allocation6_spill] sm:$0xff] }
 0x266   : > { %v4017_v53 = vpop.eup %4016  ;;  %3704 = vmatprep.subr.bf16.mxu1 %v3817_v49  ;;  %3714 = vmatprep.subr.bf16.mxu0 %v4987_v7  ;;  %v1885_v26 = vmul.f32 %v4015_v32, %v4732_v54 }
 0x267   : > { %3662 = vmatprep.mubr.msk.bf16.mxu0 %vm1214_vm2, %v1929_v46  ;;  %v1700_v62 = vpop.xlane.xlu1 %1699  ;;  %v1884_v36 = vmul.f32 %v4017_v53, %v4762_v60  ;;  %v5298_v46 = vld [vmem:[#allocation3_spill] sm:$0xff] }
 0x268   : > { %4024 = vrcp.f32 %v1700_v62  ;;  %3663 = vmatmul.mubr.msk.bf16.gmra.mrb[44].mxu0 %vm1214_vm2, %v1930_v18  ;;  %v1934_v11 = vpack.c.bf16 %v1886_v10, %v1885_v26  ;;  %v5299_v62 = vld [vmem:[#allocation5_spill] sm:$0xff] }
 0x269   : > { %4026 = vrcp.f32 %v1730_v47  ;;  %v1715_v5 = vpop.xlane.xlu0 %1714  ;;  %v1933_v2 = vpack.c.bf16 %v1884_v36, %v1883_v55  ;;  %3705 = vmatpush3.bf16.msra.mxu1 %v3817_v49 }
 0x26a   : > { %4028 = vrcp.f32 %v1721_v14  ;;  %3730 = vmatprep.subr.bf16.mxu1 %v4995_v35  ;;  %v4019_v60 = vpop.eup %4018 }
 0x26b   : > { %4030 = vrcp.f32 %v1727_v17  ;;  %3678 = vmatprep.mubr.msk.bf16.mxu1 %vm1214_vm2, %v1933_v2  ;;  %v1724_v34 = vpop.xlane.xlu1 %1723  ;;  %v1890_v63 = vmul.f32 %v4019_v60, %v4776_v8 }
 0x26c   : > { %4032 = vrcp.f32 %v1724_v34  ;;  %3679 = vmatmul.mubr.msk.bf16.gmra.mrb[44].mxu1 %vm1214_vm2, %v1934_v11  ;;  %v4021_v9 = vpop.eup %4020  ;;  %v5301_v11 = vld [vmem:[#allocation17_spill] sm:$0xff] }
 0x26d   : > { %v1739_v24 = vpop.xlane.xlu0 %1738  ;;  %v4023_v54 = vpop.eup %4022  ;;  %v1887_v56 = vmul.f32 %v4021_v9, %v4790_v42 }
 0x26e   : > { %v1889_v16 = vmul.f32 %v4023_v54, %v5295_v13 }
 0x26f   : > { %v1718_v20 = vpop.xlane.xlu1 %1717 }
 0x270   : > { %4034 = vrcp.f32 %v1718_v20  ;;  %v1936_v21 = vpack.c.bf16 %v1890_v63, %v1889_v16 }
 0x271   : > { %v1709_v19 = vpop.xlane.xlu0 %1708 }
 0x272   : > { %v4025_v59 = vpop.eup %4024  ;;  %4036 = vrcp.f32 %v1709_v19 }
 0x273   : > { %v4027_v15 = vpop.eup %4026  ;;  %v1742_v48 = vpop.xlane.xlu1 %1741  ;;  %v1888_v58 = vmul.f32 %v4025_v59, %v4796_v40  ;;  %4038 = vrcp.f32 %v1715_v5  ;;  %v5300_v5 = vld [vmem:[#allocation8_spill] sm:$0xff] }
 0x274   : > { %v4029_v61 = vpop.eup %4028  ;;  %v1898_v37 = vmul.f32 %v4027_v15, %v4786_v33 }
 0x275   : > { %v4031_v45 = vpop.eup %4030  ;;  %v1733_v44 = vpop.xlane.xlu0 %1732  ;;  %v1935_v1 = vpack.c.bf16 %v1888_v58, %v1887_v56  ;;  %v1895_v42 = vmul.f32 %v4029_v61, %v4800_v51  ;;  %v5303_v61 = vld [vmem:[#allocation9_spill] sm:$0xff] }
 0x276   : > { %v4033_v50 = vpop.eup %4032  ;;  %v1897_v52 = vmul.f32 %v4031_v45, %v4780_v23 }
 0x277   : > { %3690 = vmatprep.mubr.msk.bf16.mxu0 %vm1214_vm2, %v1935_v1  ;;  %v1712_v8 = vpop.xlane.xlu1 %1711  ;;  %v1896_v40 = vmul.f32 %v4033_v50, %v4806_v38  ;;  %v3823_v38 = vld [vmem:[%s4196_s24 + $0xd8] sm:$0xff]  }
 0x278   : > { %4040 = vrcp.f32 %v1712_v8  ;;  %3691 = vmatmul.mubr.msk.bf16.vlgmr.msra.gmra.mrb[48].mxu0 %vm1214_vm2, %v1936_v21  ;;  %v1940_v30 = vpack.c.bf16 %v1898_v37, %v1897_v52  ;;  %v5305_v50 = vld [vmem:[#allocation13_spill] sm:$0xff] }
 0x279   : > { %4042 = vrcp.f32 %v1742_v48  ;;  %v1751_v17 = vpop.xlane.xlu0 %1750  ;;  %v1939_v33 = vpack.c.bf16 %v1896_v40, %v1895_v42  ;;  %3715 = vmatpush3.bf16.msra.mxu0 %v4987_v7 }
 0x27a   : > { %4044 = vrcp.f32 %v1733_v44  ;;  %3716 = vmatprep.subr.bf16.mxu0 %v3819_v0  ;;  %v4035_v39 = vpop.eup %4034  ;;  %v5304_v44 = vld [vmem:[#allocation20_spill] sm:$0xff] }
 0x27b   : > { %4046 = vrcp.f32 %v1739_v24  ;;  %3706 = vmatprep.mubr.msk.bf16.mxu1 %vm1214_vm2, %v1939_v33  ;;  %v1736_v51 = vpop.xlane.xlu1 %1735  ;;  %v1894_v7 = vmul.f32 %v4035_v39, %v4816_v12  ;;  %v5302_v24 = vld [vmem:[#allocation4_spill] sm:$0xff]  ;;  %v5310_v39 = vld [vmem:[#allocation19_spill] sm:$0xff] }
 0x27c   : > { %4048 = vrcp.f32 %v1736_v51  ;;  %3707 = vmatmul.mubr.msk.bf16.vlgmr.msra.gmra.mrb[48].mxu1 %vm1214_vm2, %v1940_v30  ;;  %v4037_v3 = vpop.eup %4036  ;;  %v5307_v30 = vld [vmem:[#allocation10_spill] sm:$0xff]  ;;  %v5308_v51 = vld [vmem:[#allocation11_spill] sm:$0xff] }
 0x27d   : > { %v1775_v23 = vpop.xlane.xlu0 %1774  ;;  %3717 = vmatpush3.bf16.msra.mxu0 %v3819_v0  ;;  %3731 = vmatpush3.bf16.msra.mxu1 %v4995_v35  ;;  %v4039_v27 = vpop.eup %4038  ;;  %v1891_v25 = vmul.f32 %v4037_v3, %v5296_v22  ;;  %v5306_v0 = vld [vmem:[#allocation18_spill] sm:$0xff] }
 0x27e   : > { %3718 = vmatprep.subr.bf16.mxu0 %v3821_v31  ;;  %3732 = vmatprep.subr.bf16.mxu1 %v3822_v57  ;;  %v1893_v53 = vmul.f32 %v4039_v27, %v5298_v46 }
 0x27f   : > { %v1754_v6 = vpop.xlane.xlu1 %1753 }
 0x280   : > { %4050 = vrcp.f32 %v1754_v6  ;;  %v1938_v12 = vpack.c.bf16 %v1894_v7, %v1893_v53 }
 0x281   : > { %v1745_v41 = vpop.xlane.xlu0 %1744  ;;  %3719 = vmatpush3.bf16.msra.mxu0 %v3821_v31  ;;  %3733 = vmatpush3.bf16.msra.mxu1 %v3822_v57 }
 0x282   : > { %v4041_v49 = vpop.eup %4040  ;;  %3720 = vmatprep.subr.bf16.mxu0 %v3823_v38  ;;  %3734 = vmatprep.subr.bf16.mxu1 %v3824_v43  ;;  %4052 = vrcp.f32 %v1745_v41 }
 0x283   : > { %v4043_v47 = vpop.eup %4042  ;;  %v1778_v28 = vpop.xlane.xlu1 %1777  ;;  %v1892_v32 = vmul.f32 %v4041_v49, %v5297_v4  ;;  %4054 = vrcp.f32 %v1751_v17  ;;  %v5312_v4 = vld [vmem:[#allocation15_spill] sm:$0xff] }
 0x284   : > { %v4045_v14 = vpop.eup %4044  ;;  %v1902_v55 = vmul.f32 %v4043_v47, %v5299_v62 }
 0x285   : > { %v4047_v18 = vpop.eup %4046  ;;  %v1937_v10 = vpack.c.bf16 %v1892_v32, %v1891_v25  ;;  %3721 = vmatpush3.bf16.msra.mxu0 %v3823_v38  ;;  %3735 = vmatpush3.bf16.msra.mxu1 %v3824_v43  ;;  %v1769_v36 = vpop.xlane.xlu0 %1768  ;;  %v1899_v2 = vmul.f32 %v4045_v14, %v5300_v5  ;;  %v5309_v38 = vld [vmem:[#allocation14_spill] sm:$0xff]  ;;  %v5313_v14 = vld [vmem:[#allocation21_spill] sm:$0xff] }
 0x286   : > { %v4049_v35 = vpop.eup %4048  ;;  %3736 = vmatprep.subr.bf16.mxu1 %v3825_v29  ;;  %v1901_v60 = vmul.f32 %v4047_v18, %v5302_v24  ;;  %v5314_v18 = vld [vmem:[#allocation12_spill] sm:$0xff] }
 0x287   : > { %3694 = vmatprep.mubr.msk.bf16.mxu0 %vm1214_vm2, %v1937_v10  ;;  %v1748_v26 = vpop.xlane.xlu1 %1747  ;;  %v1900_v34 = vmul.f32 %v4049_v35, %v5301_v11 }
 0x288   : > { %4056 = vrcp.f32 %v1748_v26  ;;  %3695 = vmatmul.mubr.msk.bf16.gmra.mrb[52].mxu0 %vm1214_vm2, %v1938_v12  ;;  %v1942_v9 = vpack.c.bf16 %v1902_v55, %v1901_v60  ;;  %v5315_v12 = vld [vmem:[#allocation22_spill] sm:$0xff]  ;;  %v5316_v26 = vld [vmem:[#allocation24_spill] sm:$0xff] }
 0x289   : > { %4058 = vrcp.f32 %v1778_v28  ;;  %v1941_v20 = vpack.c.bf16 %v1900_v34, %v1899_v2  ;;  %3737 = vmatpush3.bf16.msra.mxu1 %v3825_v29  ;;  %v1763_v19 = vpop.xlane.xlu0 %1762  ;;  %v5311_v28 = vld [vmem:[#allocation16_spill] sm:$0xff]  ;;  %v5317_v34 = vld [vmem:[#allocation23_spill] sm:$0xff] }
 0x28a   : > { %4060 = vrcp.f32 %v1769_v36  ;;  %v4051_v59 = vpop.eup %4050 }
 0x28b   : > { %4062 = vrcp.f32 %v1775_v23  ;;  %3710 = vmatprep.mubr.msk.bf16.mxu1 %vm1214_vm2, %v1941_v20  ;;  %v1772_v54 = vpop.xlane.xlu1 %1771  ;;  %v1906_v13 = vmul.f32 %v4051_v59, %v5303_v61  ;;  %v5318_v20 = vld [vmem:[#allocation25_spill] sm:$0xff] }
 0x28c   : > { %4064 = vrcp.f32 %v1772_v54  ;;  %3711 = vmatmul.mubr.msk.bf16.gmra.mrb[52].mxu1 %vm1214_vm2, %v1942_v9  ;;  %v4053_v15 = vpop.eup %4052 }
 0x28d   : > { %v4055_v48 = vpop.eup %4054  ;;  %v1903_v1 = vmul.f32 %v4053_v15, %v5304_v44 }
 0x28e   : > { %v1905_v8 = vmul.f32 %v4055_v48, %v5306_v0 }
 0x28f   : > { %v1766_v63 = vpop.xlane.xlu1 %1765 }
 0x290   : > { %4066 = vrcp.f32 %v1766_v63  ;;  %v1944_v33 = vpack.c.bf16 %v1906_v13, %v1905_v8 }
 0x291   : > { %v1757_v56 = vpop.xlane.xlu0 %1756 }
 0x292   : > { %v4057_v58 = vpop.eup %4056  ;;  %4068 = vrcp.f32 %v1757_v56 }
 0x293   : > { %v4059_v16 = vpop.eup %4058  ;;  %4070 = vrcp.f32 %v1763_v19  ;;  %v1760_v45 = vpop.xlane.xlu1 %1759  ;;  %v1904_v21 = vmul.f32 %v4057_v58, %v5305_v50 }
 0x294   : > { %v4061_v37 = vpop.eup %4060  ;;  %4072 = vrcp.f32 %v1760_v45  ;;  %v1914_v31 = vmul.f32 %v4059_v16, %v5307_v30 }
 0x295   : > { %v4063_v42 = vpop.eup %4062  ;;  %v1781_v40 = vpop.xlane.xlu0 %1780  ;;  %v1943_v52 = vpack.c.bf16 %v1904_v21, %v1903_v1  ;;  %v1911_v23 = vmul.f32 %v4061_v37, %v5308_v51 }
 0x296   : > { %v4065_v17 = vpop.eup %4064  ;;  %4074 = vrcp.f32 %v1781_v40  ;;  %v1913_v6 = vmul.f32 %v4063_v42, %v5310_v39 }
 0x297   : > { %3722 = vmatprep.mubr.msk.bf16.mxu0 %vm1214_vm2, %v1943_v52  ;;  %v1784_v57 = vpop.xlane.xlu1 %1783  ;;  %v1912_v43 = vmul.f32 %v4065_v17, %v5309_v38 }
 0x298   : > { %4076 = vrcp.f32 %v1784_v57  ;;  %3723 = vmatmul.mubr.msk.bf16.vlgmr.msra.gmra.mrb[56].mxu0 %vm1214_vm2, %v1944_v33  ;;  %v1948_v41 = vpack.c.bf16 %v1914_v31, %v1913_v6 }
 0x299   : > { %v1787_v3 = vpop.xlane.xlu0 %1786  ;;  %v1947_v27 = vpack.c.bf16 %v1912_v43, %v1911_v23 }
 0x29a   : > { %4078 = vrcp.f32 %v1787_v3  ;;  %v4067_v49 = vpop.eup %4066 }
 0x29b   : > { %3738 = vmatprep.mubr.msk.bf16.mxu1 %vm1214_vm2, %v1947_v27  ;;  %v1790_v7 = vpop.xlane.xlu1 %1789  ;;  %v1910_v32 = vmul.f32 %v4067_v49, %v5312_v4 }
 0x29c   : > { %v4069_v29 = vpop.eup %4068  ;;  %4080 = vrcp.f32 %v1790_v7  ;;  %3739 = vmatmul.mubr.msk.bf16.vlgmr.msra.gmra.mrb[56].mxu1 %vm1214_vm2, %v1948_v41 }
 0x29d   : > { %v4071_v47 = vpop.eup %4070  ;;  %v1907_v22 = vmul.f32 %v4069_v29, %v5311_v28 }
 0x29e   : > { %v4073_v25 = vpop.eup %4072  ;;  %v1909_v10 = vmul.f32 %v4071_v47, %v5314_v18 }
 0x29f   : > { %v1908_v46 = vmul.f32 %v4073_v25, %v5313_v14 }
 0x2a0   : > { %v4075_v53 = vpop.eup %4074  ;;  %v1946_v36 = vpack.c.bf16 %v1910_v32, %v1909_v10 }
 0x2a1   : > { %v1945_v35 = vpack.c.bf16 %v1908_v46, %v1907_v22  ;;  %v1915_v62 = vmul.f32 %v4075_v53, %v5315_v12 }
 0x2a2   : > { %v4077_v55 = vpop.eup %4076 }
 0x2a3   : > { %3726 = vmatprep.mubr.msk.bf16.mxu0 %vm1214_vm2, %v1945_v35  ;;  %v1916_v5 = vmul.f32 %v4077_v55, %v5316_v26 }
 0x2a4   : > { %v4079_v2 = vpop.eup %4078  ;;  %3727 = vmatmul.mubr.msk.bf16.gmra.mrb[60].mxu0 %vm1214_vm2, %v1946_v36 }
 0x2a5   : > { %v1949_v11 = vpack.c.bf16 %v1916_v5, %v1915_v62  ;;  %v1917_v24 = vmul.f32 %v4079_v2, %v5317_v34 }
 0x2a6   : > { %v4081_v60 = vpop.eup %4080 }
 0x2a7   : > { %3742 = vmatprep.mubr.msk.bf16.mxu1 %vm1214_vm2, %v1949_v11  ;;  %v1918_v9 = vmul.f32 %v4081_v60, %v5318_v20 }
 0x2a9   : > { %v1950_v54 = vpack.c.bf16 %v1918_v9, %v1917_v24 }
 0x2ab   : > { %3743 = vmatmul.mubr.msk.bf16.gmra.mrb[60].mxu1 %vm1214_vm2, %v1950_v54 }
 0x30b   : > { %v3628_v19 = vpop.f32.mrb[32].mxu0 }
 0x30c   : > { %v3372_v59 = vpack.c.bf16 %v3628_v19, %v3628_v19  ;;  %v2021_v63 = vpop.f32.mrb[33].mxu0 }
 0x30d   : > { %v3370_v15 = vpack.c.bf16 %v2021_v63, %v2021_v63  ;;  %v3629_v48 = vpop.f32.mrb[34].mxu0 }
 0x30e   : > { %3018 = vst.msk [vmem:[%s5065_s27 + $0x8] sm:$0xf] %vm3015_vm3, %v3372_v59  ;;  %v3373_v56 = vpack.c.bf16 %v3629_v48, %v3629_v48  ;;  %v2024_v58 = vpop.f32.mrb[35].mxu0 }
 0x30f   : > { %3016 = vst.msk [vmem:[%s5065_s27] sm:$0xf] %vm3015_vm3, %v3370_v15  ;;  %v3371_v61 = vpack.c.bf16 %v2024_v58, %v2024_v58  ;;  %v3644_v13 = vpop.f32.mrb[32].mxu1 }
 0x310   : > { %3019 = vst.msk [vmem:[%s5065_s27 + $0xc] sm:$0xf] %vm3015_vm3, %v3373_v56  ;;  %v3380_v16 = vpack.c.bf16 %v3644_v13, %v3644_v13  ;;  %v2122_v45 = vpop.f32.mrb[33].mxu1 }
 0x311   : > { %3017 = vst.msk [vmem:[%s5065_s27 + $0x4] sm:$0xf] %vm3015_vm3, %v3371_v61  ;;  %v3378_v44 = vpack.c.bf16 %v2122_v45, %v2122_v45  ;;  %v3645_v1 = vpop.f32.mrb[34].mxu1 }
 0x312   : > { %3026 = vst.msk [vmem:[%s5065_s27 + $0x28] sm:$0xf] %vm3015_vm3, %v3380_v16  ;;  %v3381_v50 = vpack.c.bf16 %v3645_v1, %v3645_v1  ;;  %v2125_v21 = vpop.f32.mrb[35].mxu1 }
 0x313   : > { %3024 = vst.msk [vmem:[%s5065_s27 + $0x20] sm:$0xf] %vm3015_vm3, %v3378_v44  ;;  %v3379_v37 = vpack.c.bf16 %v2125_v21, %v2125_v21 }
 0x314   : > { %3027 = vst.msk [vmem:[%s5065_s27 + $0x2c] sm:$0xf] %vm3015_vm3, %v3381_v50 }
 0x315   : > { %3025 = vst.msk [vmem:[%s5065_s27 + $0x24] sm:$0xf] %vm3015_vm3, %v3379_v37 }
 0x31b   : > { %v3632_v0 = vpop.f32.mrb[36].mxu0 }
 0x31c   : > { %v3376_v8 = vpack.c.bf16 %v3632_v0, %v3632_v0  ;;  %v2037_v42 = vpop.f32.mrb[37].mxu0 }
 0x31d   : > { %v3374_v40 = vpack.c.bf16 %v2037_v42, %v2037_v42  ;;  %v3633_v52 = vpop.f32.mrb[38].mxu0 }
 0x31e   : > { %3022 = vst.msk [vmem:[%s5065_s27 + $0x18] sm:$0xf] %vm3015_vm3, %v3376_v8  ;;  %v3377_v17 = vpack.c.bf16 %v3633_v52, %v3633_v52  ;;  %v2040_v33 = vpop.f32.mrb[39].mxu0 }
 0x31f   : > { %3020 = vst.msk [vmem:[%s5065_s27 + $0x10] sm:$0xf] %vm3015_vm3, %v3374_v40  ;;  %v3375_v30 = vpack.c.bf16 %v2040_v33, %v2040_v33  ;;  %v3648_v31 = vpop.f32.mrb[36].mxu1 }
 0x320   : > { %3023 = vst.msk [vmem:[%s5065_s27 + $0x1c] sm:$0xf] %vm3015_vm3, %v3377_v17  ;;  %v3384_v57 = vpack.c.bf16 %v3648_v31, %v3648_v31  ;;  %v2138_v51 = vpop.f32.mrb[37].mxu1 }
 0x321   : > { %3021 = vst.msk [vmem:[%s5065_s27 + $0x14] sm:$0xf] %vm3015_vm3, %v3375_v30  ;;  %v3382_v23 = vpack.c.bf16 %v2138_v51, %v2138_v51  ;;  %v3649_v38 = vpop.f32.mrb[38].mxu1 }
 0x322   : > { %3030 = vst.msk [vmem:[%s5065_s27 + $0x38] sm:$0xf] %vm3015_vm3, %v3384_v57  ;;  %v3385_v43 = vpack.c.bf16 %v3649_v38, %v3649_v38  ;;  %v2141_v39 = vpop.f32.mrb[39].mxu1 }
 0x323   : > { %3028 = vst.msk [vmem:[%s5065_s27 + $0x30] sm:$0xf] %vm3015_vm3, %v3382_v23  ;;  %v3383_v6 = vpack.c.bf16 %v2141_v39, %v2141_v39 }
 0x324   : > { %3031 = vst.msk [vmem:[%s5065_s27 + $0x3c] sm:$0xf] %vm3015_vm3, %v3385_v43 }
 0x325   : > { %3029 = vst.msk [vmem:[%s5065_s27 + $0x34] sm:$0xf] %vm3015_vm3, %v3383_v6 }
 0x32b   : > { %v3660_v3 = vpop.f32.mrb[40].mxu0 }
 0x32c   : > { %v3388_v27 = vpack.c.bf16 %v3660_v3, %v3660_v3  ;;  %v2223_v41 = vpop.f32.mrb[41].mxu0 }
 0x32d   : > { %v3386_v49 = vpack.c.bf16 %v2223_v41, %v2223_v41  ;;  %v3661_v7 = vpop.f32.mrb[42].mxu0 }
 0x32e   : > { %3034 = vst.msk [vmem:[%s5065_s27 + $0x48] sm:$0xf] %vm3015_vm3, %v3388_v27  ;;  %v3389_v29 = vpack.c.bf16 %v3661_v7, %v3661_v7  ;;  %v2226_v47 = vpop.f32.mrb[43].mxu0 }
 0x32f   : > { %3032 = vst.msk [vmem:[%s5065_s27 + $0x40] sm:$0xf] %vm3015_vm3, %v3386_v49  ;;  %v3387_v28 = vpack.c.bf16 %v2226_v47, %v2226_v47  ;;  %v3676_v22 = vpop.f32.mrb[40].mxu1 }
 0x330   : > { %3035 = vst.msk [vmem:[%s5065_s27 + $0x4c] sm:$0xf] %vm3015_vm3, %v3389_v29  ;;  %v3396_v25 = vpack.c.bf16 %v3676_v22, %v3676_v22  ;;  %v2324_v4 = vpop.f32.mrb[41].mxu1 }
 0x331   : > { %3033 = vst.msk [vmem:[%s5065_s27 + $0x44] sm:$0xf] %vm3015_vm3, %v3387_v28  ;;  %v3394_v32 = vpack.c.bf16 %v2324_v4, %v2324_v4  ;;  %v3677_v14 = vpop.f32.mrb[42].mxu1 }
 0x332   : > { %3042 = vst.msk [vmem:[%s5065_s27 + $0x68] sm:$0xf] %vm3015_vm3, %v3396_v25  ;;  %v3397_v46 = vpack.c.bf16 %v3677_v14, %v3677_v14  ;;  %v2327_v53 = vpop.f32.mrb[43].mxu1 }
 0x333   : > { %3040 = vst.msk [vmem:[%s5065_s27 + $0x60] sm:$0xf] %vm3015_vm3, %v3394_v32  ;;  %v3395_v18 = vpack.c.bf16 %v2327_v53, %v2327_v53 }
 0x334   : > { %3043 = vst.msk [vmem:[%s5065_s27 + $0x6c] sm:$0xf] %vm3015_vm3, %v3397_v46 }
 0x335   : > { %3041 = vst.msk [vmem:[%s5065_s27 + $0x64] sm:$0xf] %vm3015_vm3, %v3395_v18 }
 0x33b   : > { %v3664_v10 = vpop.f32.mrb[44].mxu0 }
 0x33c   : > { %v3392_v35 = vpack.c.bf16 %v3664_v10, %v3664_v10  ;;  %v2239_v12 = vpop.f32.mrb[45].mxu0 }
 0x33d   : > { %v3390_v62 = vpack.c.bf16 %v2239_v12, %v2239_v12  ;;  %v3665_v55 = vpop.f32.mrb[46].mxu0 }
 0x33e   : > { %3038 = vst.msk [vmem:[%s5065_s27 + $0x58] sm:$0xf] %vm3015_vm3, %v3392_v35  ;;  %v3393_v36 = vpack.c.bf16 %v3665_v55, %v3665_v55  ;;  %v2242_v26 = vpop.f32.mrb[47].mxu0 }
 0x33f   : > { %3036 = vst.msk [vmem:[%s5065_s27 + $0x50] sm:$0xf] %vm3015_vm3, %v3390_v62  ;;  %v3391_v5 = vpack.c.bf16 %v2242_v26, %v2242_v26  ;;  %v3680_v2 = vpop.f32.mrb[44].mxu1 }
 0x340   : > { %3039 = vst.msk [vmem:[%s5065_s27 + $0x5c] sm:$0xf] %vm3015_vm3, %v3393_v36  ;;  %v3400_v11 = vpack.c.bf16 %v3680_v2, %v3680_v2  ;;  %v2340_v34 = vpop.f32.mrb[45].mxu1 }
 0x341   : > { %3037 = vst.msk [vmem:[%s5065_s27 + $0x54] sm:$0xf] %vm3015_vm3, %v3391_v5  ;;  %v3398_v24 = vpack.c.bf16 %v2340_v34, %v2340_v34  ;;  %v3681_v60 = vpop.f32.mrb[46].mxu1 }
 0x342   : > { %3046 = vst.msk [vmem:[%s5065_s27 + $0x78] sm:$0xf] %vm3015_vm3, %v3400_v11  ;;  %v3401_v20 = vpack.c.bf16 %v3681_v60, %v3681_v60  ;;  %v2343_v9 = vpop.f32.mrb[47].mxu1 }
 0x343   : > { %3044 = vst.msk [vmem:[%s5065_s27 + $0x70] sm:$0xf] %vm3015_vm3, %v3398_v24  ;;  %v3399_v54 = vpack.c.bf16 %v2343_v9, %v2343_v9 }
 0x344   : > { %3047 = vst.msk [vmem:[%s5065_s27 + $0x7c] sm:$0xf] %vm3015_vm3, %v3401_v20 }
 0x345   : > { %3045 = vst.msk [vmem:[%s5065_s27 + $0x74] sm:$0xf] %vm3015_vm3, %v3399_v54 }
 0x34b   : > { %v3692_v19 = vpop.f32.mrb[48].mxu0 }
 0x34c   : > { %v3404_v59 = vpack.c.bf16 %v3692_v19, %v3692_v19  ;;  %v2425_v63 = vpop.f32.mrb[49].mxu0 }
 0x34d   : > { %v3402_v15 = vpack.c.bf16 %v2425_v63, %v2425_v63  ;;  %v3693_v48 = vpop.f32.mrb[50].mxu0 }
 0x34e   : > { %3050 = vst.msk [vmem:[%s5065_s27 + $0x88] sm:$0xf] %vm3015_vm3, %v3404_v59  ;;  %v3405_v56 = vpack.c.bf16 %v3693_v48, %v3693_v48  ;;  %v2428_v58 = vpop.f32.mrb[51].mxu0 }
 0x34f   : > { %3048 = vst.msk [vmem:[%s5065_s27 + $0x80] sm:$0xf] %vm3015_vm3, %v3402_v15  ;;  %v3403_v61 = vpack.c.bf16 %v2428_v58, %v2428_v58  ;;  %v3708_v13 = vpop.f32.mrb[48].mxu1 }
 0x350   : > { %3051 = vst.msk [vmem:[%s5065_s27 + $0x8c] sm:$0xf] %vm3015_vm3, %v3405_v56  ;;  %v3412_v16 = vpack.c.bf16 %v3708_v13, %v3708_v13  ;;  %v2526_v45 = vpop.f32.mrb[49].mxu1 }
 0x351   : > { %3049 = vst.msk [vmem:[%s5065_s27 + $0x84] sm:$0xf] %vm3015_vm3, %v3403_v61  ;;  %v3410_v44 = vpack.c.bf16 %v2526_v45, %v2526_v45  ;;  %v3709_v1 = vpop.f32.mrb[50].mxu1 }
 0x352   : > { %3058 = vst.msk [vmem:[%s5065_s27 + $0xa8] sm:$0xf] %vm3015_vm3, %v3412_v16  ;;  %v3413_v50 = vpack.c.bf16 %v3709_v1, %v3709_v1  ;;  %v2529_v21 = vpop.f32.mrb[51].mxu1 }
 0x353   : > { %3056 = vst.msk [vmem:[%s5065_s27 + $0xa0] sm:$0xf] %vm3015_vm3, %v3410_v44  ;;  %v3411_v37 = vpack.c.bf16 %v2529_v21, %v2529_v21 }
 0x354   : > { %3059 = vst.msk [vmem:[%s5065_s27 + $0xac] sm:$0xf] %vm3015_vm3, %v3413_v50 }
 0x355   : > { %3057 = vst.msk [vmem:[%s5065_s27 + $0xa4] sm:$0xf] %vm3015_vm3, %v3411_v37 }
 0x35b   : > { %v3696_v0 = vpop.f32.mrb[52].mxu0 }
 0x35c   : > { %v3408_v8 = vpack.c.bf16 %v3696_v0, %v3696_v0  ;;  %v2441_v42 = vpop.f32.mrb[53].mxu0 }
 0x35d   : > { %v3406_v40 = vpack.c.bf16 %v2441_v42, %v2441_v42  ;;  %v3697_v52 = vpop.f32.mrb[54].mxu0 }
 0x35e   : > { %3054 = vst.msk [vmem:[%s5065_s27 + $0x98] sm:$0xf] %vm3015_vm3, %v3408_v8  ;;  %v3409_v17 = vpack.c.bf16 %v3697_v52, %v3697_v52  ;;  %v2444_v33 = vpop.f32.mrb[55].mxu0 }
 0x35f   : > { %3052 = vst.msk [vmem:[%s5065_s27 + $0x90] sm:$0xf] %vm3015_vm3, %v3406_v40  ;;  %v3407_v30 = vpack.c.bf16 %v2444_v33, %v2444_v33  ;;  %v3712_v31 = vpop.f32.mrb[52].mxu1 }
 0x360   : > { %3055 = vst.msk [vmem:[%s5065_s27 + $0x9c] sm:$0xf] %vm3015_vm3, %v3409_v17  ;;  %v3416_v57 = vpack.c.bf16 %v3712_v31, %v3712_v31  ;;  %v2542_v51 = vpop.f32.mrb[53].mxu1 }
 0x361   : > { %3053 = vst.msk [vmem:[%s5065_s27 + $0x94] sm:$0xf] %vm3015_vm3, %v3407_v30  ;;  %v3414_v23 = vpack.c.bf16 %v2542_v51, %v2542_v51  ;;  %v3713_v38 = vpop.f32.mrb[54].mxu1 }
 0x362   : > { %3062 = vst.msk [vmem:[%s5065_s27 + $0xb8] sm:$0xf] %vm3015_vm3, %v3416_v57  ;;  %v3417_v43 = vpack.c.bf16 %v3713_v38, %v3713_v38  ;;  %v2545_v39 = vpop.f32.mrb[55].mxu1 }
 0x363   : > { %3060 = vst.msk [vmem:[%s5065_s27 + $0xb0] sm:$0xf] %vm3015_vm3, %v3414_v23  ;;  %v3415_v6 = vpack.c.bf16 %v2545_v39, %v2545_v39 }
 0x364   : > { %3063 = vst.msk [vmem:[%s5065_s27 + $0xbc] sm:$0xf] %vm3015_vm3, %v3417_v43 }
 0x365   : > { %3061 = vst.msk [vmem:[%s5065_s27 + $0xb4] sm:$0xf] %vm3015_vm3, %v3415_v6 }
 0x36b   : > { %v3724_v3 = vpop.f32.mrb[56].mxu0 }
 0x36c   : > { %v3420_v27 = vpack.c.bf16 %v3724_v3, %v3724_v3  ;;  %v2627_v41 = vpop.f32.mrb[57].mxu0 }
 0x36d   : > { %v3418_v49 = vpack.c.bf16 %v2627_v41, %v2627_v41  ;;  %v3725_v7 = vpop.f32.mrb[58].mxu0 }
 0x36e   : > { %3066 = vst.msk [vmem:[%s5065_s27 + $0xc8] sm:$0xf] %vm3015_vm3, %v3420_v27  ;;  %v3421_v29 = vpack.c.bf16 %v3725_v7, %v3725_v7  ;;  %v2630_v47 = vpop.f32.mrb[59].mxu0 }
 0x36f   : > { %3064 = vst.msk [vmem:[%s5065_s27 + $0xc0] sm:$0xf] %vm3015_vm3, %v3418_v49  ;;  %v3419_v28 = vpack.c.bf16 %v2630_v47, %v2630_v47  ;;  %v3740_v22 = vpop.f32.mrb[56].mxu1 }
 0x370   : > { %3067 = vst.msk [vmem:[%s5065_s27 + $0xcc] sm:$0xf] %vm3015_vm3, %v3421_v29  ;;  %v3428_v25 = vpack.c.bf16 %v3740_v22, %v3740_v22  ;;  %v2728_v4 = vpop.f32.mrb[57].mxu1 }
 0x371   : > { %3065 = vst.msk [vmem:[%s5065_s27 + $0xc4] sm:$0xf] %vm3015_vm3, %v3419_v28  ;;  %v3426_v32 = vpack.c.bf16 %v2728_v4, %v2728_v4  ;;  %v3741_v14 = vpop.f32.mrb[58].mxu1 }
 0x372   : > { %3074 = vst.msk [vmem:[%s5065_s27 + $0xe8] sm:$0xf] %vm3015_vm3, %v3428_v25  ;;  %v3429_v46 = vpack.c.bf16 %v3741_v14, %v3741_v14  ;;  %v2731_v53 = vpop.f32.mrb[59].mxu1 }
 0x373   : > { %3072 = vst.msk [vmem:[%s5065_s27 + $0xe0] sm:$0xf] %vm3015_vm3, %v3426_v32  ;;  %v3427_v18 = vpack.c.bf16 %v2731_v53, %v2731_v53 }
 0x374   : > { %3075 = vst.msk [vmem:[%s5065_s27 + $0xec] sm:$0xf] %vm3015_vm3, %v3429_v46 }
 0x375   : > { %3073 = vst.msk [vmem:[%s5065_s27 + $0xe4] sm:$0xf] %vm3015_vm3, %v3427_v18 }
 0x377   : > { %v3728_v10 = vpop.f32.mrb[60].mxu0 }
 0x378   : > { %v3424_v35 = vpack.c.bf16 %v3728_v10, %v3728_v10  ;;  %v2643_v12 = vpop.f32.mrb[61].mxu0 }
 0x379   : > { %v3422_v62 = vpack.c.bf16 %v2643_v12, %v2643_v12  ;;  %v3729_v55 = vpop.f32.mrb[62].mxu0 }
 0x37a   : > { %3070 = vst.msk [vmem:[%s5065_s27 + $0xd8] sm:$0xf] %vm3015_vm3, %v3424_v35  ;;  %v3425_v36 = vpack.c.bf16 %v3729_v55, %v3729_v55  ;;  %v2646_v26 = vpop.f32.mrb[63].mxu0 }
 0x37b   : > { %3068 = vst.msk [vmem:[%s5065_s27 + $0xd0] sm:$0xf] %vm3015_vm3, %v3422_v62  ;;  %v3423_v5 = vpack.c.bf16 %v2646_v26, %v2646_v26 }
 0x37c   : > { %3071 = vst.msk [vmem:[%s5065_s27 + $0xdc] sm:$0xf] %vm3015_vm3, %v3425_v36 }
 0x37d   : > { %3069 = vst.msk [vmem:[%s5065_s27 + $0xd4] sm:$0xf] %vm3015_vm3, %v3423_v5 }
 0x37e   : > { %v3744_v2 = vpop.f32.mrb[60].mxu1 }
 0x37f   : > { %v3432_v11 = vpack.c.bf16 %v3744_v2, %v3744_v2  ;;  %v2744_v34 = vpop.f32.mrb[61].mxu1 }
 0x380   : > { %v3430_v24 = vpack.c.bf16 %v2744_v34, %v2744_v34  ;;  %v3745_v60 = vpop.f32.mrb[62].mxu1 }
 0x381   : > { %3078 = vst.msk [vmem:[%s5065_s27 + $0xf8] sm:$0xf] %vm3015_vm3, %v3432_v11  ;;  %v3433_v20 = vpack.c.bf16 %v3745_v60, %v3745_v60  ;;  %v2747_v9 = vpop.f32.mrb[63].mxu1 }
 0x382   : > { %3076 = vst.msk [vmem:[%s5065_s27 + $0xf0] sm:$0xf] %vm3015_vm3, %v3430_v24  ;;  %v3431_v54 = vpack.c.bf16 %v2747_v9, %v2747_v9 }
 0x383   : > { %3079 = vst.msk [vmem:[%s5065_s27 + $0xfc] sm:$0xf] %vm3015_vm3, %v3433_v20 }
 0x384   : > { %3077 = vst.msk [vmem:[%s5065_s27 + $0xf4] sm:$0xf] %vm3015_vm3, %v3431_v54 }
 0x385 PF: > { %s13_s12 = sadd.s32 1, %s4088_s12  }
 0x386   : > { %p10_p4 = scmp.ge.s32.totalorder %s13_s12, 6  }
 0x388   :  { %12 = sbr.rel (!%p10_p4) target bundleno = 1 (0x1), region = 68 }

// kernel: multilevel_visual_collab.17
= control target key start
LH: loop header
LB: loop body
LE: loop exit
PB: predicated region body
PF: predicated region fallthrough
CT: control target
= control target key end

     0   :  { %s852_s12 = smov 0   ;;  %s966_s0 = inlined_call_operand.vmem [shape: bf16[128,288], index: 0, kind: input, shape index: {}]   ;;  %s967_s1 = inlined_call_operand.vmem [shape: bf16[288,32], index: 1, kind: input, shape index: {}]   ;;  %s968_s2 = inlined_call_operand.vmem [shape: f32[1,32], index: 2, kind: input, shape index: {}]   ;;  %s969_s3 = inlined_call_operand.vmem [shape: bf16[128,32], index: 3, kind: output, shape index: {}]  }
   0x1 LB: > { %s645_s13 = sadd.s32 4294967295, %s830_s12   ;;  %p649_p0 = scmp.ge.s32.totalorder %s830_s12, 1  ;;  %s830_s12 = sphi %s852_s12, %s13_s12  }
   0x2   : > { %p139_p1 = scmp.lt.s32.totalorder %s830_s12, 3 }
   0x4   : > { %p140_p2 = pnand %p649_p0, %p139_p1 }
   0x5   : > { %v790_v0 = vld [vmem:[%s967_s1 + $0x40] sm:$0xff] (!%p140_p2)   ;;  %s650_s16 = sshll.u32 (!%p140_p2), %s645_s13, 3  ;;  %v792_v2 = vld [vmem:[%s967_s1 + $0x48] sm:$0xff] (!%p140_p2)   ;;  %v794_v4 = vld [vmem:[%s967_s1 + $0x50] sm:$0xff] (!%p140_p2)   ;;  %vm405_vm0 = vcmask (!%p140_p2), 261120   ;;  %vm580_vm1 = vcmask (!%p140_p2), 257024  }
   0x6   : > { %143 = sbr.rel (%p140_p2) target bundleno = 278 (0x116), region = 32  ;;  %v791_v1 = vld [vmem:[%s967_s1] sm:$0xff] (!%p140_p2)   ;;  %707 = vmatprep.subr.bf16.mxu0 (!%p140_p2), %v790_v0  ;;  %765 = vmatprep.subr.bf16.mxu1 (!%p140_p2), %v790_v0  ;;  %p165_p3 = scmp.lt.s32.totalorder (!%p140_p2), %s650_s16, 15  ;;  %v793_v3 = vld [vmem:[%s967_s1 + $0x8] sm:$0xff] (!%p140_p2)   ;;  %v795_v5 = vld [vmem:[%s967_s1 + $0x10] sm:$0xff] (!%p140_p2)  }
   0x7   : > { %708 = vmatpush3.bf16.msra.mxu0 (!%p140_p2), %v791_v1  ;;  %773 = vmatpush3.bf16.msra.mxu1 (!%p140_p2), %v791_v1  ;;  %v796_v6 = vld [vmem:[%s967_s1 + $0x58] sm:$0xff] (!%p140_p2)   ;;  %v798_v8 = vld [vmem:[%s967_s1 + $0x60] sm:$0xff] (!%p140_p2)   ;;  %v800_v10 = vld [vmem:[%s967_s1 + $0x68] sm:$0xff] (!%p140_p2)  }
   0x8   : > { %709 = vmatprep.subr.bf16.mxu0 (!%p140_p2), %v792_v2  ;;  %766 = vmatprep.subr.bf16.mxu1 (!%p140_p2), %v792_v2  ;;  %v797_v7 = vld [vmem:[%s967_s1 + $0x18] sm:$0xff] (!%p140_p2)   ;;  %v799_v9 = vld [vmem:[%s967_s1 + $0x20] sm:$0xff] (!%p140_p2)   ;;  %v801_v13 = vld [vmem:[%s967_s1 + $0x28] sm:$0xff] (!%p140_p2)  }
   0x9   : > { %v802_v14 = vld [vmem:[%s967_s1 + $0x70] sm:$0xff] (!%p140_p2)   ;;  %v804_v16 = vld [vmem:[%s967_s1 + $0x78] sm:$0xff] (!%p140_p2)   ;;  %v812_v18 = vld [vmem:[%s967_s1 + $0x80] sm:$0xff] (!%p140_p2)  }
   0xa   : > { %v803_v15 = vld [vmem:[%s967_s1 + $0x30] sm:$0xff] (!%p140_p2)   ;;  %v805_v17 = vld [vmem:[%s967_s1 + $0x38] sm:$0xff] (!%p140_p2)   ;;  %v813_v22 = vld [vmem:[%s967_s1 + $0x88] sm:$0xff] (!%p140_p2)  }
   0xb   : > { %710 = vmatpush3.bf16.msra.mxu0 (!%p140_p2), %v793_v3  ;;  %774 = vmatpush3.bf16.msra.mxu1 (!%p140_p2), %v793_v3  ;;  %v654_v42 = vld [vmem:[%s968_s2] ss:$0 sm:$0xff] (!%p140_p2) }
   0xc   : > { %711 = vmatprep.subr.bf16.mxu0 (!%p140_p2), %v794_v4  ;;  %767 = vmatprep.subr.bf16.mxu1 (!%p140_p2), %v794_v4 }
   0xd   : > { %s971_s16 = smov (!%p165_p3, %s650_s16), 15 }
   0xe   : > { %s781_s29 = smul.u32 12, %s971_s16  ;;  %s653_s5 = sshll.u32 %s971_s16, 2 }
   0xf   : > { %712 = vmatpush3.bf16.msra.mxu0 %v795_v5  ;;  %775 = vmatpush3.bf16.msra.mxu1 %v795_v5  ;;  %s945_s8 = scalar_lea.vmem %s969_s3, %s653_s5 }
  0x10   : > { %713 = vmatprep.subr.bf16.mxu0 %v796_v6  ;;  %768 = vmatprep.subr.bf16.mxu1 %v796_v6  ;;  %s893_s9 = scalar_lea.vmem %s966_s0, %s781_s29 }
  0x11   : > { %v808_v11 = vld [vmem:[%s893_s9 + $0x4] ss:$12 sps:$4 sm:$0xff]   ;;  %v811_v12 = vld [vmem:[%s893_s9 + $0x4c] ss:$12 sps:$4 sm:$0xff]   ;;  %v809_v20 = vld [vmem:[%s893_s9 + $0x48] ss:$12 sps:$4 sm:$0xff]  }
  0x12   : > { %450 = vmatprep.mubr.bf16.mxu0 %v808_v11  ;;  %474 = vmatprep.mubr.bf16.mxu1 %v811_v12  ;;  %v806_v19 = vld [vmem:[%s893_s9] ss:$12 sps:$4 sm:$0xff]   ;;  %v814_v21 = vld [vmem:[%s893_s9 + $0x1c] ss:$12 sps:$4 sm:$0xff]   ;;  %v817_v24 = vld [vmem:[%s893_s9 + $0x18] ss:$12 sps:$4 sm:$0xff]  }
  0x13   : > { %714 = vmatpush3.bf16.msra.mxu0 %v797_v7  ;;  %776 = vmatpush3.bf16.msra.mxu1 %v797_v7  ;;  %v816_v23 = vld [vmem:[%s893_s9 + $0x8] ss:$12 sps:$4 sm:$0xff]   ;;  %v818_v25 = vld [vmem:[%s893_s9 + $0x20] ss:$12 sps:$4 sm:$0xff]   ;;  %v821_v27 = vld [vmem:[%s893_s9 + $0x38] ss:$12 sps:$4 sm:$0xff]  }
  0x14   : > { %715 = vmatprep.subr.bf16.mxu0 %v798_v8  ;;  %769 = vmatprep.subr.bf16.mxu1 %v798_v8  ;;  %v819_v26 = vld [vmem:[%s893_s9 + $0x34] ss:$12 sps:$4 sm:$0xff]   ;;  %v822_v28 = vld [vmem:[%s893_s9 + $0x30] ss:$12 sps:$4 sm:$0xff]  }
  0x15   : > { %v823_v29 = vld [vmem:[%s893_s9 + $0x50] ss:$12 sps:$4 sm:$0xff]  }
  0x17   : > { %716 = vmatpush3.bf16.msra.mxu0 %v799_v9  ;;  %777 = vmatpush3.bf16.msra.mxu1 %v799_v9 }
  0x18   : > { %717 = vmatprep.subr.bf16.mxu0 %v800_v10  ;;  %770 = vmatprep.subr.bf16.mxu1 %v800_v10 }
  0x1b   : > { %718 = vmatpush3.bf16.msra.mxu0 %v801_v13  ;;  %778 = vmatpush3.bf16.msra.mxu1 %v801_v13 }
  0x1c   : > { %719 = vmatprep.subr.bf16.mxu0 %v802_v14  ;;  %771 = vmatprep.subr.bf16.mxu1 %v802_v14 }
  0x1f   : > { %720 = vmatpush3.bf16.msra.mxu0 %v803_v15  ;;  %779 = vmatpush3.bf16.msra.mxu1 %v803_v15 }
  0x20   : > { %721 = vmatprep.subr.bf16.mxu0 %v804_v16  ;;  %772 = vmatprep.subr.bf16.mxu1 %v804_v16 }
  0x23   : > { %722 = vmatpush3.bf16.msra.mxu0 %v805_v17  ;;  %780 = vmatpush3.bf16.msra.mxu1 %v805_v17 }
  0x24   : > { %753 = vmatprep.subr.bf16.mxu1 %v812_v18 }
  0x26   : > { %451 = vmatmul.mubr.bf16.vlgmr.msra.gmra.mrb[0].mxu0 %v806_v19  ;;  %475 = vmatmul.mubr.bf16.vlgmr.msra.gmra.mrb[0].mxu1 %v809_v20 }
  0x27   : > { %754 = vmatpush3.bf16.msra.mxu1 %v812_v18  ;;  %458 = vmatprep.mubr.bf16.mxu0 %v814_v21 }
  0x28   : > { %755 = vmatprep.subr.bf16.mxu1 %v813_v22  ;;  %757 = vmatprep.mubr.msk.bf16.mxu1 %vm405_vm0, %v816_v23 }
  0x2b   : > { %756 = vmatpush3.bf16.msra.mxu1 %v813_v22 }
  0x2e   : > { %459 = vmatmul.mubr.bf16.gmra.mrb[4].mxu0 %v817_v24  ;;  %758 = vmatmul.mubr.msk.bf16.vlgmr.msra.gmra.mrb[4].mxu1 %vm405_vm0, %v818_v25 }
  0x2f   : > { %466 = vmatprep.mubr.bf16.mxu0 %v819_v26  ;;  %761 = vmatprep.mubr.msk.bf16.mxu1 %vm405_vm0, %v821_v27 }
  0x36   : > { %467 = vmatmul.mubr.bf16.gmra.mrb[8].mxu0 %v822_v28  ;;  %762 = vmatmul.mubr.msk.bf16.gmra.mrb[8].mxu1 %vm405_vm0, %v823_v29 }
  0xf9   : > { %v723_v30 = vpop.f32.mrb[0].mxu0  ;;  %v741_v31 = vpop.f32.mrb[0].mxu1 }
  0xfa   : > { %v724_v32 = vpop.f32.mrb[1].mxu0  ;;  %v742_v33 = vpop.f32.mrb[1].mxu1 }
  0xfb   : > { %v725_v34 = vadd.f32 %v724_v32, %v723_v30  ;;  %v726_v35 = vpop.f32.mrb[2].mxu0  ;;  %v743_v36 = vadd.f32 %v742_v33, %v741_v31  ;;  %v744_v37 = vpop.f32.mrb[2].mxu1 }
  0xfc   : > { %v727_v38 = vpop.f32.mrb[3].mxu0  ;;  %v745_v39 = vpop.f32.mrb[3].mxu1 }
  0xfd   : > { %v728_v40 = vadd.f32 %v727_v38, %v726_v35  ;;  %v746_v41 = vadd.f32 %v745_v39, %v744_v37  ;;  %v453_v45 = vadd.f32 %v725_v34, %v654_v42  ;;  %v477_v62 = vadd.f32 %v743_v36, %v654_v42 }
  0xff   : > { %v456_v52 = vadd.f32 %v728_v40, %v654_v42  ;;  %v480_v6 = vadd.f32 %v746_v41, %v654_v42 }
 0x101   : > { %v729_v43 = vpop.f32.mrb[4].mxu0  ;;  %v759_v44 = vpop.f32.mrb[4].mxu1 }
 0x102   : > { %v730_v46 = vpop.f32.mrb[5].mxu0  ;;  %v517_v47 = vpop.f32.mrb[5].mxu1 }
 0x103   : > { %v731_v48 = vadd.f32 %v730_v46, %v729_v43  ;;  %v518_v49 = vadd.f32 %v517_v47, %v453_v45  ;;  %v732_v50 = vpop.f32.mrb[6].mxu0  ;;  %v760_v51 = vpop.f32.mrb[6].mxu1 }
 0x104   : > { %v733_v53 = vpop.f32.mrb[7].mxu0  ;;  %v520_v54 = vpop.f32.mrb[7].mxu1 }
 0x105   : > { %v461_v55 = vadd.f32 %v731_v48, %v654_v42  ;;  %v699_v56 = vpack.c.bf16 %v518_v49, %v518_v49  ;;  %v734_v57 = vadd.f32 %v733_v53, %v732_v50  ;;  %v521_v58 = vadd.f32 %v520_v54, %v456_v52 }
 0x107   : > { %v526_v59 = vadd.f32 %v759_v44, %v461_v55  ;;  %581 = vst.msk [vmem:[%s945_s8] sm:$0xf] %vm580_vm1, %v699_v56  ;;  %v464_v60 = vadd.f32 %v734_v57, %v654_v42  ;;  %v700_v61 = vpack.c.bf16 %v521_v58, %v521_v58 }
 0x109   : > { %v701_v63 = vpack.c.bf16 %v526_v59, %v526_v59  ;;  %v529_v0 = vadd.f32 %v760_v51, %v464_v60  ;;  %582 = vst.msk [vmem:[%s945_s8 + $0x4] sm:$0xf] %vm580_vm1, %v700_v61  ;;  %v735_v1 = vpop.f32.mrb[8].mxu0  ;;  %v763_v2 = vpop.f32.mrb[8].mxu1 }
 0x10a   : > { %v542_v3 = vadd.f32 %v763_v2, %v477_v62  ;;  %v736_v4 = vpop.f32.mrb[9].mxu0  ;;  %v533_v5 = vpop.f32.mrb[9].mxu1 }
 0x10b   : > { %583 = vst.msk [vmem:[%s945_s8 + $0x8] sm:$0xf] %vm580_vm1, %v701_v63  ;;  %v702_v7 = vpack.c.bf16 %v529_v0, %v529_v0  ;;  %v737_v8 = vadd.f32 %v736_v4, %v735_v1  ;;  %v738_v9 = vpop.f32.mrb[10].mxu0  ;;  %v764_v10 = vpop.f32.mrb[10].mxu1 }
 0x10c   : > { %v705_v11 = vpack.c.bf16 %v542_v3, %v542_v3  ;;  %v545_v12 = vadd.f32 %v764_v10, %v480_v6  ;;  %v739_v13 = vpop.f32.mrb[11].mxu0  ;;  %v536_v14 = vpop.f32.mrb[11].mxu1 }
 0x10d   : > { %584 = vst.msk [vmem:[%s945_s8 + $0xc] sm:$0xf] %vm580_vm1, %v702_v7  ;;  %v469_v15 = vadd.f32 %v737_v8, %v654_v42  ;;  %v740_v16 = vadd.f32 %v739_v13, %v738_v9 }
 0x10e   : > { %587 = vst.msk [vmem:[%s945_s8 + $0x18] sm:$0xf] %vm580_vm1, %v705_v11  ;;  %v706_v17 = vpack.c.bf16 %v545_v12, %v545_v12 }
 0x10f   : > { %v534_v18 = vadd.f32 %v533_v5, %v469_v15  ;;  %v472_v19 = vadd.f32 %v740_v16, %v654_v42 }
 0x110   : > { %588 = vst.msk [vmem:[%s945_s8 + $0x1c] sm:$0xf] %vm580_vm1, %v706_v17 }
 0x111   : > { %v703_v20 = vpack.c.bf16 %v534_v18, %v534_v18  ;;  %v537_v21 = vadd.f32 %v536_v14, %v472_v19 }
 0x113   : > { %585 = vst.msk [vmem:[%s945_s8 + $0x10] sm:$0xf] %vm580_vm1, %v703_v20  ;;  %v704_v22 = vpack.c.bf16 %v537_v21, %v537_v21 }
 0x115   : > { %586 = vst.msk [vmem:[%s945_s8 + $0x14] sm:$0xf] %vm580_vm1, %v704_v22 }
 0x116 PF: > { %s13_s12 = sadd.s32 1, %s830_s12  }
 0x117   : > { %p10_p4 = scmp.ge.s32.totalorder %s13_s12, 4  }
 0x119   :  { %12 = sbr.rel (!%p10_p4) target bundleno = 1 (0x1), region = 62 }

// kernel: multilevel_visual_collab.18
= control target key start
LH: loop header
LB: loop body
LE: loop exit
PB: predicated region body
PF: predicated region fallthrough
CT: control target
= control target key end

     0   :  { %s1110_s21 = smov 0   ;;  %s1282_s0 = inlined_call_operand.vmem [shape: bf16[128,288], index: 0, kind: input, shape index: {}]   ;;  %s1283_s1 = inlined_call_operand.vmem [shape: bf16[288,32], index: 1, kind: input, shape index: {}]   ;;  %s1284_s2 = inlined_call_operand.vmem [shape: f32[1,32], index: 2, kind: input, shape index: {}]   ;;  %s1285_s3 = inlined_call_operand.vmem [shape: f32[128,32], index: 3, kind: input, shape index: {}, may-alias: {3,4}]   ;;  %s1286_s4 = inlined_call_operand.vmem [shape: f32[128,32], index: 4, kind: input, shape index: {}, may-alias: {3,4}]   ;;  %s1287_s5 = inlined_call_operand.vmem [shape: bf16[128,32], index: 5, kind: output, shape index: {0}]   ;;  %s1288_s6 = inlined_call_operand.vmem [shape: f32[128,32], index: 6, kind: output, shape index: {1}]  }
   0x1 LB: > { %s882_s22 = sadd.s32 4294967295, %s1073_s21   ;;  %p886_p0 = scmp.ge.s32.totalorder %s1073_s21, 1  ;;  %s1073_s21 = sphi %s1110_s21, %s17_s21  }
   0x2   : > { %p239_p1 = scmp.lt.s32.totalorder %s1073_s21, 3 }
   0x4   : > { %p240_p2 = pnand %p886_p0, %p239_p1 }
   0x5   : > { %v1033_v0 = vld [vmem:[%s1283_s1 + $0x40] sm:$0xff] (!%p240_p2)   ;;  %s887_s25 = sshll.u32 (!%p240_p2), %s882_s22, 3  ;;  %v1035_v2 = vld [vmem:[%s1283_s1 + $0x48] sm:$0xff] (!%p240_p2)   ;;  %v1037_v4 = vld [vmem:[%s1283_s1 + $0x50] sm:$0xff] (!%p240_p2)   ;;  %vm544_vm0 = vcmask (!%p240_p2), 261120   ;;  %vm735_vm1 = vcmask (!%p240_p2), 257024  }
   0x6   : > { %243 = sbr.rel (%p240_p2) target bundleno = 282 (0x11a), region = 40  ;;  %v1034_v1 = vld [vmem:[%s1283_s1] sm:$0xff] (!%p240_p2)   ;;  %950 = vmatprep.subr.bf16.mxu0 (!%p240_p2), %v1033_v0  ;;  %1008 = vmatprep.subr.bf16.mxu1 (!%p240_p2), %v1033_v0  ;;  %p286_p3 = scmp.lt.s32.totalorder (!%p240_p2), %s887_s25, 15  ;;  %v1036_v3 = vld [vmem:[%s1283_s1 + $0x8] sm:$0xff] (!%p240_p2)   ;;  %v1038_v5 = vld [vmem:[%s1283_s1 + $0x10] sm:$0xff] (!%p240_p2)  }
   0x7   : > { %951 = vmatpush3.bf16.msra.mxu0 (!%p240_p2), %v1034_v1  ;;  %1016 = vmatpush3.bf16.msra.mxu1 (!%p240_p2), %v1034_v1  ;;  %v1039_v6 = vld [vmem:[%s1283_s1 + $0x58] sm:$0xff] (!%p240_p2)   ;;  %v1041_v8 = vld [vmem:[%s1283_s1 + $0x60] sm:$0xff] (!%p240_p2)   ;;  %v1043_v10 = vld [vmem:[%s1283_s1 + $0x68] sm:$0xff] (!%p240_p2)  }
   0x8   : > { %952 = vmatprep.subr.bf16.mxu0 (!%p240_p2), %v1035_v2  ;;  %1009 = vmatprep.subr.bf16.mxu1 (!%p240_p2), %v1035_v2  ;;  %v1040_v7 = vld [vmem:[%s1283_s1 + $0x18] sm:$0xff] (!%p240_p2)   ;;  %v1042_v9 = vld [vmem:[%s1283_s1 + $0x20] sm:$0xff] (!%p240_p2)   ;;  %v1044_v13 = vld [vmem:[%s1283_s1 + $0x28] sm:$0xff] (!%p240_p2)  }
   0x9   : > { %v1045_v14 = vld [vmem:[%s1283_s1 + $0x70] sm:$0xff] (!%p240_p2)   ;;  %v1047_v16 = vld [vmem:[%s1283_s1 + $0x78] sm:$0xff] (!%p240_p2)   ;;  %v1055_v18 = vld [vmem:[%s1283_s1 + $0x80] sm:$0xff] (!%p240_p2)  }
   0xa   : > { %v1046_v15 = vld [vmem:[%s1283_s1 + $0x30] sm:$0xff] (!%p240_p2)   ;;  %v1048_v17 = vld [vmem:[%s1283_s1 + $0x38] sm:$0xff] (!%p240_p2)   ;;  %v1056_v22 = vld [vmem:[%s1283_s1 + $0x88] sm:$0xff] (!%p240_p2)  }
   0xb   : > { %953 = vmatpush3.bf16.msra.mxu0 (!%p240_p2), %v1036_v3  ;;  %1017 = vmatpush3.bf16.msra.mxu1 (!%p240_p2), %v1036_v3  ;;  %v1200_v42 = vld [vmem:[%s1284_s2] ss:$0 sm:$0xff] (!%p240_p2) }
   0xc   : > { %954 = vmatprep.subr.bf16.mxu0 (!%p240_p2), %v1037_v4  ;;  %1010 = vmatprep.subr.bf16.mxu1 (!%p240_p2), %v1037_v4 }
   0xd   : > { %s1290_s25 = smov (!%p286_p3, %s887_s25), 15 }
   0xe   : > { %s1024_s14 = smul.u32 12, %s1290_s25  ;;  %s890_s18 = sshll.u32 %s1290_s25, 3 }
   0xf   : > { %955 = vmatpush3.bf16.msra.mxu0 %v1038_v5  ;;  %1018 = vmatpush3.bf16.msra.mxu1 %v1038_v5  ;;  %s1205_s24 = scalar_lea.vmem %s1285_s3, %s890_s18  ;;  %s1210_s28 = scalar_lea.vmem %s1286_s4, %s890_s18 }
  0x10   : > { %956 = vmatprep.subr.bf16.mxu0 %v1039_v6  ;;  %1011 = vmatprep.subr.bf16.mxu1 %v1039_v6  ;;  %s1151_s22 = scalar_lea.vmem %s1282_s0, %s1024_s14  ;;  %v687_v48 = vld [vmem:[%s1205_s24] sm:$0xff]  ;;  %s894_s29 = sshll.u32 %s1290_s25, 2  ;;  %v688_v61 = vld [vmem:[%s1205_s24 + $0x8] sm:$0xff]  ;;  %v689_v62 = vld [vmem:[%s1205_s24 + $0x10] sm:$0xff] }
  0x11   : > { %v1051_v11 = vld [vmem:[%s1151_s22 + $0x4] ss:$12 sps:$4 sm:$0xff]   ;;  %v1054_v12 = vld [vmem:[%s1151_s22 + $0x4c] ss:$12 sps:$4 sm:$0xff]   ;;  %v1052_v20 = vld [vmem:[%s1151_s22 + $0x48] ss:$12 sps:$4 sm:$0xff]   ;;  %s1222_s7 = scalar_lea.vmem %s1287_s5, %s894_s29  ;;  %s1227_s10 = scalar_lea.vmem %s1288_s6, %s890_s18 }
  0x12   : > { %589 = vmatprep.mubr.bf16.mxu0 %v1051_v11  ;;  %613 = vmatprep.mubr.bf16.mxu1 %v1054_v12  ;;  %v1049_v19 = vld [vmem:[%s1151_s22] ss:$12 sps:$4 sm:$0xff]   ;;  %v1057_v21 = vld [vmem:[%s1151_s22 + $0x1c] ss:$12 sps:$4 sm:$0xff]   ;;  %v1060_v24 = vld [vmem:[%s1151_s22 + $0x18] ss:$12 sps:$4 sm:$0xff]  }
  0x13   : > { %957 = vmatpush3.bf16.msra.mxu0 %v1040_v7  ;;  %1019 = vmatpush3.bf16.msra.mxu1 %v1040_v7  ;;  %v1059_v23 = vld [vmem:[%s1151_s22 + $0x8] ss:$12 sps:$4 sm:$0xff]   ;;  %v1061_v25 = vld [vmem:[%s1151_s22 + $0x20] ss:$12 sps:$4 sm:$0xff]   ;;  %v1064_v27 = vld [vmem:[%s1151_s22 + $0x38] ss:$12 sps:$4 sm:$0xff]  }
  0x14   : > { %958 = vmatprep.subr.bf16.mxu0 %v1041_v8  ;;  %1012 = vmatprep.subr.bf16.mxu1 %v1041_v8  ;;  %v1062_v26 = vld [vmem:[%s1151_s22 + $0x34] ss:$12 sps:$4 sm:$0xff]   ;;  %v1065_v28 = vld [vmem:[%s1151_s22 + $0x30] ss:$12 sps:$4 sm:$0xff]   ;;  %v745_v3 = vld [vmem:[%s1210_s28 + $0x8] sm:$0xff] }
  0x15   : > { %v1066_v29 = vld [vmem:[%s1151_s22 + $0x50] ss:$12 sps:$4 sm:$0xff]   ;;  %v744_v54 = vld [vmem:[%s1210_s28] sm:$0xff] }
  0x16   : > { %v746_v4 = vld [vmem:[%s1210_s28 + $0x10] sm:$0xff]  ;;  %v690_v5 = vld [vmem:[%s1205_s24 + $0x18] sm:$0xff] }
  0x17   : > { %959 = vmatpush3.bf16.msra.mxu0 %v1042_v9  ;;  %1020 = vmatpush3.bf16.msra.mxu1 %v1042_v9  ;;  %v693_v12 = vld [vmem:[%s1205_s24 + $0x30] sm:$0xff] }
  0x18   : > { %960 = vmatprep.subr.bf16.mxu0 %v1043_v10  ;;  %1013 = vmatprep.subr.bf16.mxu1 %v1043_v10 }
  0x1b   : > { %961 = vmatpush3.bf16.msra.mxu0 %v1044_v13  ;;  %1021 = vmatpush3.bf16.msra.mxu1 %v1044_v13  ;;  %v747_v13 = vld [vmem:[%s1210_s28 + $0x18] sm:$0xff] }
  0x1c   : > { %962 = vmatprep.subr.bf16.mxu0 %v1045_v14  ;;  %1014 = vmatprep.subr.bf16.mxu1 %v1045_v14 }
  0x1f   : > { %963 = vmatpush3.bf16.msra.mxu0 %v1046_v15  ;;  %1022 = vmatpush3.bf16.msra.mxu1 %v1046_v15 }
  0x20   : > { %964 = vmatprep.subr.bf16.mxu0 %v1047_v16  ;;  %1015 = vmatprep.subr.bf16.mxu1 %v1047_v16 }
  0x23   : > { %965 = vmatpush3.bf16.msra.mxu0 %v1048_v17  ;;  %1023 = vmatpush3.bf16.msra.mxu1 %v1048_v17 }
  0x24   : > { %996 = vmatprep.subr.bf16.mxu1 %v1055_v18 }
  0x26   : > { %590 = vmatmul.mubr.bf16.vlgmr.msra.gmra.mrb[0].mxu0 %v1049_v19  ;;  %614 = vmatmul.mubr.bf16.vlgmr.msra.gmra.mrb[0].mxu1 %v1052_v20 }
  0x27   : > { %997 = vmatpush3.bf16.msra.mxu1 %v1055_v18  ;;  %597 = vmatprep.mubr.bf16.mxu0 %v1057_v21 }
  0x28   : > { %998 = vmatprep.subr.bf16.mxu1 %v1056_v22  ;;  %1000 = vmatprep.mubr.msk.bf16.mxu1 %vm544_vm0, %v1059_v23  ;;  %v750_v23 = vld [vmem:[%s1210_s28 + $0x30] sm:$0xff] }
  0x2b   : > { %999 = vmatpush3.bf16.msra.mxu1 %v1056_v22 }
  0x2e   : > { %598 = vmatmul.mubr.bf16.gmra.mrb[4].mxu0 %v1060_v24  ;;  %1001 = vmatmul.mubr.msk.bf16.vlgmr.msra.gmra.mrb[4].mxu1 %vm544_vm0, %v1061_v25 }
  0x2f   : > { %605 = vmatprep.mubr.bf16.mxu0 %v1062_v26  ;;  %1004 = vmatprep.mubr.msk.bf16.mxu1 %vm544_vm0, %v1064_v27  ;;  %v694_v27 = vld [vmem:[%s1205_s24 + $0x38] sm:$0xff] }
  0x36   : > { %606 = vmatmul.mubr.bf16.gmra.mrb[8].mxu0 %v1065_v28  ;;  %1005 = vmatmul.mubr.msk.bf16.gmra.mrb[8].mxu1 %vm544_vm0, %v1066_v29 }
  0xf9   : > { %v966_v30 = vpop.f32.mrb[0].mxu0  ;;  %v984_v31 = vpop.f32.mrb[0].mxu1 }
  0xfa   : > { %v967_v32 = vpop.f32.mrb[1].mxu0  ;;  %v985_v33 = vpop.f32.mrb[1].mxu1 }
  0xfb   : > { %v968_v34 = vadd.f32 %v967_v32, %v966_v30  ;;  %v969_v35 = vpop.f32.mrb[2].mxu0  ;;  %v986_v36 = vadd.f32 %v985_v33, %v984_v31  ;;  %v987_v37 = vpop.f32.mrb[2].mxu1 }
  0xfc   : > { %v970_v38 = vpop.f32.mrb[3].mxu0  ;;  %v988_v39 = vpop.f32.mrb[3].mxu1 }
  0xfd   : > { %v971_v40 = vadd.f32 %v970_v38, %v969_v35  ;;  %v989_v41 = vadd.f32 %v988_v39, %v987_v37  ;;  %v592_v45 = vadd.f32 %v968_v34, %v1200_v42  ;;  %v616_v7 = vadd.f32 %v986_v36, %v1200_v42  ;;  %v751_v35 = vld [vmem:[%s1210_s28 + $0x38] sm:$0xff]  ;;  %v691_v39 = vld [vmem:[%s1205_s24 + $0x20] sm:$0xff] }
  0xff   : > { %v595_v53 = vadd.f32 %v971_v40, %v1200_v42  ;;  %v619_v19 = vadd.f32 %v989_v41, %v1200_v42 }
 0x101   : > { %v972_v43 = vpop.f32.mrb[4].mxu0  ;;  %v1002_v44 = vpop.f32.mrb[4].mxu1 }
 0x102   : > { %v973_v46 = vpop.f32.mrb[5].mxu0  ;;  %v656_v47 = vpop.f32.mrb[5].mxu1 }
 0x103   : > { %v974_v49 = vadd.f32 %v973_v46, %v972_v43  ;;  %v657_v50 = vadd.f32 %v656_v47, %v592_v45  ;;  %v975_v51 = vpop.f32.mrb[6].mxu0  ;;  %v1003_v52 = vpop.f32.mrb[6].mxu1  ;;  %v692_v47 = vld [vmem:[%s1205_s24 + $0x28] sm:$0xff] }
 0x104   : > { %v976_v55 = vpop.f32.mrb[7].mxu0  ;;  %v659_v56 = vpop.f32.mrb[7].mxu1 }
 0x105   : > { %v600_v57 = vadd.f32 %v974_v49, %v1200_v42  ;;  %v695_v58 = vadd.f32 %v687_v48, %v657_v50  ;;  %v977_v59 = vadd.f32 %v976_v55, %v975_v51  ;;  %v660_v60 = vadd.f32 %v659_v56, %v595_v53  ;;  %v749_v50 = vld [vmem:[%s1210_s28 + $0x28] sm:$0xff] }
 0x107   : > { %v665_v63 = vadd.f32 %v1002_v44, %v600_v57  ;;  %v942_v0 = vpack.c.bf16 %v695_v58, %v695_v58  ;;  %v752_v1 = vmul.f32 %v744_v54, %v695_v58  ;;  %v603_v2 = vadd.f32 %v977_v59, %v1200_v42  ;;  %v748_v44 = vld [vmem:[%s1210_s28 + $0x20] sm:$0xff] }
 0x108   : > { %v696_v6 = vadd.f32 %v688_v61, %v660_v60 }
 0x109   : > { %v697_v8 = vadd.f32 %v689_v62, %v665_v63  ;;  %736 = vst.msk [vmem:[%s1222_s7] sm:$0xf] %vm735_vm1, %v942_v0  ;;  %v668_v9 = vadd.f32 %v1003_v52, %v603_v2  ;;  %v978_v10 = vpop.f32.mrb[8].mxu0  ;;  %v1006_v11 = vpop.f32.mrb[8].mxu1 }
 0x10a   : > { %760 = vst.msk [vmem:[%s1227_s10] sm:$0xff] %vm544_vm0, %v752_v1  ;;  %v943_v14 = vpack.c.bf16 %v696_v6, %v696_v6  ;;  %v753_v15 = vmul.f32 %v745_v3, %v696_v6  ;;  %v681_v16 = vadd.f32 %v1006_v11, %v616_v7  ;;  %v979_v17 = vpop.f32.mrb[9].mxu0  ;;  %v672_v18 = vpop.f32.mrb[9].mxu1 }
 0x10b   : > { %v944_v20 = vpack.c.bf16 %v697_v8, %v697_v8  ;;  %v754_v21 = vmul.f32 %v746_v4, %v697_v8  ;;  %v698_v22 = vadd.f32 %v690_v5, %v668_v9  ;;  %v980_v24 = vadd.f32 %v979_v17, %v978_v10  ;;  %v981_v25 = vpop.f32.mrb[10].mxu0  ;;  %v1007_v26 = vpop.f32.mrb[10].mxu1 }
 0x10c   : > { %737 = vst.msk [vmem:[%s1222_s7 + $0x4] sm:$0xf] %vm735_vm1, %v943_v14  ;;  %v701_v28 = vadd.f32 %v693_v12, %v681_v16  ;;  %v684_v29 = vadd.f32 %v1007_v26, %v619_v19  ;;  %v982_v30 = vpop.f32.mrb[11].mxu0  ;;  %v675_v31 = vpop.f32.mrb[11].mxu1 }
 0x10d   : > { %761 = vst.msk [vmem:[%s1227_s10 + $0x8] sm:$0xff] %vm544_vm0, %v753_v15  ;;  %762 = vst.msk [vmem:[%s1227_s10 + $0x10] sm:$0xff] %vm544_vm0, %v754_v21  ;;  %v945_v32 = vpack.c.bf16 %v698_v22, %v698_v22  ;;  %v755_v33 = vmul.f32 %v747_v13, %v698_v22  ;;  %v608_v34 = vadd.f32 %v980_v24, %v1200_v42 }
 0x10e   : > { %738 = vst.msk [vmem:[%s1222_s7 + $0x8] sm:$0xf] %vm735_vm1, %v944_v20  ;;  %v983_v36 = vadd.f32 %v982_v30, %v981_v25  ;;  %v948_v37 = vpack.c.bf16 %v701_v28, %v701_v28  ;;  %v758_v38 = vmul.f32 %v750_v23, %v701_v28  ;;  %v702_v40 = vadd.f32 %v694_v27, %v684_v29 }
 0x10f   : > { %739 = vst.msk [vmem:[%s1222_s7 + $0xc] sm:$0xf] %vm735_vm1, %v945_v32  ;;  %v673_v41 = vadd.f32 %v672_v18, %v608_v34 }
 0x110   : > { %763 = vst.msk [vmem:[%s1227_s10 + $0x18] sm:$0xff] %vm544_vm0, %v755_v33  ;;  %v611_v43 = vadd.f32 %v983_v36, %v1200_v42  ;;  %766 = vst.msk [vmem:[%s1227_s10 + $0x30] sm:$0xff] %vm544_vm0, %v758_v38  ;;  %v949_v45 = vpack.c.bf16 %v702_v40, %v702_v40  ;;  %v759_v46 = vmul.f32 %v751_v35, %v702_v40 }
 0x111   : > { %742 = vst.msk [vmem:[%s1222_s7 + $0x18] sm:$0xf] %vm735_vm1, %v948_v37  ;;  %v699_v48 = vadd.f32 %v691_v39, %v673_v41 }
 0x112   : > { %v676_v49 = vadd.f32 %v675_v31, %v611_v43  ;;  %743 = vst.msk [vmem:[%s1222_s7 + $0x1c] sm:$0xf] %vm735_vm1, %v949_v45 }
 0x113   : > { %767 = vst.msk [vmem:[%s1227_s10 + $0x38] sm:$0xff] %vm544_vm0, %v759_v46  ;;  %v946_v51 = vpack.c.bf16 %v699_v48, %v699_v48  ;;  %v756_v42 = vmul.f32 %v748_v44, %v699_v48 }
 0x114   : > { %v700_v52 = vadd.f32 %v692_v47, %v676_v49 }
 0x115   : > { %740 = vst.msk [vmem:[%s1222_s7 + $0x10] sm:$0xf] %vm735_vm1, %v946_v51 }
 0x116   : > { %764 = vst.msk [vmem:[%s1227_s10 + $0x20] sm:$0xff] %vm544_vm0, %v756_v42  ;;  %v947_v53 = vpack.c.bf16 %v700_v52, %v700_v52  ;;  %v757_v54 = vmul.f32 %v749_v50, %v700_v52 }
 0x118   : > { %741 = vst.msk [vmem:[%s1222_s7 + $0x14] sm:$0xf] %vm735_vm1, %v947_v53 }
 0x119   : > { %765 = vst.msk [vmem:[%s1227_s10 + $0x28] sm:$0xff] %vm544_vm0, %v757_v54 }
 0x11a PF: > { %s17_s21 = sadd.s32 1, %s1073_s21  }
 0x11b   : > { %p14_p4 = scmp.ge.s32.totalorder %s17_s21, 4  }
 0x11d   :  { %16 = sbr.rel (!%p14_p4) target bundleno = 1 (0x1), region = 88 }

// kernel: multilevel_visual_collab.22
= control target key start
LH: loop header
LB: loop body
LE: loop exit
PB: predicated region body
PF: predicated region fallthrough
CT: control target
= control target key end

     0   :  { %s936_s15 = smov 0   ;;  %s1064_s0 = inlined_call_operand.vmem [shape: bf16[128,288], index: 0, kind: input, shape index: {}]   ;;  %s1065_s1 = inlined_call_operand.vmem [shape: bf16[288,32], index: 1, kind: input, shape index: {}]   ;;  %s1066_s2 = inlined_call_operand.vmem [shape: f32[1,32], index: 2, kind: input, shape index: {}]   ;;  %s1067_s3 = inlined_call_operand.vmem [shape: f32[128,32], index: 3, kind: input, shape index: {}]   ;;  %s1068_s4 = inlined_call_operand.vmem [shape: bf16[128,32], index: 4, kind: output, shape index: {}]  }
   0x1 LB: > { %s722_s16 = sadd.s32 4294967295, %s909_s15   ;;  %p726_p0 = scmp.ge.s32.totalorder %s909_s15, 1  ;;  %s909_s15 = sphi %s936_s15, %s14_s15  }
   0x2   : > { %p175_p1 = scmp.lt.s32.totalorder %s909_s15, 3 }
   0x4   : > { %p176_p2 = pnand %p726_p0, %p175_p1 }
   0x5   : > { %v869_v0 = vld [vmem:[%s1065_s1 + $0x40] sm:$0xff] (!%p176_p2)   ;;  %s727_s19 = sshll.u32 (!%p176_p2), %s722_s16, 3  ;;  %v871_v2 = vld [vmem:[%s1065_s1 + $0x48] sm:$0xff] (!%p176_p2)   ;;  %v873_v4 = vld [vmem:[%s1065_s1 + $0x50] sm:$0xff] (!%p176_p2)   ;;  %vm454_vm0 = vcmask (!%p176_p2), 261120   ;;  %vm645_vm1 = vcmask (!%p176_p2), 257024  }
   0x6   : > { %179 = sbr.rel (%p176_p2) target bundleno = 280 (0x118), region = 36  ;;  %v870_v1 = vld [vmem:[%s1065_s1] sm:$0xff] (!%p176_p2)   ;;  %786 = vmatprep.subr.bf16.mxu0 (!%p176_p2), %v869_v0  ;;  %844 = vmatprep.subr.bf16.mxu1 (!%p176_p2), %v869_v0  ;;  %p208_p3 = scmp.lt.s32.totalorder (!%p176_p2), %s727_s19, 15  ;;  %v872_v3 = vld [vmem:[%s1065_s1 + $0x8] sm:$0xff] (!%p176_p2)   ;;  %v874_v5 = vld [vmem:[%s1065_s1 + $0x10] sm:$0xff] (!%p176_p2)  }
   0x7   : > { %787 = vmatpush3.bf16.msra.mxu0 (!%p176_p2), %v870_v1  ;;  %852 = vmatpush3.bf16.msra.mxu1 (!%p176_p2), %v870_v1  ;;  %v875_v6 = vld [vmem:[%s1065_s1 + $0x58] sm:$0xff] (!%p176_p2)   ;;  %v877_v8 = vld [vmem:[%s1065_s1 + $0x60] sm:$0xff] (!%p176_p2)   ;;  %v879_v10 = vld [vmem:[%s1065_s1 + $0x68] sm:$0xff] (!%p176_p2)  }
   0x8   : > { %788 = vmatprep.subr.bf16.mxu0 (!%p176_p2), %v871_v2  ;;  %845 = vmatprep.subr.bf16.mxu1 (!%p176_p2), %v871_v2  ;;  %v876_v7 = vld [vmem:[%s1065_s1 + $0x18] sm:$0xff] (!%p176_p2)   ;;  %v878_v9 = vld [vmem:[%s1065_s1 + $0x20] sm:$0xff] (!%p176_p2)   ;;  %v880_v13 = vld [vmem:[%s1065_s1 + $0x28] sm:$0xff] (!%p176_p2)  }
   0x9   : > { %v881_v14 = vld [vmem:[%s1065_s1 + $0x70] sm:$0xff] (!%p176_p2)   ;;  %v883_v16 = vld [vmem:[%s1065_s1 + $0x78] sm:$0xff] (!%p176_p2)   ;;  %v891_v18 = vld [vmem:[%s1065_s1 + $0x80] sm:$0xff] (!%p176_p2)  }
   0xa   : > { %v882_v15 = vld [vmem:[%s1065_s1 + $0x30] sm:$0xff] (!%p176_p2)   ;;  %v884_v17 = vld [vmem:[%s1065_s1 + $0x38] sm:$0xff] (!%p176_p2)   ;;  %v892_v22 = vld [vmem:[%s1065_s1 + $0x88] sm:$0xff] (!%p176_p2)  }
   0xb   : > { %789 = vmatpush3.bf16.msra.mxu0 (!%p176_p2), %v872_v3  ;;  %853 = vmatpush3.bf16.msra.mxu1 (!%p176_p2), %v872_v3  ;;  %v733_v42 = vld [vmem:[%s1066_s2] ss:$0 sm:$0xff] (!%p176_p2) }
   0xc   : > { %790 = vmatprep.subr.bf16.mxu0 (!%p176_p2), %v873_v4  ;;  %846 = vmatprep.subr.bf16.mxu1 (!%p176_p2), %v873_v4 }
   0xd   : > { %s1070_s19 = smov (!%p208_p3, %s727_s19), 15 }
   0xe   : > { %s860_s6 = smul.u32 12, %s1070_s19  ;;  %s730_s8 = sshll.u32 %s1070_s19, 3 }
   0xf   : > { %791 = vmatpush3.bf16.msra.mxu0 %v874_v5  ;;  %854 = vmatpush3.bf16.msra.mxu1 %v874_v5  ;;  %s732_s14 = sshll.u32 %s1070_s19, 2 }
  0x10   : > { %792 = vmatprep.subr.bf16.mxu0 %v875_v6  ;;  %847 = vmatprep.subr.bf16.mxu1 %v875_v6  ;;  %s977_s13 = scalar_lea.vmem %s1064_s0, %s860_s6  ;;  %s1037_s18 = scalar_lea.vmem %s1068_s4, %s732_s14 }
  0x11   : > { %v887_v11 = vld [vmem:[%s977_s13 + $0x4] ss:$12 sps:$4 sm:$0xff]   ;;  %v890_v12 = vld [vmem:[%s977_s13 + $0x4c] ss:$12 sps:$4 sm:$0xff]   ;;  %v888_v20 = vld [vmem:[%s977_s13 + $0x48] ss:$12 sps:$4 sm:$0xff]  }
  0x12   : > { %499 = vmatprep.mubr.bf16.mxu0 %v887_v11  ;;  %523 = vmatprep.mubr.bf16.mxu1 %v890_v12  ;;  %v885_v19 = vld [vmem:[%s977_s13] ss:$12 sps:$4 sm:$0xff]   ;;  %v893_v21 = vld [vmem:[%s977_s13 + $0x1c] ss:$12 sps:$4 sm:$0xff]   ;;  %v896_v24 = vld [vmem:[%s977_s13 + $0x18] ss:$12 sps:$4 sm:$0xff]  }
  0x13   : > { %793 = vmatpush3.bf16.msra.mxu0 %v876_v7  ;;  %855 = vmatpush3.bf16.msra.mxu1 %v876_v7  ;;  %v895_v23 = vld [vmem:[%s977_s13 + $0x8] ss:$12 sps:$4 sm:$0xff]   ;;  %v897_v25 = vld [vmem:[%s977_s13 + $0x20] ss:$12 sps:$4 sm:$0xff]   ;;  %v900_v27 = vld [vmem:[%s977_s13 + $0x38] ss:$12 sps:$4 sm:$0xff]  }
  0x14   : > { %794 = vmatprep.subr.bf16.mxu0 %v877_v8  ;;  %848 = vmatprep.subr.bf16.mxu1 %v877_v8  ;;  %v898_v26 = vld [vmem:[%s977_s13 + $0x34] ss:$12 sps:$4 sm:$0xff]   ;;  %v901_v28 = vld [vmem:[%s977_s13 + $0x30] ss:$12 sps:$4 sm:$0xff]  }
  0x15   : > { %v902_v29 = vld [vmem:[%s977_s13 + $0x50] ss:$12 sps:$4 sm:$0xff]   ;;  %s1029_s13 = scalar_lea.vmem %s1067_s3, %s730_s8 }
  0x16   : > { %v597_v48 = vld [vmem:[%s1029_s13] sm:$0xff]  ;;  %v598_v56 = vld [vmem:[%s1029_s13 + $0x8] sm:$0xff]  ;;  %v599_v61 = vld [vmem:[%s1029_s13 + $0x10] sm:$0xff] }
  0x17   : > { %795 = vmatpush3.bf16.msra.mxu0 %v878_v9  ;;  %856 = vmatpush3.bf16.msra.mxu1 %v878_v9  ;;  %v600_v2 = vld [vmem:[%s1029_s13 + $0x18] sm:$0xff]  ;;  %v603_v9 = vld [vmem:[%s1029_s13 + $0x30] sm:$0xff] }
  0x18   : > { %796 = vmatprep.subr.bf16.mxu0 %v879_v10  ;;  %849 = vmatprep.subr.bf16.mxu1 %v879_v10 }
  0x1b   : > { %797 = vmatpush3.bf16.msra.mxu0 %v880_v13  ;;  %857 = vmatpush3.bf16.msra.mxu1 %v880_v13 }
  0x1c   : > { %798 = vmatprep.subr.bf16.mxu0 %v881_v14  ;;  %850 = vmatprep.subr.bf16.mxu1 %v881_v14 }
  0x1f   : > { %799 = vmatpush3.bf16.msra.mxu0 %v882_v15  ;;  %858 = vmatpush3.bf16.msra.mxu1 %v882_v15 }
  0x20   : > { %800 = vmatprep.subr.bf16.mxu0 %v883_v16  ;;  %851 = vmatprep.subr.bf16.mxu1 %v883_v16 }
  0x23   : > { %801 = vmatpush3.bf16.msra.mxu0 %v884_v17  ;;  %859 = vmatpush3.bf16.msra.mxu1 %v884_v17 }
  0x24   : > { %832 = vmatprep.subr.bf16.mxu1 %v891_v18 }
  0x26   : > { %500 = vmatmul.mubr.bf16.vlgmr.msra.gmra.mrb[0].mxu0 %v885_v19  ;;  %524 = vmatmul.mubr.bf16.vlgmr.msra.gmra.mrb[0].mxu1 %v888_v20  ;;  %v604_v19 = vld [vmem:[%s1029_s13 + $0x38] sm:$0xff] }
  0x27   : > { %833 = vmatpush3.bf16.msra.mxu1 %v891_v18  ;;  %507 = vmatprep.mubr.bf16.mxu0 %v893_v21 }
  0x28   : > { %834 = vmatprep.subr.bf16.mxu1 %v892_v22  ;;  %836 = vmatprep.mubr.msk.bf16.mxu1 %vm454_vm0, %v895_v23 }
  0x2b   : > { %835 = vmatpush3.bf16.msra.mxu1 %v892_v22 }
  0x2e   : > { %508 = vmatmul.mubr.bf16.gmra.mrb[4].mxu0 %v896_v24  ;;  %837 = vmatmul.mubr.msk.bf16.vlgmr.msra.gmra.mrb[4].mxu1 %vm454_vm0, %v897_v25 }
  0x2f   : > { %515 = vmatprep.mubr.bf16.mxu0 %v898_v26  ;;  %840 = vmatprep.mubr.msk.bf16.mxu1 %vm454_vm0, %v900_v27 }
  0x36   : > { %516 = vmatmul.mubr.bf16.gmra.mrb[8].mxu0 %v901_v28  ;;  %841 = vmatmul.mubr.msk.bf16.gmra.mrb[8].mxu1 %vm454_vm0, %v902_v29  ;;  %v601_v28 = vld [vmem:[%s1029_s13 + $0x20] sm:$0xff] }
  0xf9   : > { %v802_v30 = vpop.f32.mrb[0].mxu0  ;;  %v820_v31 = vpop.f32.mrb[0].mxu1 }
  0xfa   : > { %v803_v32 = vpop.f32.mrb[1].mxu0  ;;  %v821_v33 = vpop.f32.mrb[1].mxu1 }
  0xfb   : > { %v804_v34 = vadd.f32 %v803_v32, %v802_v30  ;;  %v805_v35 = vpop.f32.mrb[2].mxu0  ;;  %v822_v36 = vadd.f32 %v821_v33, %v820_v31  ;;  %v823_v37 = vpop.f32.mrb[2].mxu1  ;;  %v602_v33 = vld [vmem:[%s1029_s13 + $0x28] sm:$0xff] }
  0xfc   : > { %v806_v38 = vpop.f32.mrb[3].mxu0  ;;  %v824_v39 = vpop.f32.mrb[3].mxu1 }
  0xfd   : > { %v807_v40 = vadd.f32 %v806_v38, %v805_v35  ;;  %v825_v41 = vadd.f32 %v824_v39, %v823_v37  ;;  %v502_v45 = vadd.f32 %v804_v34, %v733_v42  ;;  %v526_v3 = vadd.f32 %v822_v36, %v733_v42 }
  0xff   : > { %v505_v53 = vadd.f32 %v807_v40, %v733_v42  ;;  %v529_v13 = vadd.f32 %v825_v41, %v733_v42 }
 0x101   : > { %v808_v43 = vpop.f32.mrb[4].mxu0  ;;  %v838_v44 = vpop.f32.mrb[4].mxu1 }
 0x102   : > { %v809_v46 = vpop.f32.mrb[5].mxu0  ;;  %v566_v47 = vpop.f32.mrb[5].mxu1 }
 0x103   : > { %v810_v49 = vadd.f32 %v809_v46, %v808_v43  ;;  %v567_v50 = vadd.f32 %v566_v47, %v502_v45  ;;  %v811_v51 = vpop.f32.mrb[6].mxu0  ;;  %v839_v52 = vpop.f32.mrb[6].mxu1 }
 0x104   : > { %v812_v54 = vpop.f32.mrb[7].mxu0  ;;  %v569_v55 = vpop.f32.mrb[7].mxu1 }
 0x105   : > { %v510_v57 = vadd.f32 %v810_v49, %v733_v42  ;;  %v605_v58 = vadd.f32 %v597_v48, %v567_v50  ;;  %v813_v59 = vadd.f32 %v812_v54, %v811_v51  ;;  %v570_v60 = vadd.f32 %v569_v55, %v505_v53 }
 0x107   : > { %v575_v62 = vadd.f32 %v838_v44, %v510_v57  ;;  %v778_v63 = vpack.c.bf16 %v605_v58, %v605_v58  ;;  %v513_v0 = vadd.f32 %v813_v59, %v733_v42  ;;  %v606_v1 = vadd.f32 %v598_v56, %v570_v60 }
 0x109   : > { %v607_v4 = vadd.f32 %v599_v61, %v575_v62  ;;  %646 = vst.msk [vmem:[%s1037_s18] sm:$0xf] %vm645_vm1, %v778_v63  ;;  %v578_v5 = vadd.f32 %v839_v52, %v513_v0  ;;  %v779_v6 = vpack.c.bf16 %v606_v1, %v606_v1  ;;  %v814_v7 = vpop.f32.mrb[8].mxu0  ;;  %v842_v8 = vpop.f32.mrb[8].mxu1 }
 0x10a   : > { %v591_v10 = vadd.f32 %v842_v8, %v526_v3  ;;  %v815_v11 = vpop.f32.mrb[9].mxu0  ;;  %v582_v12 = vpop.f32.mrb[9].mxu1 }
 0x10b   : > { %v780_v14 = vpack.c.bf16 %v607_v4, %v607_v4  ;;  %v608_v15 = vadd.f32 %v600_v2, %v578_v5  ;;  %647 = vst.msk [vmem:[%s1037_s18 + $0x4] sm:$0xf] %vm645_vm1, %v779_v6  ;;  %v816_v16 = vadd.f32 %v815_v11, %v814_v7  ;;  %v817_v17 = vpop.f32.mrb[10].mxu0  ;;  %v843_v18 = vpop.f32.mrb[10].mxu1 }
 0x10c   : > { %v611_v20 = vadd.f32 %v603_v9, %v591_v10  ;;  %v594_v21 = vadd.f32 %v843_v18, %v529_v13  ;;  %v818_v22 = vpop.f32.mrb[11].mxu0  ;;  %v585_v23 = vpop.f32.mrb[11].mxu1 }
 0x10d   : > { %648 = vst.msk [vmem:[%s1037_s18 + $0x8] sm:$0xf] %vm645_vm1, %v780_v14  ;;  %v781_v24 = vpack.c.bf16 %v608_v15, %v608_v15  ;;  %v518_v25 = vadd.f32 %v816_v16, %v733_v42  ;;  %v819_v26 = vadd.f32 %v818_v22, %v817_v17 }
 0x10e   : > { %v784_v27 = vpack.c.bf16 %v611_v20, %v611_v20  ;;  %v612_v29 = vadd.f32 %v604_v19, %v594_v21 }
 0x10f   : > { %649 = vst.msk [vmem:[%s1037_s18 + $0xc] sm:$0xf] %vm645_vm1, %v781_v24  ;;  %v583_v30 = vadd.f32 %v582_v12, %v518_v25  ;;  %v521_v31 = vadd.f32 %v819_v26, %v733_v42 }
 0x110   : > { %652 = vst.msk [vmem:[%s1037_s18 + $0x18] sm:$0xf] %vm645_vm1, %v784_v27  ;;  %v785_v32 = vpack.c.bf16 %v612_v29, %v612_v29 }
 0x111   : > { %v609_v34 = vadd.f32 %v601_v28, %v583_v30  ;;  %v586_v35 = vadd.f32 %v585_v23, %v521_v31 }
 0x112   : > { %653 = vst.msk [vmem:[%s1037_s18 + $0x1c] sm:$0xf] %vm645_vm1, %v785_v32 }
 0x113   : > { %v782_v36 = vpack.c.bf16 %v609_v34, %v609_v34  ;;  %v610_v37 = vadd.f32 %v602_v33, %v586_v35 }
 0x115   : > { %650 = vst.msk [vmem:[%s1037_s18 + $0x10] sm:$0xf] %vm645_vm1, %v782_v36  ;;  %v783_v38 = vpack.c.bf16 %v610_v37, %v610_v37 }
 0x117   : > { %651 = vst.msk [vmem:[%s1037_s18 + $0x14] sm:$0xf] %vm645_vm1, %v783_v38 }
 0x118 PF: > { %s14_s15 = sadd.s32 1, %s909_s15  }
 0x119   : > { %p11_p4 = scmp.ge.s32.totalorder %s14_s15, 4  }
 0x11b   :  { %13 = sbr.rel (!%p11_p4) target bundleno = 1 (0x1), region = 69 }

// kernel: multilevel_visual_collab.23
= control target key start
LH: loop header
LB: loop body
LE: loop exit
PB: predicated region body
PF: predicated region fallthrough
CT: control target
= control target key end

     0   :  { %8 = vsyncpa [#allocation3], 0  ;;  %s1945_s0 = inlined_call_operand.vmem [shape: bf16[128,864], index: 0, kind: input, shape index: {}]   ;;  %s1946_s1 = inlined_call_operand.vmem [shape: bf16[864,32], index: 1, kind: input, shape index: {}]   ;;  %s1947_s2 = inlined_call_operand.vmem [shape: f32[1,32], index: 2, kind: input, shape index: {}]   ;;  %s1948_s3 = inlined_call_operand.hbm [shape: f32[128,32], index: 3, kind: output, shape index: {}]  }
   0x1   :  { %10 = vsyncpa [#allocation3 + $0x1], 0  ;;  %s1618_s12 = smov 0   ;;  %s1620_s13 = smov 0  }
   0x2   :  { %s1622_s14 = smov 0   ;;  %s1624_s15 = smov 0  }
   0x3 LB: > { %s1639_s16 = sadd.s32 4294967295, %s1593_s15   ;;  %s1145_s17 = sadd.s32 4294967294, %s1593_s15   ;;  %s1593_s15 = sphi %s1624_s15, %s1954_s15   ;;  %s1589_s14 = sphi %s1622_s14, %s1953_s14   ;;  %s1585_s13 = sphi %s1620_s13, %s1952_s13   ;;  %s1581_s12 = sphi %s1618_s12, %s1951_s12  }
   0x4   : > { %s1643_s18 = sadd.s32 1, %s1593_s15   ;;  %s91_s19 = sadd.s32 1, %s1589_s14 }
   0x5   : > { %s88_s20 = ssub.s32 %s1593_s15, %s1643_s18  ;;  %p101_p0 = scmp.ne.s32.totalorder %s1589_s14, %s1585_s13 }
   0x6   : > { %p89_p1 = scmp.eq.s32.totalorder %s88_s20, 0  ;;  %p102_p2 = scmp.eq.s32.totalorder %s1639_s16, 1 }
   0x7   : > { %p107_p3 = scmp.ne.s32.totalorder %s1585_s13, %s1581_s12  ;;  %p108_p4 = scmp.eq.s32.totalorder %s1145_s17, 1 }
   0x8   : > { %s1654_s21 = scalar_select %p89_p1, %s1589_s14, %s91_s19  }
   0x9   : > { %p1656_p5 = por %p102_p2, %p101_p0  ;;  %p1660_p6 = por %p108_p4, %p107_p3 }
   0xa   : > { %p1148_p7 = scmp.ge.s32.totalorder %s1593_s15, 1  ;;  %p142_p8 = scmp.lt.s32.totalorder %s1593_s15, 3 }
   0xc   : > { %p143_p9 = pnand %p1148_p7, %p142_p8 }
   0xd   : > { %v1437_v0 = vld [vmem:[%s1946_s1 + $0x40] sm:$0xff] (!%p143_p9)   ;;  %v1441_v4 = vld [vmem:[%s1946_s1 + $0x48] sm:$0xff] (!%p143_p9)   ;;  %v1445_v8 = vld [vmem:[%s1946_s1 + $0x50] sm:$0xff] (!%p143_p9)   ;;  %s1150_s7 = sshll.u32 (!%p143_p9), %s1639_s16, 3  ;;  %vm787_vm0 = vcmask (!%p143_p9), 785408   ;;  %vm1060_vm1 = vcmask (!%p143_p9), 261120  }
   0xe   : > { %146 = sbr.rel (%p143_p9) target bundleno = 338 (0x152), region = 32  ;;  %v1438_v1 = vld [vmem:[%s1946_s1] sm:$0xff] (!%p143_p9)   ;;  %1245 = vmatprep.subr.bf16.mxu0 (!%p143_p9), %v1437_v0  ;;  %v1442_v5 = vld [vmem:[%s1946_s1 + $0x8] sm:$0xff] (!%p143_p9)   ;;  %v1446_v9 = vld [vmem:[%s1946_s1 + $0x10] sm:$0xff] (!%p143_p9)   ;;  %p168_p10 = scmp.lt.s32.totalorder (!%p143_p9), %s1150_s7, 15 }
   0xf   : > { %v1439_v2 = vld [vmem:[%s1946_s1 + $0xc0] sm:$0xff] (!%p143_p9)   ;;  %1246 = vmatpush3.bf16.msra.mxu0 (!%p143_p9), %v1438_v1  ;;  %v1443_v6 = vld [vmem:[%s1946_s1 + $0xc8] sm:$0xff] (!%p143_p9)   ;;  %v1447_v10 = vld [vmem:[%s1946_s1 + $0xd0] sm:$0xff] (!%p143_p9)   ;;  %s1244_s10 = sshll.u32 (!%p143_p9), %s1639_s16, 10  ;;  %s1595_s25 = smov (!%p143_p9), [#allocation2]  }
  0x10   : > { %v1440_v3 = vld [vmem:[%s1946_s1 + $0x80] sm:$0xff] (!%p143_p9)   ;;  %1285 = vmatprep.subr.bf16.mxu1 (!%p143_p9), %v1439_v2  ;;  %1247 = vmatprep.subr.bf16.mxu0 (!%p143_p9), %v1441_v4  ;;  %v1444_v7 = vld [vmem:[%s1946_s1 + $0x88] sm:$0xff] (!%p143_p9)   ;;  %v1448_v11 = vld [vmem:[%s1946_s1 + $0x90] sm:$0xff] (!%p143_p9)   ;;  %s1894_s20 = scalar_lea.hbm (!%p143_p9), %s1948_s3, %s1244_s10  ;;  %s1535_s26 = sshll.u32 (!%p143_p9), %s1595_s25, 4  ;;  %s1536_s26 = int_to_ptr.vmem [resolvable:$false] %s1535_s26 }
  0x11   : > { %1286 = vmatpush3.bf16.msra.mxu1 (!%p143_p9), %v1440_v3  ;;  %v1449_v12 = vld [vmem:[%s1946_s1 + $0x58] sm:$0xff] (!%p143_p9)   ;;  %v1453_v16 = vld [vmem:[%s1946_s1 + $0x60] sm:$0xff] (!%p143_p9)   ;;  %v1457_v20 = vld [vmem:[%s1946_s1 + $0x68] sm:$0xff] (!%p143_p9)   ;;  %s1537_s27 = scalar_lea.vmem (!%p143_p9), %s1536_s26, 2048 }
  0x12   : > { %1287 = vmatprep.subr.bf16.mxu1 (!%p143_p9), %v1443_v6  ;;  %v1450_v13 = vld [vmem:[%s1946_s1 + $0x18] sm:$0xff] (!%p143_p9)   ;;  %v1454_v17 = vld [vmem:[%s1946_s1 + $0x20] sm:$0xff] (!%p143_p9)   ;;  %v1458_v21 = vld [vmem:[%s1946_s1 + $0x28] sm:$0xff] (!%p143_p9)  }
  0x13   : > { %1248 = vmatpush3.bf16.msra.mxu0 (!%p143_p9), %v1442_v5  ;;  %v1451_v14 = vld [vmem:[%s1946_s1 + $0xd8] sm:$0xff] (!%p143_p9)   ;;  %v1455_v18 = vld [vmem:[%s1946_s1 + $0xe0] sm:$0xff] (!%p143_p9)   ;;  %v1459_v22 = vld [vmem:[%s1946_s1 + $0xe8] sm:$0xff] (!%p143_p9)  }
  0x14   : > { %1249 = vmatprep.subr.bf16.mxu0 (!%p143_p9), %v1445_v8  ;;  %v1452_v15 = vld [vmem:[%s1946_s1 + $0x98] sm:$0xff] (!%p143_p9)   ;;  %v1456_v19 = vld [vmem:[%s1946_s1 + $0xa0] sm:$0xff] (!%p143_p9)   ;;  %v1460_v23 = vld [vmem:[%s1946_s1 + $0xa8] sm:$0xff] (!%p143_p9)  }
  0x15   : > { %1288 = vmatpush3.bf16.msra.mxu1 %v1444_v7  ;;  %s1956_s7 = smov (!%p168_p10, %s1150_s7), 15  ;;  %v1461_v24 = vld [vmem:[%s1946_s1 + $0x70] sm:$0xff]   ;;  %v1465_v28 = vld [vmem:[%s1946_s1 + $0x78] sm:$0xff]   ;;  %v1472_v34 = vld [vmem:[%s1946_s1 + $0x140] sm:$0xff]  }
  0x16   : > { %1289 = vmatprep.subr.bf16.mxu1 %v1447_v10  ;;  %s1395_s19 = smul.u32 28, %s1956_s7  ;;  %v1462_v25 = vld [vmem:[%s1946_s1 + $0x30] sm:$0xff]   ;;  %v1466_v29 = vld [vmem:[%s1946_s1 + $0x38] sm:$0xff]   ;;  %v1476_v37 = vld [vmem:[%s1946_s1 + $0x100] sm:$0xff]  }
  0x17   : > { %1250 = vmatpush3.bf16.msra.mxu0 %v1446_v9  ;;  %v1463_v26 = vld [vmem:[%s1946_s1 + $0xf0] sm:$0xff]   ;;  %v1467_v30 = vld [vmem:[%s1946_s1 + $0xf8] sm:$0xff]   ;;  %v1477_v38 = vld [vmem:[%s1946_s1 + $0x148] sm:$0xff]  }
  0x18   : > { %1251 = vmatprep.subr.bf16.mxu0 %v1449_v12  ;;  %v1464_v27 = vld [vmem:[%s1946_s1 + $0xb0] sm:$0xff]   ;;  %s1757_s5 = scalar_lea.vmem %s1945_s0, %s1395_s19  ;;  %v1471_v33 = vld [vmem:[%s1946_s1 + $0xb8] sm:$0xff]   ;;  %v1478_v39 = vld [vmem:[%s1946_s1 + $0x108] sm:$0xff]  }
  0x19   : > { %1290 = vmatpush3.bf16.msra.mxu1 %v1448_v11  ;;  %v1468_v31 = vld [vmem:[%s1757_s5] ss:$28 sps:$4 sm:$0xff]   ;;  %v1473_v35 = vld [vmem:[%s1757_s5 + $0x8] ss:$28 sps:$4 sm:$0xff]   ;;  %v1481_v41 = vld [vmem:[%s1757_s5 + $0x38] ss:$28 sps:$4 sm:$0xff]  }
  0x1a   : > { %1291 = vmatprep.subr.bf16.mxu1 %v1451_v14  ;;  %v1470_v32 = vld [vmem:[%s1757_s5 + $0x4] ss:$28 sps:$4 sm:$0xff]   ;;  %v1475_v36 = vld [vmem:[%s1757_s5 + $0xc] ss:$28 sps:$4 sm:$0xff]   ;;  %v1479_v40 = vld [vmem:[%s1757_s5 + $0x3c] ss:$28 sps:$4 sm:$0xff]  }
  0x1b   : > { %1252 = vmatpush3.bf16.msra.mxu0 %v1450_v13  ;;  %832 = vmatprep.mubr.bf16.mxu0 %v1470_v32  ;;  %v1482_v42 = vld [vmem:[%s1946_s1 + $0x150] sm:$0xff]   ;;  %v1483_v43 = vld [vmem:[%s1757_s5 + $0x44] ss:$28 sps:$4 sm:$0xff]   ;;  %v1487_v46 = vld [vmem:[%s1946_s1 + $0x158] sm:$0xff]  }
  0x1c   : > { %1253 = vmatprep.subr.bf16.mxu0 %v1453_v16  ;;  %897 = vmatprep.mubr.bf16.mxu1 %v1475_v36  ;;  %v1485_v44 = vld [vmem:[%s1946_s1 + $0x110] sm:$0xff]   ;;  %v1486_v45 = vld [vmem:[%s1757_s5 + $0x40] ss:$28 sps:$4 sm:$0xff]   ;;  %v1494_v52 = vld [vmem:[%s1946_s1 + $0x188] sm:$0xff]  }
  0x1d   : > { %1292 = vmatpush3.bf16.msra.mxu1 %v1452_v15  ;;  %v1488_v47 = vld [vmem:[%s1946_s1 + $0x180] sm:$0xff]   ;;  %v1489_v48 = vld [vmem:[%s1946_s1 + $0x118] sm:$0xff]   ;;  %v1490_v49 = vld [vmem:[%s1757_s5 + $0x74] ss:$28 sps:$4 sm:$0xff]  }
  0x1e   : > { %1293 = vmatprep.subr.bf16.mxu1 %v1455_v18  ;;  %v1492_v50 = vld [vmem:[%s1757_s5 + $0x70] ss:$28 sps:$4 sm:$0xff]   ;;  %v1493_v51 = vld [vmem:[%s1946_s1 + $0x160] sm:$0xff]   ;;  %v1495_v53 = vld [vmem:[%s1757_s5 + $0x7c] ss:$28 sps:$4 sm:$0xff]  }
  0x1f   : > { %1254 = vmatpush3.bf16.msra.mxu0 %v1454_v17  ;;  %v1497_v54 = vld [vmem:[%s1946_s1 + $0x120] sm:$0xff]   ;;  %v1498_v55 = vld [vmem:[%s1757_s5 + $0x78] ss:$28 sps:$4 sm:$0xff]   ;;  %v1499_v56 = vld [vmem:[%s1946_s1 + $0x168] sm:$0xff]  }
  0x20   : > { %1255 = vmatprep.subr.bf16.mxu0 %v1457_v20  ;;  %v1500_v57 = vld [vmem:[%s1946_s1 + $0x190] sm:$0xff]   ;;  %v1501_v58 = vld [vmem:[%s1946_s1 + $0x128] sm:$0xff]   ;;  %v1506_v62 = vld [vmem:[%s1946_s1 + $0x198] sm:$0xff]  }
  0x21   : > { %1294 = vmatpush3.bf16.msra.mxu1 %v1456_v19  ;;  %v1502_v59 = vld [vmem:[%s1757_s5 + $0xac] ss:$28 sps:$4 sm:$0xff]   ;;  %v1505_v61 = vld [vmem:[%s1946_s1 + $0x170] sm:$0xff]   ;;  %v1511_v2 = vld [vmem:[%s1946_s1 + $0x178] sm:$0xff]  }
  0x22   : > { %1295 = vmatprep.subr.bf16.mxu1 %v1459_v22  ;;  %v1504_v60 = vld [vmem:[%s1757_s5 + $0xa8] ss:$28 sps:$4 sm:$0xff]   ;;  %v1507_v63 = vld [vmem:[%s1757_s5 + $0xb4] ss:$28 sps:$4 sm:$0xff]   ;;  %v1513_v4 = vld [vmem:[%s1946_s1 + $0x138] sm:$0xff]  }
  0x23   : > { %1256 = vmatpush3.bf16.msra.mxu0 %v1458_v21  ;;  %v1509_v0 = vld [vmem:[%s1946_s1 + $0x130] sm:$0xff]   ;;  %v1512_v3 = vld [vmem:[%s1946_s1 + $0x1a0] sm:$0xff]   ;;  %v1517_v7 = vld [vmem:[%s1946_s1 + $0x1a8] sm:$0xff]  }
  0x24   : > { %1257 = vmatprep.subr.bf16.mxu0 %v1461_v24  ;;  %v1510_v1 = vld [vmem:[%s1757_s5 + $0xb0] ss:$28 sps:$4 sm:$0xff]   ;;  %v1518_v8 = vld [vmem:[%s1757_s5 + $0x18] ss:$28 sps:$4 sm:$0xff]   ;;  %v1526_v11 = vld [vmem:[%s1757_s5 + $0x88] ss:$28 sps:$4 sm:$0xff]  }
  0x25   : > { %1296 = vmatpush3.bf16.msra.mxu1 %v1460_v23  ;;  %v1514_v5 = vld [vmem:[%s1757_s5 + $0x10] ss:$28 sps:$4 sm:$0xff]   ;;  %v1522_v12 = vld [vmem:[%s1757_s5 + $0x48] ss:$28 sps:$4 sm:$0xff]   ;;  %v1527_v14 = vld [vmem:[%s1757_s5 + $0xc0] ss:$28 sps:$4 sm:$0xff]  }
  0x26   : > { %1297 = vmatprep.subr.bf16.mxu1 %v1463_v26  ;;  %v1516_v6 = vld [vmem:[%s1757_s5 + $0x14] ss:$28 sps:$4 sm:$0xff]   ;;  %v1520_v10 = vld [vmem:[%s1757_s5 + $0x4c] ss:$28 sps:$4 sm:$0xff]   ;;  %v1523_v13 = vld [vmem:[%s1757_s5 + $0x84] ss:$28 sps:$4 sm:$0xff]  }
  0x27   : > { %1258 = vmatpush3.bf16.msra.mxu0 %v1462_v25  ;;  %v1519_v9 = vld [vmem:[%s1757_s5 + $0x50] ss:$28 sps:$4 sm:$0xff]   ;;  %v1525_v15 = vld [vmem:[%s1757_s5 + $0x80] ss:$28 sps:$4 sm:$0xff]   ;;  %v1530_v17 = vld [vmem:[%s1757_s5 + $0xb8] ss:$28 sps:$4 sm:$0xff]  }
  0x28   : > { %1259 = vmatprep.subr.bf16.mxu0 %v1465_v28  ;;  %v1528_v16 = vld [vmem:[%s1757_s5 + $0xbc] ss:$28 sps:$4 sm:$0xff]   ;;  %v1152_v19 = vld [vmem:[%s1947_s2] ss:$0 sm:$0xff]  ;;  %s164_s5 = sand.u32 1, %s1585_s13  }
  0x29   : > { %1298 = vmatpush3.bf16.msra.mxu1 %v1464_v27  ;;  %s1149_s8 = sshll.u32 %s164_s5, 6  ;;  %s1904_s16 = scalar_lea.sflag [#allocation3], %s164_s5 }
  0x2a   : > { %1299 = vmatprep.subr.bf16.mxu1 %v1467_v30  ;;  %s1874_s9 = scalar_lea.vmem [#allocation2], %s1149_s8 }
  0x2b   : > { %1260 = vmatpush3.bf16.msra.mxu0 %v1466_v29  ;;  %s1083_s11 = sshll.u32 %s1874_s9, 4  ;;  %s1896_s11 = int_to_ptr.vmem [resolvable:$true] %s1083_s11 }
  0x2c   : > { %1325 = vmatprep.subr.bf16.mxu0 %v1472_v34  ;;  %s1531_s24 = scalar_lea.vmem %s1896_s11, 1024  ;;  %p1538_p0 = scmp.lt.s32.totalorder %s1896_s11, %s1536_s26 }
  0x2d   : > { %1300 = vmatpush3.bf16.msra.mxu1 %v1471_v33  ;;  %p1532_p11 = scmp.ne.s32.totalorder %s1896_s11, %s1531_s24  ;;  %p1539_p1 = scmp.lt.s32.totalorder %s1537_s27, %s1531_s24 }
  0x2e   : > { %833 = vmatmul.mubr.bf16.vlgmr.msra.gmra.mrb[0].mxu0 %v1468_v31  ;;  %1375 = vmatprep.subr.bf16.mxu1 %v1488_v47 }
  0x2f   : > { %1326 = vmatpush3.bf16.msra.mxu0 %v1476_v37  ;;  %840 = vmatprep.mubr.bf16.mxu0 %v1479_v40  ;;  %p1533_p12 = pnand %p1532_p11, %p1656_p5  ;;  %p1540_p2 = por %p1539_p1, %p1538_p0 }
  0x30   : > { %898 = vmatmul.mubr.bf16.vlgmr.msra.gmra.mrb[0].mxu1 %v1473_v35  ;;  %1327 = vmatprep.subr.bf16.mxu0 %v1477_v38 }
  0x31   : > { %905 = vmatprep.mubr.bf16.mxu1 %v1483_v43  ;;  %1376 = vmatpush3.bf16.msra.mxu1 %v1488_v47  ;;  %p1534_p13 = pneg %p1533_p12 }
  0x32   : > { %1377 = vmatprep.subr.bf16.mxu1 %v1494_v52 }
  0x33   : > { %1328 = vmatpush3.bf16.msra.mxu0 %v1478_v39  ;;  %p1541_p3 = pnand %p1540_p2, %p1534_p13 }
  0x34   : > { %1329 = vmatprep.subr.bf16.mxu0 %v1482_v42 }
  0x35   : > { %1378 = vmatpush3.bf16.msra.mxu1 %v1494_v52 }
  0x36   : > { %841 = vmatmul.mubr.bf16.gmra.mrb[4].mxu0 %v1481_v41  ;;  %1379 = vmatprep.subr.bf16.mxu1 %v1500_v57 }
  0x37   : > { %1330 = vmatpush3.bf16.msra.mxu0 %v1485_v44  ;;  %848 = vmatprep.mubr.bf16.mxu0 %v1490_v49 }
  0x38   : > { %906 = vmatmul.mubr.bf16.gmra.mrb[4].mxu1 %v1486_v45  ;;  %1331 = vmatprep.subr.bf16.mxu0 %v1487_v46 }
  0x39   : > { %913 = vmatprep.mubr.bf16.mxu1 %v1495_v53  ;;  %1380 = vmatpush3.bf16.msra.mxu1 %v1500_v57 }
  0x3a   : > { %1381 = vmatprep.subr.bf16.mxu1 %v1506_v62 }
  0x3b   : > { %1332 = vmatpush3.bf16.msra.mxu0 %v1489_v48 }
  0x3c   : > { %1333 = vmatprep.subr.bf16.mxu0 %v1493_v51 }
  0x3d   : > { %1382 = vmatpush3.bf16.msra.mxu1 %v1506_v62 }
  0x3e   : > { %849 = vmatmul.mubr.bf16.gmra.mrb[8].mxu0 %v1492_v50  ;;  %1383 = vmatprep.subr.bf16.mxu1 %v1512_v3 }
  0x3f   : > { %1334 = vmatpush3.bf16.msra.mxu0 %v1497_v54  ;;  %856 = vmatprep.mubr.bf16.mxu0 %v1502_v59 }
  0x40   : > { %914 = vmatmul.mubr.bf16.gmra.mrb[8].mxu1 %v1498_v55  ;;  %1335 = vmatprep.subr.bf16.mxu0 %v1499_v56 }
  0x41   : > { %921 = vmatprep.mubr.bf16.mxu1 %v1507_v63  ;;  %1384 = vmatpush3.bf16.msra.mxu1 %v1512_v3 }
  0x42   : > { %1385 = vmatprep.subr.bf16.mxu1 %v1517_v7 }
  0x43   : > { %1336 = vmatpush3.bf16.msra.mxu0 %v1501_v58 }
  0x44   : > { %1337 = vmatprep.subr.bf16.mxu0 %v1505_v61 }
  0x45   : > { %1386 = vmatpush3.bf16.msra.mxu1 %v1517_v7 }
  0x46   : > { %857 = vmatmul.mubr.bf16.gmra.mrb[12].mxu0 %v1504_v60 }
  0x47   : > { %1338 = vmatpush3.bf16.msra.mxu0 %v1509_v0  ;;  %962 = vmatprep.mubr.bf16.mxu0 %v1516_v6 }
  0x48   : > { %922 = vmatmul.mubr.bf16.gmra.mrb[12].mxu1 %v1510_v1  ;;  %1339 = vmatprep.subr.bf16.mxu0 %v1511_v2 }
  0x49   : > { %1387 = vmatprep.mubr.msk.bf16.mxu1 %vm787_vm0, %v1518_v8 }
  0x4b   : > { %1340 = vmatpush3.bf16.msra.mxu0 %v1513_v4 }
  0x4e   : > { %963 = vmatmul.mubr.bf16.vlgmr.msra.gmra.mrb[16].mxu0 %v1514_v5 }
  0x4f   : > { %970 = vmatprep.mubr.bf16.mxu0 %v1520_v10 }
  0x50   : > { %1388 = vmatmul.mubr.msk.bf16.vlgmr.msra.gmra.mrb[16].mxu1 %vm787_vm0, %v1519_v9 }
  0x51   : > { %1391 = vmatprep.mubr.msk.bf16.mxu1 %vm787_vm0, %v1526_v11 }
  0x56   : > { %971 = vmatmul.mubr.bf16.gmra.mrb[20].mxu0 %v1522_v12 }
  0x57   : > { %978 = vmatprep.mubr.bf16.mxu0 %v1523_v13 }
  0x58   : > { %1392 = vmatmul.mubr.msk.bf16.gmra.mrb[20].mxu1 %vm787_vm0, %v1527_v14 }
  0x5e   : > { %979 = vmatmul.mubr.bf16.gmra.mrb[24].mxu0 %v1525_v15 }
  0x5f   : > { %986 = vmatprep.mubr.bf16.mxu0 %v1528_v16 }
  0x66   : > { %987 = vmatmul.mubr.bf16.gmra.mrb[28].mxu0 %v1530_v17 }
 0x101   : > { %v1261_v18 = vpop.f32.mrb[0].mxu0 }
 0x102   : > { %v1262_v20 = vpop.f32.mrb[1].mxu0 }
 0x103   : > { %v1263_v21 = vadd.f32 %v1262_v20, %v1261_v18  ;;  %v1264_v22 = vpop.f32.mrb[2].mxu0  ;;  %v1301_v23 = vpop.f32.mrb[0].mxu1 }
 0x104   : > { %v1265_v24 = vpop.f32.mrb[3].mxu0  ;;  %v1302_v27 = vpop.f32.mrb[1].mxu1 }
 0x105   : > { %v835_v25 = vadd.f32 %v1263_v21, %v1152_v19  ;;  %v1266_v26 = vadd.f32 %v1265_v24, %v1264_v22  ;;  %v1303_v28 = vadd.f32 %v1302_v27, %v1301_v23  ;;  %v1304_v29 = vpop.f32.mrb[2].mxu1 }
 0x106   : > { %v1305_v31 = vpop.f32.mrb[3].mxu1 }
 0x107   : > { %v838_v30 = vadd.f32 %v1266_v26, %v1152_v19  ;;  %v900_v32 = vadd.f32 %v1303_v28, %v835_v25  ;;  %v1306_v33 = vadd.f32 %v1305_v31, %v1304_v29 }
 0x109   : > { %v1267_v34 = vpop.f32.mrb[4].mxu0  ;;  %v903_v35 = vadd.f32 %v1306_v33, %v838_v30 }
 0x10a   : > { %v1268_v36 = vpop.f32.mrb[5].mxu0 }
 0x10b   : > { %v1269_v37 = vadd.f32 %v1268_v36, %v1267_v34  ;;  %v1270_v38 = vpop.f32.mrb[6].mxu0  ;;  %v1307_v39 = vpop.f32.mrb[4].mxu1 }
 0x10c   : > { %v1271_v40 = vpop.f32.mrb[7].mxu0  ;;  %v1308_v43 = vpop.f32.mrb[5].mxu1 }
 0x10d   : > { %v843_v41 = vadd.f32 %v1269_v37, %v1152_v19  ;;  %v1272_v42 = vadd.f32 %v1271_v40, %v1270_v38  ;;  %v1309_v44 = vadd.f32 %v1308_v43, %v1307_v39  ;;  %v1310_v45 = vpop.f32.mrb[6].mxu1 }
 0x10e   : > { %v1311_v47 = vpop.f32.mrb[7].mxu1 }
 0x10f   : > { %v846_v46 = vadd.f32 %v1272_v42, %v1152_v19  ;;  %v908_v48 = vadd.f32 %v1309_v44, %v843_v41  ;;  %v1312_v49 = vadd.f32 %v1311_v47, %v1310_v45 }
 0x111   : > { %v1273_v50 = vpop.f32.mrb[8].mxu0  ;;  %v1869_v51 = vadd.f32 %v1312_v49, %v846_v46 }
 0x112   : > { %v1274_v52 = vpop.f32.mrb[9].mxu0 }
 0x113   : > { %v1275_v53 = vadd.f32 %v1274_v52, %v1273_v50  ;;  %v1276_v54 = vpop.f32.mrb[10].mxu0  ;;  %v1313_v55 = vpop.f32.mrb[8].mxu1 }
 0x114   : > { %v1277_v56 = vpop.f32.mrb[11].mxu0  ;;  %v1314_v59 = vpop.f32.mrb[9].mxu1 }
 0x115   : > { %v851_v57 = vadd.f32 %v1275_v53, %v1152_v19  ;;  %v1278_v58 = vadd.f32 %v1277_v56, %v1276_v54  ;;  %v1315_v60 = vadd.f32 %v1314_v59, %v1313_v55  ;;  %v1316_v61 = vpop.f32.mrb[10].mxu1 }
 0x116   : > { %v1317_v63 = vpop.f32.mrb[11].mxu1 }
 0x117   : > { %v854_v62 = vadd.f32 %v1278_v58, %v1152_v19  ;;  %v916_v0 = vadd.f32 %v1315_v60, %v851_v57  ;;  %v1318_v1 = vadd.f32 %v1317_v63, %v1316_v61 }
 0x119   : > { %v1279_v2 = vpop.f32.mrb[12].mxu0  ;;  %v919_v3 = vadd.f32 %v1318_v1, %v854_v62 }
 0x11a   : > { %v1280_v4 = vpop.f32.mrb[13].mxu0 }
 0x11b   : > { %v1281_v5 = vadd.f32 %v1280_v4, %v1279_v2  ;;  %v1282_v6 = vpop.f32.mrb[14].mxu0  ;;  %v1319_v7 = vpop.f32.mrb[12].mxu1 }
 0x11c   : > { %v1283_v8 = vpop.f32.mrb[15].mxu0  ;;  %v1320_v11 = vpop.f32.mrb[13].mxu1 }
 0x11d   : > { %v859_v9 = vadd.f32 %v1281_v5, %v1152_v19  ;;  %v1284_v10 = vadd.f32 %v1283_v8, %v1282_v6  ;;  %v1321_v12 = vadd.f32 %v1320_v11, %v1319_v7  ;;  %v1322_v13 = vpop.f32.mrb[14].mxu1 }
 0x11e   : > { %v1323_v15 = vpop.f32.mrb[15].mxu1 }
 0x11f   : > { %v862_v14 = vadd.f32 %v1284_v10, %v1152_v19  ;;  %v924_v16 = vadd.f32 %v1321_v12, %v859_v9  ;;  %v1324_v17 = vadd.f32 %v1323_v15, %v1322_v13 }
 0x121   : > { %v927_v18 = vadd.f32 %v1324_v17, %v862_v14  ;;  %v1341_v20 = vpop.f32.mrb[16].mxu0 }
 0x122   : > { %v1342_v21 = vpop.f32.mrb[17].mxu0 }
 0x123   : > { %v1343_v22 = vadd.f32 %v1342_v21, %v1341_v20  ;;  %v1344_v23 = vpop.f32.mrb[18].mxu0  ;;  %v1389_v25 = vpop.f32.mrb[16].mxu1 }
 0x124   : > { %v1345_v24 = vpop.f32.mrb[19].mxu0  ;;  %v1029_v28 = vpop.f32.mrb[17].mxu1 }
 0x125   : > { %v1346_v26 = vadd.f32 %v1345_v24, %v1344_v23  ;;  %v965_v27 = vadd.f32 %v1343_v22, %v900_v32  ;;  %v1390_v29 = vpop.f32.mrb[18].mxu1 }
 0x126   : > { %v1032_v31 = vpop.f32.mrb[19].mxu1 }
 0x127   : > { %v1030_v30 = vadd.f32 %v1029_v28, %v965_v27  ;;  %v968_v19 = vadd.f32 %v1346_v26, %v903_v35 }
 0x129   : > { %1061 = vst.msk [vmem:[%s1874_s9] sm:$0xff] %vm1060_vm1, %v1030_v30  ;;  %v1033_v33 = vadd.f32 %v1032_v31, %v968_v19  ;;  %v1347_v34 = vpop.f32.mrb[20].mxu0 }
 0x12a   : > { %v1348_v36 = vpop.f32.mrb[21].mxu0 }
 0x12b   : > { %1062 = vst.msk [vmem:[%s1874_s9 + $0x8] sm:$0xff] %vm1060_vm1, %v1033_v33  ;;  %v1349_v32 = vadd.f32 %v1348_v36, %v1347_v34  ;;  %v1350_v37 = vpop.f32.mrb[22].mxu0  ;;  %v1393_v39 = vpop.f32.mrb[20].mxu1 }
 0x12c   : > { %v1351_v38 = vpop.f32.mrb[23].mxu0  ;;  %v1045_v41 = vpop.f32.mrb[21].mxu1 }
 0x12d   : > { %v973_v40 = vadd.f32 %v1349_v32, %v908_v48  ;;  %v1352_v35 = vadd.f32 %v1351_v38, %v1350_v37  ;;  %v1394_v42 = vpop.f32.mrb[22].mxu1 }
 0x12e   : > { %v1048_v45 = vpop.f32.mrb[23].mxu1 }
 0x12f   : > { %v1038_v43 = vadd.f32 %v1389_v25, %v973_v40  ;;  %v976_v44 = vadd.f32 %v1352_v35, %v1869_v51 }
 0x131   : > { %1063 = vst.msk [vmem:[%s1874_s9 + $0x10] sm:$0xff] %vm1060_vm1, %v1038_v43  ;;  %v1041_v46 = vadd.f32 %v1390_v29, %v976_v44  ;;  %v1353_v47 = vpop.f32.mrb[24].mxu0 }
 0x132   : > { %v1354_v49 = vpop.f32.mrb[25].mxu0 }
 0x133   : > { %1064 = vst.msk [vmem:[%s1874_s9 + $0x18] sm:$0xff] %vm1060_vm1, %v1041_v46  ;;  %v1355_v50 = vadd.f32 %v1354_v49, %v1353_v47  ;;  %v1356_v52 = vpop.f32.mrb[26].mxu0 }
 0x134   : > { %v1357_v48 = vpop.f32.mrb[27].mxu0 }
 0x135   : > { %v1358_v53 = vadd.f32 %v1357_v48, %v1356_v52  ;;  %v981_v54 = vadd.f32 %v1355_v50, %v916_v0 }
 0x137   : > { %v1046_v55 = vadd.f32 %v1045_v41, %v981_v54  ;;  %v984_v56 = vadd.f32 %v1358_v53, %v919_v3 }
 0x139   : > { %1065 = vst.msk [vmem:[%s1874_s9 + $0x20] sm:$0xff] %vm1060_vm1, %v1046_v55  ;;  %v1049_v51 = vadd.f32 %v1048_v45, %v984_v56  ;;  %v1359_v57 = vpop.f32.mrb[28].mxu0 }
 0x13a   : > { %v1360_v58 = vpop.f32.mrb[29].mxu0 }
 0x13b   : > { %1066 = vst.msk [vmem:[%s1874_s9 + $0x28] sm:$0xff] %vm1060_vm1, %v1049_v51  ;;  %v1361_v59 = vadd.f32 %v1360_v58, %v1359_v57  ;;  %v1362_v60 = vpop.f32.mrb[30].mxu0 }
 0x13c   : > { %v1363_v61 = vpop.f32.mrb[31].mxu0 }
 0x13d   : > { %v989_v62 = vadd.f32 %v1361_v59, %v924_v16  ;;  %v1364_v63 = vadd.f32 %v1363_v61, %v1362_v60 }
 0x13f   : > { %v1054_v0 = vadd.f32 %v1393_v39, %v989_v62  ;;  %v992_v1 = vadd.f32 %v1364_v63, %v927_v18 }
 0x141   : > { %1067 = vst.msk [vmem:[%s1874_s9 + $0x30] sm:$0xff] %vm1060_vm1, %v1054_v0  ;;  %v1057_v2 = vadd.f32 %v1394_v42, %v992_v1 }
 0x143   : > { %1068 = vst.msk [vmem:[%s1874_s9 + $0x38] sm:$0xff] %vm1060_vm1, %v1057_v2 }
 0x144   : > { %1544 = shalt.err (!%p1541_p3)
}
 0x145   : > { %s1545_s28 = scalar_lea.hbm %s1894_s20, 1024  ;;  %s1549_s7 = scalar_lea.hbm %s1948_s3, 2048 }
 0x146   : > { %p1546_p4 = scmp.ne.s32.totalorder %s1894_s20, %s1545_s28  ;;  %p1550_p9 = scmp.lt.u32.totalorder %s1894_s20, %s1948_s3 }
 0x147   : > { %p1551_p10 = scmp.lt.u32.totalorder %s1549_s7, %s1545_s28  ;;  %p1553_p12 = scmp.lt.u32.totalorder %s1545_s28, %s1894_s20 }
 0x148   : > { %p1547_p7 = pnand %p1546_p4, %p1656_p5 }
 0x149   : > { %p1552_p11 = por %p1551_p10, %p1550_p9 }
 0x14a   : > { %p1548_p8 = pneg %p1547_p7 }
 0x14b   : > { %p1554_p13 = por %p1553_p12, %p1552_p11 }
 0x14d   : > { %p1555_p0 = pnand %p1554_p13, %p1548_p8 }
 0x14f   : > { %1558 = shalt.err (!%p1555_p0)
}
 0x150   : > { %s1596_s5 = smov 128   ;;  %s1597_s8 = smov 8  }
 0x151   : > { %1396 = dma.vmem_to_hbm [thread:$0]  (%p1656_p5), %s1896_s11, 1024, %s1894_s20, %s1904_s16, %s1596_s5, %s1596_s5, %s1597_s8  }
 0x152 PF: > { %p1402_p1 = scmp.ge.s32.totalorder %s1593_s15, 2  ;;  %s1098_s9 = sand.u32 1, %s1581_s12  }
 0x153   : > { %s1099_s10 = scalar_lea.sflag [#allocation3], %s1098_s9 }
 0x154   : > { %p1399_p2 = pnand %p1402_p1, %p1660_p6 }
 0x156   : > { %1576 = dma.done.wait (!%p1399_p2), %s1099_s10, 1024  }
 0x157   : > { %1578 = vsyncadd (!%p1399_p2), %s1099_s10, 4294966272  ;;  %p13_p3 = scmp.ge.s32.totalorder %s1643_s18, 4   ;;  %s1951_s12 = smov %s1585_s13 }
 0x158   : > { %s1952_s13 = smov %s1589_s14  ;;  %s1953_s14 = smov %s1654_s21 }
 0x159   : > { %s1954_s15 = smov %s1643_s18  ;;  %15 = sbr.rel (!%p13_p3) target bundleno = 3 (0x3), region = 67 }
 0x160   :  { %1104 = vsyncpa [#allocation3], 1 }
 0x161   :  { %1106 = vsyncpa [#allocation3 + $0x1], 1 }

</bundles_post_ra>
